<compile_context>
chip_gen: v6e
topology: v6e:2x2x1
jax: 0.10.0
libtpu: 0.0.40
codegen_flags: <defaults>
</compile_context>

<pallas_src>
import jax
import jax.numpy as jnp
from jax.experimental import pallas as pl
from jax.experimental.pallas import tpu as pltpu

NEG_SLOPE = 0.01   # nn.LeakyReLU default negative_slope
LANE = 128         # TPU lane width


def _round_up(x, m):
    return (x + m - 1) // m * m


def _lrelu_f32(v):
    return jnp.where(v > 0, v, NEG_SLOPE * v)


# ----------------------------- fused kernel ---------------------------------
def _make_fused_kernel(dims):
    H, W, C, Ho1, Wo1, Ho2, Wo2, CP, FP = dims

    def kernel(x_ref, w1_ref, b1_ref, w2_ref, b2_ref, w3_ref, b3_ref,
               wl_ref, bl_ref, o_ref, a1_s, a2_s, a3_s):
        cdtype = a1_s.dtype
        x2d = x_ref[0]                                      # (H, W*C)

        # conv1: 3x3 valid + LeakyReLU -> a1_s (Ho1, Wo1*CP)
        for w in range(Wo1):
            acc = jnp.zeros((Ho1, CP), jnp.float32)
            for i in range(3):
                sub = x2d[i:i + Ho1, w * C:(w + 3) * C]     # (Ho1, 3*C)
                acc += jnp.dot(sub, w1_ref[i],
                               preferred_element_type=jnp.float32)
            a1_s[:, w * CP:(w + 1) * CP] = (
                _lrelu_f32(acc + b1_ref[...]).astype(cdtype))

        # conv2: 2x2 valid + LeakyReLU -> a2_s (Ho2, Wo2*CP)
        for w in range(Wo2):
            acc = jnp.zeros((Ho2, CP), jnp.float32)
            for i in range(2):
                sub = a1_s[i:i + Ho2, w * CP:(w + 2) * CP]  # (Ho2, 2*CP)
                acc += jnp.dot(sub, w2_ref[i],
                               preferred_element_type=jnp.float32)
            a2_s[:, w * CP:(w + 1) * CP] = (
                _lrelu_f32(acc + b2_ref[...]).astype(cdtype))

        # conv3: 1x1 + LeakyReLU -> a3_s (Ho2, Wo2*CP)
        for w in range(Wo2):
            acc = jnp.dot(a2_s[:, w * CP:(w + 1) * CP], w3_ref[...],
                          preferred_element_type=jnp.float32)
            a3_s[:, w * CP:(w + 1) * CP] = (
                _lrelu_f32(acc + b3_ref[...]).astype(cdtype))

        # Linear + LeakyReLU (PyTorch NCHW-flatten order folded into wl)
        y = jnp.zeros((1, FP), jnp.float32)
        for h in range(Ho2):
            y += jnp.dot(a3_s[h:h + 1, :], wl_ref[h],
                         preferred_element_type=jnp.float32)
        o_ref[0] = _lrelu_f32(y + bl_ref[...]).astype(o_ref.dtype)

    return kernel


# --------------------------- parameter handling ------------------------------
def init_params(key, observation_shape, features_dim, latent_dim):
    """Random parameters in the PyTorch layouts (Conv2d OIHW, Linear (out,in))."""
    C, H, W = observation_shape
    n_flatten = latent_dim * (H - 3) * (W - 3)
    ks = jax.random.split(key, 8)
    s = 0.1
    return {
        "w1": s * jax.random.normal(ks[0], (latent_dim, C, 3, 3), jnp.float32),
        "b1": s * jax.random.normal(ks[1], (latent_dim,), jnp.float32),
        "w2": s * jax.random.normal(ks[2], (latent_dim, latent_dim, 2, 2), jnp.float32),
        "b2": s * jax.random.normal(ks[3], (latent_dim,), jnp.float32),
        "w3": s * jax.random.normal(ks[4], (latent_dim, latent_dim, 1, 1), jnp.float32),
        "b3": s * jax.random.normal(ks[5], (latent_dim,), jnp.float32),
        "wl": s * jax.random.normal(ks[6], (features_dim, n_flatten), jnp.float32),
        "bl": s * jax.random.normal(ks[7], (features_dim,), jnp.float32),
    }


def prepare_params(params, observation_shape, features_dim, latent_dim,
                   compute_dtype=jnp.bfloat16):
    """One-time repack / zero-pad of the PyTorch-layout params for the kernel."""
    C, H, W = observation_shape
    Ho1, Wo1 = H - 2, W - 2            # after 3x3 valid conv
    Ho2, Wo2 = H - 3, W - 3            # after 2x2 valid conv (1x1 keeps shape)
    CP = _round_up(latent_dim, LANE)   # lane-dense padded hidden channels
    FP = _round_up(features_dim, LANE)
    cpad, fpad = CP - latent_dim, FP - features_dim

    # conv1: (Cout, Cin, 3, 3) -> per row-tap i a (3*Cin, CP) matrix whose rows
    # are ordered (kw-tap j, cin), matching the contiguous input window layout.
    w1 = jnp.transpose(params["w1"], (2, 3, 1, 0))            # (3, 3, Cin, Cout)
    w1 = jnp.pad(w1, ((0, 0), (0, 0), (0, 0), (0, cpad)))
    w1 = w1.reshape(3, 3 * C, CP)

    # conv2: (Cout, Cin, 2, 2) -> per row-tap i a (2*CP, CP) matrix.
    w2 = jnp.transpose(params["w2"], (2, 3, 1, 0))            # (2, 2, Cin, Cout)
    w2 = jnp.pad(w2, ((0, 0), (0, 0), (0, cpad), (0, cpad)))
    w2 = w2.reshape(2, 2 * CP, CP)

    # conv3 (1x1): (Cout, Cin, 1, 1) -> (CP, CP)
    w3 = jnp.transpose(params["w3"], (2, 3, 1, 0))[0, 0]      # (Cin, Cout)
    w3 = jnp.pad(w3, ((0, cpad), (0, cpad)))

    # linear: PyTorch flattens NCHW (channel-major).  Fold that permutation and
    # the channel/feature padding into the weight once: (Ho2, Wo2*CP, FP).
    wl = params["wl"].reshape(features_dim, latent_dim, Ho2, Wo2)
    wl = jnp.transpose(wl, (2, 3, 1, 0))                      # (Ho2, Wo2, Cin, F)
    wl = jnp.pad(wl, ((0, 0), (0, 0), (0, cpad), (0, fpad)))
    wl = wl.reshape(Ho2, Wo2 * CP, FP)

    prepped = {
        "w1": w1.astype(compute_dtype),
        "w2": w2.astype(compute_dtype),
        "w3": w3.astype(compute_dtype),
        "wl": wl.astype(compute_dtype),
        # Biases stay f32: the bias + LeakyReLU epilogue runs in f32 vregs.
        "b1": jnp.pad(params["b1"], (0, cpad)).reshape(1, CP).astype(jnp.float32),
        "b2": jnp.pad(params["b2"], (0, cpad)).reshape(1, CP).astype(jnp.float32),
        "b3": jnp.pad(params["b3"], (0, cpad)).reshape(1, CP).astype(jnp.float32),
        "bl": jnp.pad(params["bl"], (0, fpad)).reshape(1, FP).astype(jnp.float32),
    }
    meta = {
        "dims": (H, W, C, Ho1, Wo1, Ho2, Wo2, CP, FP),
        "features_dim": features_dim,
        "compute_dtype": compute_dtype,
    }
    return prepped, meta


# ------------------------------- forward -------------------------------------
def board_cnn_forward(prepped, meta, observations_nchw):
    """Fused BoardCNN forward; `observations_nchw` is (B, C, H, W) like PyTorch."""
    H, W, C, Ho1, Wo1, Ho2, Wo2, CP, FP = meta["dims"]
    features_dim = meta["features_dim"]
    cdtype = meta["compute_dtype"]
    B = observations_nchw.shape[0]

    # NCHW -> NHWC -> per-sample lane-friendly 2-D (H, W*C) layout, single cast
    # to the MXU operand dtype.  (Tiny XLA glue; everything else is in-kernel.)
    x = jnp.transpose(observations_nchw, (0, 2, 3, 1)).reshape(B, H, W * C)
    x = x.astype(cdtype)

    weight_args = (prepped["w1"], prepped["b1"], prepped["w2"], prepped["b2"],
                   prepped["w3"], prepped["b3"], prepped["wl"], prepped["bl"])

    in_specs = [pl.BlockSpec((1, H, W * C), lambda b: (b, 0, 0))]
    for a in weight_args:
        # Full-array blocks with constant index_maps: weights stay VMEM-resident
        # across the batch grid.
        in_specs.append(pl.BlockSpec(a.shape, lambda b, n=a.ndim: (0,) * n))

    out = pl.pallas_call(
        _make_fused_kernel(meta["dims"]),
        out_shape=jax.ShapeDtypeStruct((B, 1, FP), jnp.float32),
        grid=(B,),
        in_specs=in_specs,
        out_specs=pl.BlockSpec((1, 1, FP), lambda b: (b, 0, 0)),
        scratch_shapes=[pltpu.VMEM((Ho1, Wo1 * CP), cdtype),
                        pltpu.VMEM((Ho2, Wo2 * CP), cdtype),
                        pltpu.VMEM((Ho2, Wo2 * CP), cdtype)],
        compiler_params=pltpu.CompilerParams(
            dimension_semantics=("parallel",)),
    )(x, *weight_args)

    # Drop the 128-lane feature padding outside the kernel (once per call).
    return out.reshape(B, FP)[:, :features_dim]


# ------------------------- pure-JAX reference check --------------------------
def _reference_forward(params, observations_nchw):
    def lrelu(v):
        return jnp.where(v > 0, v, NEG_SLOPE * v)

    def conv(x, w, b):
        y = jax.lax.conv_general_dilated(
            x, w, window_strides=(1, 1), padding="VALID",
            dimension_numbers=("NCHW", "OIHW", "NCHW"))
        return lrelu(y + b[None, :, None, None])

    x = observations_nchw
    x = conv(x, params["w1"], params["b1"])
    x = conv(x, params["w2"], params["b2"])
    x = conv(x, params["w3"], params["b3"])
    flat = x.reshape(x.shape[0], -1)
    return lrelu(flat @ params["wl"].T + params["bl"][None, :])


if __name__ == "__main__":
    observation_shape = (4, 8, 8)     # (C, H, W): small board
    features_dim = 32
    latent_dim = 32
    batch = 2

    key = jax.random.PRNGKey(0)
    k_params, k_x = jax.random.split(key)
    params = init_params(k_params, observation_shape, features_dim, latent_dim)
    x = jax.random.uniform(k_x, (batch,) + observation_shape, jnp.float32)

    ref = jax.block_until_ready(_reference_forward(params, x))

    # 1) f32 MXU operands: strict check against the f32 XLA reference.
    prepped32, meta32 = prepare_params(params, observation_shape, features_dim,
                                       latent_dim, compute_dtype=jnp.float32)
    fwd32 = jax.jit(lambda p, obs: board_cnn_forward(p, meta32, obs))
    out32 = jax.block_until_ready(fwd32(prepped32, x))
    assert out32.shape == (batch, features_dim), out32.shape
    err32 = float(jnp.max(jnp.abs(out32 - ref)))
    assert jnp.allclose(out32, ref, rtol=1e-3, atol=1e-3), err32

    # 2) bf16 MXU operands (f32 accumulate / f32 epilogue): the fast path for
    #    the v6e/v7x MXU.  Tolerance loosened only for bf16 operand rounding.
    prepped16, meta16 = prepare_params(params, observation_shape, features_dim,
                                       latent_dim, compute_dtype=jnp.bfloat16)
    fwd16 = jax.jit(lambda p, obs: board_cnn_forward(p, meta16, obs))
    out16 = jax.block_until_ready(fwd16(prepped16, x))
    assert out16.shape == (batch, features_dim), out16.shape
    err16 = float(jnp.max(jnp.abs(out16 - ref)))
    assert jnp.allclose(out16, ref, rtol=5e-2, atol=5e-2), err16

    print("KERNEL_OK")
</pallas_src>

<mosaic_0001>
module attributes {stable_mosaic.version = 11 : i64} {
  func.func @kernel(%arg0: i32, %arg1: memref<1x8x32xf32, #tpu.memory_space<vmem>>, %arg2: memref<3x12x128xf32, #tpu.memory_space<vmem>>, %arg3: memref<1x128xf32, #tpu.memory_space<vmem>>, %arg4: memref<2x256x128xf32, #tpu.memory_space<vmem>>, %arg5: memref<1x128xf32, #tpu.memory_space<vmem>>, %arg6: memref<128x128xf32, #tpu.memory_space<vmem>>, %arg7: memref<1x128xf32, #tpu.memory_space<vmem>>, %arg8: memref<5x640x128xf32, #tpu.memory_space<vmem>>, %arg9: memref<1x128xf32, #tpu.memory_space<vmem>>, %arg10: memref<1x1x128xf32, #tpu.memory_space<vmem>>, %arg11: memref<6x768xf32, #tpu.memory_space<vmem>>, %arg12: memref<5x640xf32, #tpu.memory_space<vmem>>, %arg13: memref<5x640xf32, #tpu.memory_space<vmem>>) attributes {dimension_semantics = [#tpu.dimension_semantics<parallel>], iteration_bounds = array<i64: 2>, scalar_prefetch = 0 : i64, scratch_operands = 3 : i64, tpu.core_type = #tpu.core_type<tc>, window_params = [{transform_indices = @transform_0, window_bounds = array<i64: 1, 8, 32>}, {pipeline_mode = #tpu.pipeline_mode<synchronous>, transform_indices = @transform_1, window_bounds = array<i64: 3, 12, 128>}, {pipeline_mode = #tpu.pipeline_mode<synchronous>, transform_indices = @transform_2, window_bounds = array<i64: 1, 128>}, {pipeline_mode = #tpu.pipeline_mode<synchronous>, transform_indices = @transform_3, window_bounds = array<i64: 2, 256, 128>}, {pipeline_mode = #tpu.pipeline_mode<synchronous>, transform_indices = @transform_4, window_bounds = array<i64: 1, 128>}, {pipeline_mode = #tpu.pipeline_mode<synchronous>, transform_indices = @transform_5, window_bounds = array<i64: 128, 128>}, {pipeline_mode = #tpu.pipeline_mode<synchronous>, transform_indices = @transform_6, window_bounds = array<i64: 1, 128>}, {pipeline_mode = #tpu.pipeline_mode<synchronous>, transform_indices = @transform_7, window_bounds = array<i64: 5, 640, 128>}, {pipeline_mode = #tpu.pipeline_mode<synchronous>, transform_indices = @transform_8, window_bounds = array<i64: 1, 128>}, {transform_indices = @transform_9, window_bounds = array<i64: 1, 1, 128>}]} {
    %c0 = arith.constant 0 : index
    %c0_0 = arith.constant 0 : index
    %c0_1 = arith.constant 0 : index
    %0 = vector.load %arg1[%c0, %c0_0, %c0_1] : memref<1x8x32xf32, #tpu.memory_space<vmem>>, vector<1x8x32xf32>
    %1 = vector.shape_cast %0 : vector<1x8x32xf32> to vector<8x32xf32>
    %cst = arith.constant 0.000000e+00 : f32
    %2 = vector.broadcast %cst : f32 to vector<6x128xf32>
    %3 = vector.extract_strided_slice %1 {offsets = [0, 0], sizes = [6, 12], strides = [1, 1]} : vector<8x32xf32> to vector<6x12xf32>
    %c0_2 = arith.constant 0 : index
    %c0_3 = arith.constant 0 : index
    %c0_4 = arith.constant 0 : index
    %4 = vector.load %arg2[%c0_2, %c0_3, %c0_4] : memref<3x12x128xf32, #tpu.memory_space<vmem>>, vector<1x12x128xf32>
    %5 = vector.shape_cast %4 : vector<1x12x128xf32> to vector<12x128xf32>
    %cst_5 = arith.constant dense<0.000000e+00> : vector<6x128xf32>
    %6 = tpu.matmul %3, %5, %cst_5 {dimension_numbers = #tpu.dot_dimension_numbers<[1], [0], [0], [1], [0, 0, 1, 1], [], []>} : vector<6x12xf32>, vector<12x128xf32>, vector<6x128xf32> -> vector<6x128xf32>
    %7 = arith.addf %2, %6 : vector<6x128xf32>
    %8 = vector.extract_strided_slice %1 {offsets = [1, 0], sizes = [6, 12], strides = [1, 1]} : vector<8x32xf32> to vector<6x12xf32>
    %c1 = arith.constant 1 : index
    %c0_6 = arith.constant 0 : index
    %c0_7 = arith.constant 0 : index
    %9 = vector.load %arg2[%c1, %c0_6, %c0_7] : memref<3x12x128xf32, #tpu.memory_space<vmem>>, vector<1x12x128xf32>
    %10 = vector.shape_cast %9 : vector<1x12x128xf32> to vector<12x128xf32>
    %cst_8 = arith.constant dense<0.000000e+00> : vector<6x128xf32>
    %11 = tpu.matmul %8, %10, %cst_8 {dimension_numbers = #tpu.dot_dimension_numbers<[1], [0], [0], [1], [0, 0, 1, 1], [], []>} : vector<6x12xf32>, vector<12x128xf32>, vector<6x128xf32> -> vector<6x128xf32>
    %12 = arith.addf %7, %11 : vector<6x128xf32>
    %13 = vector.extract_strided_slice %1 {offsets = [2, 0], sizes = [6, 12], strides = [1, 1]} : vector<8x32xf32> to vector<6x12xf32>
    %c2 = arith.constant 2 : index
    %c0_9 = arith.constant 0 : index
    %c0_10 = arith.constant 0 : index
    %14 = vector.load %arg2[%c2, %c0_9, %c0_10] : memref<3x12x128xf32, #tpu.memory_space<vmem>>, vector<1x12x128xf32>
    %15 = vector.shape_cast %14 : vector<1x12x128xf32> to vector<12x128xf32>
    %cst_11 = arith.constant dense<0.000000e+00> : vector<6x128xf32>
    %16 = tpu.matmul %13, %15, %cst_11 {dimension_numbers = #tpu.dot_dimension_numbers<[1], [0], [0], [1], [0, 0, 1, 1], [], []>} : vector<6x12xf32>, vector<12x128xf32>, vector<6x128xf32> -> vector<6x128xf32>
    %17 = arith.addf %12, %16 : vector<6x128xf32>
    %c0_12 = arith.constant 0 : index
    %c0_13 = arith.constant 0 : index
    %18 = vector.load %arg3[%c0_12, %c0_13] : memref<1x128xf32, #tpu.memory_space<vmem>>, vector<1x128xf32>
    %19 = vector.broadcast %18 : vector<1x128xf32> to vector<6x128xf32>
    %20 = arith.addf %17, %19 : vector<6x128xf32>
    %cst_14 = arith.constant 0.000000e+00 : f32
    %21 = vector.broadcast %cst_14 : f32 to vector<6x128xf32>
    %22 = arith.cmpf ogt, %20, %21 : vector<6x128xf32>
    %cst_15 = arith.constant 0.00999999977 : f32
    %23 = vector.broadcast %cst_15 : f32 to vector<6x128xf32>
    %24 = arith.mulf %23, %20 : vector<6x128xf32>
    %25 = arith.select %22, %20, %24 : vector<6x128xi1>, vector<6x128xf32>
    %c0_16 = arith.constant 0 : index
    %c0_17 = arith.constant 0 : index
    %26 = vector.load %arg11[%c0_16, %c0_17] : memref<6x768xf32, #tpu.memory_space<vmem>>, vector<6x128xf32>
    tpu.vector_store %arg11[%c0_16, %c0_17], %25 {strides = array<i32>} : memref<6x768xf32, #tpu.memory_space<vmem>>, vector<6x128xf32>,
    %cst_18 = arith.constant 0.000000e+00 : f32
    %27 = vector.broadcast %cst_18 : f32 to vector<6x128xf32>
    %28 = vector.extract_strided_slice %1 {offsets = [0, 4], sizes = [6, 12], strides = [1, 1]} : vector<8x32xf32> to vector<6x12xf32>
    %c0_19 = arith.constant 0 : index
    %c0_20 = arith.constant 0 : index
    %c0_21 = arith.constant 0 : index
    %29 = vector.load %arg2[%c0_19, %c0_20, %c0_21] : memref<3x12x128xf32, #tpu.memory_space<vmem>>, vector<1x12x128xf32>
    %30 = vector.shape_cast %29 : vector<1x12x128xf32> to vector<12x128xf32>
    %cst_22 = arith.constant dense<0.000000e+00> : vector<6x128xf32>
    %31 = tpu.matmul %28, %30, %cst_22 {dimension_numbers = #tpu.dot_dimension_numbers<[1], [0], [0], [1], [0, 0, 1, 1], [], []>} : vector<6x12xf32>, vector<12x128xf32>, vector<6x128xf32> -> vector<6x128xf32>
    %32 = arith.addf %27, %31 : vector<6x128xf32>
    %33 = vector.extract_strided_slice %1 {offsets = [1, 4], sizes = [6, 12], strides = [1, 1]} : vector<8x32xf32> to vector<6x12xf32>
    %c1_23 = arith.constant 1 : index
    %c0_24 = arith.constant 0 : index
    %c0_25 = arith.constant 0 : index
    %34 = vector.load %arg2[%c1_23, %c0_24, %c0_25] : memref<3x12x128xf32, #tpu.memory_space<vmem>>, vector<1x12x128xf32>
    %35 = vector.shape_cast %34 : vector<1x12x128xf32> to vector<12x128xf32>
    %cst_26 = arith.constant dense<0.000000e+00> : vector<6x128xf32>
    %36 = tpu.matmul %33, %35, %cst_26 {dimension_numbers = #tpu.dot_dimension_numbers<[1], [0], [0], [1], [0, 0, 1, 1], [], []>} : vector<6x12xf32>, vector<12x128xf32>, vector<6x128xf32> -> vector<6x128xf32>
    %37 = arith.addf %32, %36 : vector<6x128xf32>
    %38 = vector.extract_strided_slice %1 {offsets = [2, 4], sizes = [6, 12], strides = [1, 1]} : vector<8x32xf32> to vector<6x12xf32>
    %c2_27 = arith.constant 2 : index
    %c0_28 = arith.constant 0 : index
    %c0_29 = arith.constant 0 : index
    %39 = vector.load %arg2[%c2_27, %c0_28, %c0_29] : memref<3x12x128xf32, #tpu.memory_space<vmem>>, vector<1x12x128xf32>
    %40 = vector.shape_cast %39 : vector<1x12x128xf32> to vector<12x128xf32>
    %cst_30 = arith.constant dense<0.000000e+00> : vector<6x128xf32>
    %41 = tpu.matmul %38, %40, %cst_30 {dimension_numbers = #tpu.dot_dimension_numbers<[1], [0], [0], [1], [0, 0, 1, 1], [], []>} : vector<6x12xf32>, vector<12x128xf32>, vector<6x128xf32> -> vector<6x128xf32>
    %42 = arith.addf %37, %41 : vector<6x128xf32>
    %c0_31 = arith.constant 0 : index
    %c0_32 = arith.constant 0 : index
    %43 = vector.load %arg3[%c0_31, %c0_32] : memref<1x128xf32, #tpu.memory_space<vmem>>, vector<1x128xf32>
    %44 = vector.broadcast %43 : vector<1x128xf32> to vector<6x128xf32>
    %45 = arith.addf %42, %44 : vector<6x128xf32>
    %cst_33 = arith.constant 0.000000e+00 : f32
    %46 = vector.broadcast %cst_33 : f32 to vector<6x128xf32>
    %47 = arith.cmpf ogt, %45, %46 : vector<6x128xf32>
    %cst_34 = arith.constant 0.00999999977 : f32
    %48 = vector.broadcast %cst_34 : f32 to vector<6x128xf32>
    %49 = arith.mulf %48, %45 : vector<6x128xf32>
    %50 = arith.select %47, %45, %49 : vector<6x128xi1>, vector<6x128xf32>
    %c0_35 = arith.constant 0 : index
    %c128 = arith.constant 128 : index
    %51 = vector.load %arg11[%c0_35, %c128] : memref<6x768xf32, #tpu.memory_space<vmem>>, vector<6x128xf32>
    tpu.vector_store %arg11[%c0_35, %c128], %50 {strides = array<i32>} : memref<6x768xf32, #tpu.memory_space<vmem>>, vector<6x128xf32>,
    %cst_36 = arith.constant 0.000000e+00 : f32
    %52 = vector.broadcast %cst_36 : f32 to vector<6x128xf32>
    %53 = vector.extract_strided_slice %1 {offsets = [0, 8], sizes = [6, 12], strides = [1, 1]} : vector<8x32xf32> to vector<6x12xf32>
    %c0_37 = arith.constant 0 : index
    %c0_38 = arith.constant 0 : index
    %c0_39 = arith.constant 0 : index
    %54 = vector.load %arg2[%c0_37, %c0_38, %c0_39] : memref<3x12x128xf32, #tpu.memory_space<vmem>>, vector<1x12x128xf32>
    %55 = vector.shape_cast %54 : vector<1x12x128xf32> to vector<12x128xf32>
    %cst_40 = arith.constant dense<0.000000e+00> : vector<6x128xf32>
    %56 = tpu.matmul %53, %55, %cst_40 {dimension_numbers = #tpu.dot_dimension_numbers<[1], [0], [0], [1], [0, 0, 1, 1], [], []>} : vector<6x12xf32>, vector<12x128xf32>, vector<6x128xf32> -> vector<6x128xf32>
    %57 = arith.addf %52, %56 : vector<6x128xf32>
    %58 = vector.extract_strided_slice %1 {offsets = [1, 8], sizes = [6, 12], strides = [1, 1]} : vector<8x32xf32> to vector<6x12xf32>
    %c1_41 = arith.constant 1 : index
    %c0_42 = arith.constant 0 : index
    %c0_43 = arith.constant 0 : index
    %59 = vector.load %arg2[%c1_41, %c0_42, %c0_43] : memref<3x12x128xf32, #tpu.memory_space<vmem>>, vector<1x12x128xf32>
    %60 = vector.shape_cast %59 : vector<1x12x128xf32> to vector<12x128xf32>
    %cst_44 = arith.constant dense<0.000000e+00> : vector<6x128xf32>
    %61 = tpu.matmul %58, %60, %cst_44 {dimension_numbers = #tpu.dot_dimension_numbers<[1], [0], [0], [1], [0, 0, 1, 1], [], []>} : vector<6x12xf32>, vector<12x128xf32>, vector<6x128xf32> -> vector<6x128xf32>
    %62 = arith.addf %57, %61 : vector<6x128xf32>
    %63 = vector.extract_strided_slice %1 {offsets = [2, 8], sizes = [6, 12], strides = [1, 1]} : vector<8x32xf32> to vector<6x12xf32>
    %c2_45 = arith.constant 2 : index
    %c0_46 = arith.constant 0 : index
    %c0_47 = arith.constant 0 : index
    %64 = vector.load %arg2[%c2_45, %c0_46, %c0_47] : memref<3x12x128xf32, #tpu.memory_space<vmem>>, vector<1x12x128xf32>
    %65 = vector.shape_cast %64 : vector<1x12x128xf32> to vector<12x128xf32>
    %cst_48 = arith.constant dense<0.000000e+00> : vector<6x128xf32>
    %66 = tpu.matmul %63, %65, %cst_48 {dimension_numbers = #tpu.dot_dimension_numbers<[1], [0], [0], [1], [0, 0, 1, 1], [], []>} : vector<6x12xf32>, vector<12x128xf32>, vector<6x128xf32> -> vector<6x128xf32>
    %67 = arith.addf %62, %66 : vector<6x128xf32>
    %c0_49 = arith.constant 0 : index
    %c0_50 = arith.constant 0 : index
    %68 = vector.load %arg3[%c0_49, %c0_50] : memref<1x128xf32, #tpu.memory_space<vmem>>, vector<1x128xf32>
    %69 = vector.broadcast %68 : vector<1x128xf32> to vector<6x128xf32>
    %70 = arith.addf %67, %69 : vector<6x128xf32>
    %cst_51 = arith.constant 0.000000e+00 : f32
    %71 = vector.broadcast %cst_51 : f32 to vector<6x128xf32>
    %72 = arith.cmpf ogt, %70, %71 : vector<6x128xf32>
    %cst_52 = arith.constant 0.00999999977 : f32
    %73 = vector.broadcast %cst_52 : f32 to vector<6x128xf32>
    %74 = arith.mulf %73, %70 : vector<6x128xf32>
    %75 = arith.select %72, %70, %74 : vector<6x128xi1>, vector<6x128xf32>
    %c0_53 = arith.constant 0 : index
    %c256 = arith.constant 256 : index
    %76 = vector.load %arg11[%c0_53, %c256] : memref<6x768xf32, #tpu.memory_space<vmem>>, vector<6x128xf32>
    tpu.vector_store %arg11[%c0_53, %c256], %75 {strides = array<i32>} : memref<6x768xf32, #tpu.memory_space<vmem>>, vector<6x128xf32>,
    %cst_54 = arith.constant 0.000000e+00 : f32
    %77 = vector.broadcast %cst_54 : f32 to vector<6x128xf32>
    %78 = vector.extract_strided_slice %1 {offsets = [0, 12], sizes = [6, 12], strides = [1, 1]} : vector<8x32xf32> to vector<6x12xf32>
    %c0_55 = arith.constant 0 : index
    %c0_56 = arith.constant 0 : index
    %c0_57 = arith.constant 0 : index
    %79 = vector.load %arg2[%c0_55, %c0_56, %c0_57] : memref<3x12x128xf32, #tpu.memory_space<vmem>>, vector<1x12x128xf32>
    %80 = vector.shape_cast %79 : vector<1x12x128xf32> to vector<12x128xf32>
    %cst_58 = arith.constant dense<0.000000e+00> : vector<6x128xf32>
    %81 = tpu.matmul %78, %80, %cst_58 {dimension_numbers = #tpu.dot_dimension_numbers<[1], [0], [0], [1], [0, 0, 1, 1], [], []>} : vector<6x12xf32>, vector<12x128xf32>, vector<6x128xf32> -> vector<6x128xf32>
    %82 = arith.addf %77, %81 : vector<6x128xf32>
    %83 = vector.extract_strided_slice %1 {offsets = [1, 12], sizes = [6, 12], strides = [1, 1]} : vector<8x32xf32> to vector<6x12xf32>
    %c1_59 = arith.constant 1 : index
    %c0_60 = arith.constant 0 : index
    %c0_61 = arith.constant 0 : index
    %84 = vector.load %arg2[%c1_59, %c0_60, %c0_61] : memref<3x12x128xf32, #tpu.memory_space<vmem>>, vector<1x12x128xf32>
    %85 = vector.shape_cast %84 : vector<1x12x128xf32> to vector<12x128xf32>
    %cst_62 = arith.constant dense<0.000000e+00> : vector<6x128xf32>
    %86 = tpu.matmul %83, %85, %cst_62 {dimension_numbers = #tpu.dot_dimension_numbers<[1], [0], [0], [1], [0, 0, 1, 1], [], []>} : vector<6x12xf32>, vector<12x128xf32>, vector<6x128xf32> -> vector<6x128xf32>
    %87 = arith.addf %82, %86 : vector<6x128xf32>
    %88 = vector.extract_strided_slice %1 {offsets = [2, 12], sizes = [6, 12], strides = [1, 1]} : vector<8x32xf32> to vector<6x12xf32>
    %c2_63 = arith.constant 2 : index
    %c0_64 = arith.constant 0 : index
    %c0_65 = arith.constant 0 : index
    %89 = vector.load %arg2[%c2_63, %c0_64, %c0_65] : memref<3x12x128xf32, #tpu.memory_space<vmem>>, vector<1x12x128xf32>
    %90 = vector.shape_cast %89 : vector<1x12x128xf32> to vector<12x128xf32>
    %cst_66 = arith.constant dense<0.000000e+00> : vector<6x128xf32>
    %91 = tpu.matmul %88, %90, %cst_66 {dimension_numbers = #tpu.dot_dimension_numbers<[1], [0], [0], [1], [0, 0, 1, 1], [], []>} : vector<6x12xf32>, vector<12x128xf32>, vector<6x128xf32> -> vector<6x128xf32>
    %92 = arith.addf %87, %91 : vector<6x128xf32>
    %c0_67 = arith.constant 0 : index
    %c0_68 = arith.constant 0 : index
    %93 = vector.load %arg3[%c0_67, %c0_68] : memref<1x128xf32, #tpu.memory_space<vmem>>, vector<1x128xf32>
    %94 = vector.broadcast %93 : vector<1x128xf32> to vector<6x128xf32>
    %95 = arith.addf %92, %94 : vector<6x128xf32>
    %cst_69 = arith.constant 0.000000e+00 : f32
    %96 = vector.broadcast %cst_69 : f32 to vector<6x128xf32>
    %97 = arith.cmpf ogt, %95, %96 : vector<6x128xf32>
    %cst_70 = arith.constant 0.00999999977 : f32
    %98 = vector.broadcast %cst_70 : f32 to vector<6x128xf32>
    %99 = arith.mulf %98, %95 : vector<6x128xf32>
    %100 = arith.select %97, %95, %99 : vector<6x128xi1>, vector<6x128xf32>
    %c0_71 = arith.constant 0 : index
    %c384 = arith.constant 384 : index
    %101 = vector.load %arg11[%c0_71, %c384] : memref<6x768xf32, #tpu.memory_space<vmem>>, vector<6x128xf32>
    tpu.vector_store %arg11[%c0_71, %c384], %100 {strides = array<i32>} : memref<6x768xf32, #tpu.memory_space<vmem>>, vector<6x128xf32>,
    %cst_72 = arith.constant 0.000000e+00 : f32
    %102 = vector.broadcast %cst_72 : f32 to vector<6x128xf32>
    %103 = vector.extract_strided_slice %1 {offsets = [0, 16], sizes = [6, 12], strides = [1, 1]} : vector<8x32xf32> to vector<6x12xf32>
    %c0_73 = arith.constant 0 : index
    %c0_74 = arith.constant 0 : index
    %c0_75 = arith.constant 0 : index
    %104 = vector.load %arg2[%c0_73, %c0_74, %c0_75] : memref<3x12x128xf32, #tpu.memory_space<vmem>>, vector<1x12x128xf32>
    %105 = vector.shape_cast %104 : vector<1x12x128xf32> to vector<12x128xf32>
    %cst_76 = arith.constant dense<0.000000e+00> : vector<6x128xf32>
    %106 = tpu.matmul %103, %105, %cst_76 {dimension_numbers = #tpu.dot_dimension_numbers<[1], [0], [0], [1], [0, 0, 1, 1], [], []>} : vector<6x12xf32>, vector<12x128xf32>, vector<6x128xf32> -> vector<6x128xf32>
    %107 = arith.addf %102, %106 : vector<6x128xf32>
    %108 = vector.extract_strided_slice %1 {offsets = [1, 16], sizes = [6, 12], strides = [1, 1]} : vector<8x32xf32> to vector<6x12xf32>
    %c1_77 = arith.constant 1 : index
    %c0_78 = arith.constant 0 : index
    %c0_79 = arith.constant 0 : index
    %109 = vector.load %arg2[%c1_77, %c0_78, %c0_79] : memref<3x12x128xf32, #tpu.memory_space<vmem>>, vector<1x12x128xf32>
    %110 = vector.shape_cast %109 : vector<1x12x128xf32> to vector<12x128xf32>
    %cst_80 = arith.constant dense<0.000000e+00> : vector<6x128xf32>
    %111 = tpu.matmul %108, %110, %cst_80 {dimension_numbers = #tpu.dot_dimension_numbers<[1], [0], [0], [1], [0, 0, 1, 1], [], []>} : vector<6x12xf32>, vector<12x128xf32>, vector<6x128xf32> -> vector<6x128xf32>
    %112 = arith.addf %107, %111 : vector<6x128xf32>
    %113 = vector.extract_strided_slice %1 {offsets = [2, 16], sizes = [6, 12], strides = [1, 1]} : vector<8x32xf32> to vector<6x12xf32>
    %c2_81 = arith.constant 2 : index
    %c0_82 = arith.constant 0 : index
    %c0_83 = arith.constant 0 : index
    %114 = vector.load %arg2[%c2_81, %c0_82, %c0_83] : memref<3x12x128xf32, #tpu.memory_space<vmem>>, vector<1x12x128xf32>
    %115 = vector.shape_cast %114 : vector<1x12x128xf32> to vector<12x128xf32>
    %cst_84 = arith.constant dense<0.000000e+00> : vector<6x128xf32>
    %116 = tpu.matmul %113, %115, %cst_84 {dimension_numbers = #tpu.dot_dimension_numbers<[1], [0], [0], [1], [0, 0, 1, 1], [], []>} : vector<6x12xf32>, vector<12x128xf32>, vector<6x128xf32> -> vector<6x128xf32>
    %117 = arith.addf %112, %116 : vector<6x128xf32>
    %c0_85 = arith.constant 0 : index
    %c0_86 = arith.constant 0 : index
    %118 = vector.load %arg3[%c0_85, %c0_86] : memref<1x128xf32, #tpu.memory_space<vmem>>, vector<1x128xf32>
    %119 = vector.broadcast %118 : vector<1x128xf32> to vector<6x128xf32>
    %120 = arith.addf %117, %119 : vector<6x128xf32>
    %cst_87 = arith.constant 0.000000e+00 : f32
    %121 = vector.broadcast %cst_87 : f32 to vector<6x128xf32>
    %122 = arith.cmpf ogt, %120, %121 : vector<6x128xf32>
    %cst_88 = arith.constant 0.00999999977 : f32
    %123 = vector.broadcast %cst_88 : f32 to vector<6x128xf32>
    %124 = arith.mulf %123, %120 : vector<6x128xf32>
    %125 = arith.select %122, %120, %124 : vector<6x128xi1>, vector<6x128xf32>
    %c0_89 = arith.constant 0 : index
    %c512 = arith.constant 512 : index
    %126 = vector.load %arg11[%c0_89, %c512] : memref<6x768xf32, #tpu.memory_space<vmem>>, vector<6x128xf32>
    tpu.vector_store %arg11[%c0_89, %c512], %125 {strides = array<i32>} : memref<6x768xf32, #tpu.memory_space<vmem>>, vector<6x128xf32>,
    %cst_90 = arith.constant 0.000000e+00 : f32
    %127 = vector.broadcast %cst_90 : f32 to vector<6x128xf32>
    %128 = vector.extract_strided_slice %1 {offsets = [0, 20], sizes = [6, 12], strides = [1, 1]} : vector<8x32xf32> to vector<6x12xf32>
    %c0_91 = arith.constant 0 : index
    %c0_92 = arith.constant 0 : index
    %c0_93 = arith.constant 0 : index
    %129 = vector.load %arg2[%c0_91, %c0_92, %c0_93] : memref<3x12x128xf32, #tpu.memory_space<vmem>>, vector<1x12x128xf32>
    %130 = vector.shape_cast %129 : vector<1x12x128xf32> to vector<12x128xf32>
    %cst_94 = arith.constant dense<0.000000e+00> : vector<6x128xf32>
    %131 = tpu.matmul %128, %130, %cst_94 {dimension_numbers = #tpu.dot_dimension_numbers<[1], [0], [0], [1], [0, 0, 1, 1], [], []>} : vector<6x12xf32>, vector<12x128xf32>, vector<6x128xf32> -> vector<6x128xf32>
    %132 = arith.addf %127, %131 : vector<6x128xf32>
    %133 = vector.extract_strided_slice %1 {offsets = [1, 20], sizes = [6, 12], strides = [1, 1]} : vector<8x32xf32> to vector<6x12xf32>
    %c1_95 = arith.constant 1 : index
    %c0_96 = arith.constant 0 : index
    %c0_97 = arith.constant 0 : index
    %134 = vector.load %arg2[%c1_95, %c0_96, %c0_97] : memref<3x12x128xf32, #tpu.memory_space<vmem>>, vector<1x12x128xf32>
    %135 = vector.shape_cast %134 : vector<1x12x128xf32> to vector<12x128xf32>
    %cst_98 = arith.constant dense<0.000000e+00> : vector<6x128xf32>
    %136 = tpu.matmul %133, %135, %cst_98 {dimension_numbers = #tpu.dot_dimension_numbers<[1], [0], [0], [1], [0, 0, 1, 1], [], []>} : vector<6x12xf32>, vector<12x128xf32>, vector<6x128xf32> -> vector<6x128xf32>
    %137 = arith.addf %132, %136 : vector<6x128xf32>
    %138 = vector.extract_strided_slice %1 {offsets = [2, 20], sizes = [6, 12], strides = [1, 1]} : vector<8x32xf32> to vector<6x12xf32>
    %c2_99 = arith.constant 2 : index
    %c0_100 = arith.constant 0 : index
    %c0_101 = arith.constant 0 : index
    %139 = vector.load %arg2[%c2_99, %c0_100, %c0_101] : memref<3x12x128xf32, #tpu.memory_space<vmem>>, vector<1x12x128xf32>
    %140 = vector.shape_cast %139 : vector<1x12x128xf32> to vector<12x128xf32>
    %cst_102 = arith.constant dense<0.000000e+00> : vector<6x128xf32>
    %141 = tpu.matmul %138, %140, %cst_102 {dimension_numbers = #tpu.dot_dimension_numbers<[1], [0], [0], [1], [0, 0, 1, 1], [], []>} : vector<6x12xf32>, vector<12x128xf32>, vector<6x128xf32> -> vector<6x128xf32>
    %142 = arith.addf %137, %141 : vector<6x128xf32>
    %c0_103 = arith.constant 0 : index
    %c0_104 = arith.constant 0 : index
    %143 = vector.load %arg3[%c0_103, %c0_104] : memref<1x128xf32, #tpu.memory_space<vmem>>, vector<1x128xf32>
    %144 = vector.broadcast %143 : vector<1x128xf32> to vector<6x128xf32>
    %145 = arith.addf %142, %144 : vector<6x128xf32>
    %cst_105 = arith.constant 0.000000e+00 : f32
    %146 = vector.broadcast %cst_105 : f32 to vector<6x128xf32>
    %147 = arith.cmpf ogt, %145, %146 : vector<6x128xf32>
    %cst_106 = arith.constant 0.00999999977 : f32
    %148 = vector.broadcast %cst_106 : f32 to vector<6x128xf32>
    %149 = arith.mulf %148, %145 : vector<6x128xf32>
    %150 = arith.select %147, %145, %149 : vector<6x128xi1>, vector<6x128xf32>
    %c0_107 = arith.constant 0 : index
    %c640 = arith.constant 640 : index
    %151 = vector.load %arg11[%c0_107, %c640] : memref<6x768xf32, #tpu.memory_space<vmem>>, vector<6x128xf32>
    tpu.vector_store %arg11[%c0_107, %c640], %150 {strides = array<i32>} : memref<6x768xf32, #tpu.memory_space<vmem>>, vector<6x128xf32>,
    %cst_108 = arith.constant 0.000000e+00 : f32
    %152 = vector.broadcast %cst_108 : f32 to vector<5x128xf32>
    %c0_109 = arith.constant 0 : index
    %c0_110 = arith.constant 0 : index
    %153 = vector.load %arg11[%c0_109, %c0_110] : memref<6x768xf32, #tpu.memory_space<vmem>>, vector<5x256xf32>
    %c0_111 = arith.constant 0 : index
    %c0_112 = arith.constant 0 : index
    %c0_113 = arith.constant 0 : index
    %154 = vector.load %arg4[%c0_111, %c0_112, %c0_113] : memref<2x256x128xf32, #tpu.memory_space<vmem>>, vector<1x256x128xf32>
    %155 = vector.shape_cast %154 : vector<1x256x128xf32> to vector<256x128xf32>
    %cst_114 = arith.constant dense<0.000000e+00> : vector<5x128xf32>
    %156 = tpu.matmul %153, %155, %cst_114 {dimension_numbers = #tpu.dot_dimension_numbers<[1], [0], [0], [1], [0, 0, 1, 1], [], []>} : vector<5x256xf32>, vector<256x128xf32>, vector<5x128xf32> -> vector<5x128xf32>
    %157 = arith.addf %152, %156 : vector<5x128xf32>
    %c1_115 = arith.constant 1 : index
    %c0_116 = arith.constant 0 : index
    %158 = vector.load %arg11[%c1_115, %c0_116] : memref<6x768xf32, #tpu.memory_space<vmem>>, vector<5x256xf32>
    %c1_117 = arith.constant 1 : index
    %c0_118 = arith.constant 0 : index
    %c0_119 = arith.constant 0 : index
    %159 = vector.load %arg4[%c1_117, %c0_118, %c0_119] : memref<2x256x128xf32, #tpu.memory_space<vmem>>, vector<1x256x128xf32>
    %160 = vector.shape_cast %159 : vector<1x256x128xf32> to vector<256x128xf32>
    %cst_120 = arith.constant dense<0.000000e+00> : vector<5x128xf32>
    %161 = tpu.matmul %158, %160, %cst_120 {dimension_numbers = #tpu.dot_dimension_numbers<[1], [0], [0], [1], [0, 0, 1, 1], [], []>} : vector<5x256xf32>, vector<256x128xf32>, vector<5x128xf32> -> vector<5x128xf32>
    %162 = arith.addf %157, %161 : vector<5x128xf32>
    %c0_121 = arith.constant 0 : index
    %c0_122 = arith.constant 0 : index
    %163 = vector.load %arg5[%c0_121, %c0_122] : memref<1x128xf32, #tpu.memory_space<vmem>>, vector<1x128xf32>
    %164 = vector.broadcast %163 : vector<1x128xf32> to vector<5x128xf32>
    %165 = arith.addf %162, %164 : vector<5x128xf32>
    %cst_123 = arith.constant 0.000000e+00 : f32
    %166 = vector.broadcast %cst_123 : f32 to vector<5x128xf32>
    %167 = arith.cmpf ogt, %165, %166 : vector<5x128xf32>
    %cst_124 = arith.constant 0.00999999977 : f32
    %168 = vector.broadcast %cst_124 : f32 to vector<5x128xf32>
    %169 = arith.mulf %168, %165 : vector<5x128xf32>
    %170 = arith.select %167, %165, %169 : vector<5x128xi1>, vector<5x128xf32>
    %c0_125 = arith.constant 0 : index
    %c0_126 = arith.constant 0 : index
    %171 = vector.load %arg12[%c0_125, %c0_126] : memref<5x640xf32, #tpu.memory_space<vmem>>, vector<5x128xf32>
    tpu.vector_store %arg12[%c0_125, %c0_126], %170 {strides = array<i32>} : memref<5x640xf32, #tpu.memory_space<vmem>>, vector<5x128xf32>,
    %cst_127 = arith.constant 0.000000e+00 : f32
    %172 = vector.broadcast %cst_127 : f32 to vector<5x128xf32>
    %c0_128 = arith.constant 0 : index
    %c128_129 = arith.constant 128 : index
    %173 = vector.load %arg11[%c0_128, %c128_129] : memref<6x768xf32, #tpu.memory_space<vmem>>, vector<5x256xf32>
    %c0_130 = arith.constant 0 : index
    %c0_131 = arith.constant 0 : index
    %c0_132 = arith.constant 0 : index
    %174 = vector.load %arg4[%c0_130, %c0_131, %c0_132] : memref<2x256x128xf32, #tpu.memory_space<vmem>>, vector<1x256x128xf32>
    %175 = vector.shape_cast %174 : vector<1x256x128xf32> to vector<256x128xf32>
    %cst_133 = arith.constant dense<0.000000e+00> : vector<5x128xf32>
    %176 = tpu.matmul %173, %175, %cst_133 {dimension_numbers = #tpu.dot_dimension_numbers<[1], [0], [0], [1], [0, 0, 1, 1], [], []>} : vector<5x256xf32>, vector<256x128xf32>, vector<5x128xf32> -> vector<5x128xf32>
    %177 = arith.addf %172, %176 : vector<5x128xf32>
    %c1_134 = arith.constant 1 : index
    %c128_135 = arith.constant 128 : index
    %178 = vector.load %arg11[%c1_134, %c128_135] : memref<6x768xf32, #tpu.memory_space<vmem>>, vector<5x256xf32>
    %c1_136 = arith.constant 1 : index
    %c0_137 = arith.constant 0 : index
    %c0_138 = arith.constant 0 : index
    %179 = vector.load %arg4[%c1_136, %c0_137, %c0_138] : memref<2x256x128xf32, #tpu.memory_space<vmem>>, vector<1x256x128xf32>
    %180 = vector.shape_cast %179 : vector<1x256x128xf32> to vector<256x128xf32>
    %cst_139 = arith.constant dense<0.000000e+00> : vector<5x128xf32>
    %181 = tpu.matmul %178, %180, %cst_139 {dimension_numbers = #tpu.dot_dimension_numbers<[1], [0], [0], [1], [0, 0, 1, 1], [], []>} : vector<5x256xf32>, vector<256x128xf32>, vector<5x128xf32> -> vector<5x128xf32>
    %182 = arith.addf %177, %181 : vector<5x128xf32>
    %c0_140 = arith.constant 0 : index
    %c0_141 = arith.constant 0 : index
    %183 = vector.load %arg5[%c0_140, %c0_141] : memref<1x128xf32, #tpu.memory_space<vmem>>, vector<1x128xf32>
    %184 = vector.broadcast %183 : vector<1x128xf32> to vector<5x128xf32>
    %185 = arith.addf %182, %184 : vector<5x128xf32>
    %cst_142 = arith.constant 0.000000e+00 : f32
    %186 = vector.broadcast %cst_142 : f32 to vector<5x128xf32>
    %187 = arith.cmpf ogt, %185, %186 : vector<5x128xf32>
    %cst_143 = arith.constant 0.00999999977 : f32
    %188 = vector.broadcast %cst_143 : f32 to vector<5x128xf32>
    %189 = arith.mulf %188, %185 : vector<5x128xf32>
    %190 = arith.select %187, %185, %189 : vector<5x128xi1>, vector<5x128xf32>
    %c0_144 = arith.constant 0 : index
    %c128_145 = arith.constant 128 : index
    %191 = vector.load %arg12[%c0_144, %c128_145] : memref<5x640xf32, #tpu.memory_space<vmem>>, vector<5x128xf32>
    tpu.vector_store %arg12[%c0_144, %c128_145], %190 {strides = array<i32>} : memref<5x640xf32, #tpu.memory_space<vmem>>, vector<5x128xf32>,
    %cst_146 = arith.constant 0.000000e+00 : f32
    %192 = vector.broadcast %cst_146 : f32 to vector<5x128xf32>
    %c0_147 = arith.constant 0 : index
    %c256_148 = arith.constant 256 : index
    %193 = vector.load %arg11[%c0_147, %c256_148] : memref<6x768xf32, #tpu.memory_space<vmem>>, vector<5x256xf32>
    %c0_149 = arith.constant 0 : index
    %c0_150 = arith.constant 0 : index
    %c0_151 = arith.constant 0 : index
    %194 = vector.load %arg4[%c0_149, %c0_150, %c0_151] : memref<2x256x128xf32, #tpu.memory_space<vmem>>, vector<1x256x128xf32>
    %195 = vector.shape_cast %194 : vector<1x256x128xf32> to vector<256x128xf32>
    %cst_152 = arith.constant dense<0.000000e+00> : vector<5x128xf32>
    %196 = tpu.matmul %193, %195, %cst_152 {dimension_numbers = #tpu.dot_dimension_numbers<[1], [0], [0], [1], [0, 0, 1, 1], [], []>} : vector<5x256xf32>, vector<256x128xf32>, vector<5x128xf32> -> vector<5x128xf32>
    %197 = arith.addf %192, %196 : vector<5x128xf32>
    %c1_153 = arith.constant 1 : index
    %c256_154 = arith.constant 256 : index
    %198 = vector.load %arg11[%c1_153, %c256_154] : memref<6x768xf32, #tpu.memory_space<vmem>>, vector<5x256xf32>
    %c1_155 = arith.constant 1 : index
    %c0_156 = arith.constant 0 : index
    %c0_157 = arith.constant 0 : index
    %199 = vector.load %arg4[%c1_155, %c0_156, %c0_157] : memref<2x256x128xf32, #tpu.memory_space<vmem>>, vector<1x256x128xf32>
    %200 = vector.shape_cast %199 : vector<1x256x128xf32> to vector<256x128xf32>
    %cst_158 = arith.constant dense<0.000000e+00> : vector<5x128xf32>
    %201 = tpu.matmul %198, %200, %cst_158 {dimension_numbers = #tpu.dot_dimension_numbers<[1], [0], [0], [1], [0, 0, 1, 1], [], []>} : vector<5x256xf32>, vector<256x128xf32>, vector<5x128xf32> -> vector<5x128xf32>
    %202 = arith.addf %197, %201 : vector<5x128xf32>
    %c0_159 = arith.constant 0 : index
    %c0_160 = arith.constant 0 : index
    %203 = vector.load %arg5[%c0_159, %c0_160] : memref<1x128xf32, #tpu.memory_space<vmem>>, vector<1x128xf32>
    %204 = vector.broadcast %203 : vector<1x128xf32> to vector<5x128xf32>
    %205 = arith.addf %202, %204 : vector<5x128xf32>
    %cst_161 = arith.constant 0.000000e+00 : f32
    %206 = vector.broadcast %cst_161 : f32 to vector<5x128xf32>
    %207 = arith.cmpf ogt, %205, %206 : vector<5x128xf32>
    %cst_162 = arith.constant 0.00999999977 : f32
    %208 = vector.broadcast %cst_162 : f32 to vector<5x128xf32>
    %209 = arith.mulf %208, %205 : vector<5x128xf32>
    %210 = arith.select %207, %205, %209 : vector<5x128xi1>, vector<5x128xf32>
    %c0_163 = arith.constant 0 : index
    %c256_164 = arith.constant 256 : index
    %211 = vector.load %arg12[%c0_163, %c256_164] : memref<5x640xf32, #tpu.memory_space<vmem>>, vector<5x128xf32>
    tpu.vector_store %arg12[%c0_163, %c256_164], %210 {strides = array<i32>} : memref<5x640xf32, #tpu.memory_space<vmem>>, vector<5x128xf32>,
    %cst_165 = arith.constant 0.000000e+00 : f32
    %212 = vector.broadcast %cst_165 : f32 to vector<5x128xf32>
    %c0_166 = arith.constant 0 : index
    %c384_167 = arith.constant 384 : index
    %213 = vector.load %arg11[%c0_166, %c384_167] : memref<6x768xf32, #tpu.memory_space<vmem>>, vector<5x256xf32>
    %c0_168 = arith.constant 0 : index
    %c0_169 = arith.constant 0 : index
    %c0_170 = arith.constant 0 : index
    %214 = vector.load %arg4[%c0_168, %c0_169, %c0_170] : memref<2x256x128xf32, #tpu.memory_space<vmem>>, vector<1x256x128xf32>
    %215 = vector.shape_cast %214 : vector<1x256x128xf32> to vector<256x128xf32>
    %cst_171 = arith.constant dense<0.000000e+00> : vector<5x128xf32>
    %216 = tpu.matmul %213, %215, %cst_171 {dimension_numbers = #tpu.dot_dimension_numbers<[1], [0], [0], [1], [0, 0, 1, 1], [], []>} : vector<5x256xf32>, vector<256x128xf32>, vector<5x128xf32> -> vector<5x128xf32>
    %217 = arith.addf %212, %216 : vector<5x128xf32>
    %c1_172 = arith.constant 1 : index
    %c384_173 = arith.constant 384 : index
    %218 = vector.load %arg11[%c1_172, %c384_173] : memref<6x768xf32, #tpu.memory_space<vmem>>, vector<5x256xf32>
    %c1_174 = arith.constant 1 : index
    %c0_175 = arith.constant 0 : index
    %c0_176 = arith.constant 0 : index
    %219 = vector.load %arg4[%c1_174, %c0_175, %c0_176] : memref<2x256x128xf32, #tpu.memory_space<vmem>>, vector<1x256x128xf32>
    %220 = vector.shape_cast %219 : vector<1x256x128xf32> to vector<256x128xf32>
    %cst_177 = arith.constant dense<0.000000e+00> : vector<5x128xf32>
    %221 = tpu.matmul %218, %220, %cst_177 {dimension_numbers = #tpu.dot_dimension_numbers<[1], [0], [0], [1], [0, 0, 1, 1], [], []>} : vector<5x256xf32>, vector<256x128xf32>, vector<5x128xf32> -> vector<5x128xf32>
    %222 = arith.addf %217, %221 : vector<5x128xf32>
    %c0_178 = arith.constant 0 : index
    %c0_179 = arith.constant 0 : index
    %223 = vector.load %arg5[%c0_178, %c0_179] : memref<1x128xf32, #tpu.memory_space<vmem>>, vector<1x128xf32>
    %224 = vector.broadcast %223 : vector<1x128xf32> to vector<5x128xf32>
    %225 = arith.addf %222, %224 : vector<5x128xf32>
    %cst_180 = arith.constant 0.000000e+00 : f32
    %226 = vector.broadcast %cst_180 : f32 to vector<5x128xf32>
    %227 = arith.cmpf ogt, %225, %226 : vector<5x128xf32>
    %cst_181 = arith.constant 0.00999999977 : f32
    %228 = vector.broadcast %cst_181 : f32 to vector<5x128xf32>
    %229 = arith.mulf %228, %225 : vector<5x128xf32>
    %230 = arith.select %227, %225, %229 : vector<5x128xi1>, vector<5x128xf32>
    %c0_182 = arith.constant 0 : index
    %c384_183 = arith.constant 384 : index
    %231 = vector.load %arg12[%c0_182, %c384_183] : memref<5x640xf32, #tpu.memory_space<vmem>>, vector<5x128xf32>
    tpu.vector_store %arg12[%c0_182, %c384_183], %230 {strides = array<i32>} : memref<5x640xf32, #tpu.memory_space<vmem>>, vector<5x128xf32>,
    %cst_184 = arith.constant 0.000000e+00 : f32
    %232 = vector.broadcast %cst_184 : f32 to vector<5x128xf32>
    %c0_185 = arith.constant 0 : index
    %c512_186 = arith.constant 512 : index
    %233 = vector.load %arg11[%c0_185, %c512_186] : memref<6x768xf32, #tpu.memory_space<vmem>>, vector<5x256xf32>
    %c0_187 = arith.constant 0 : index
    %c0_188 = arith.constant 0 : index
    %c0_189 = arith.constant 0 : index
    %234 = vector.load %arg4[%c0_187, %c0_188, %c0_189] : memref<2x256x128xf32, #tpu.memory_space<vmem>>, vector<1x256x128xf32>
    %235 = vector.shape_cast %234 : vector<1x256x128xf32> to vector<256x128xf32>
    %cst_190 = arith.constant dense<0.000000e+00> : vector<5x128xf32>
    %236 = tpu.matmul %233, %235, %cst_190 {dimension_numbers = #tpu.dot_dimension_numbers<[1], [0], [0], [1], [0, 0, 1, 1], [], []>} : vector<5x256xf32>, vector<256x128xf32>, vector<5x128xf32> -> vector<5x128xf32>
    %237 = arith.addf %232, %236 : vector<5x128xf32>
    %c1_191 = arith.constant 1 : index
    %c512_192 = arith.constant 512 : index
    %238 = vector.load %arg11[%c1_191, %c512_192] : memref<6x768xf32, #tpu.memory_space<vmem>>, vector<5x256xf32>
    %c1_193 = arith.constant 1 : index
    %c0_194 = arith.constant 0 : index
    %c0_195 = arith.constant 0 : index
    %239 = vector.load %arg4[%c1_193, %c0_194, %c0_195] : memref<2x256x128xf32, #tpu.memory_space<vmem>>, vector<1x256x128xf32>
    %240 = vector.shape_cast %239 : vector<1x256x128xf32> to vector<256x128xf32>
    %cst_196 = arith.constant dense<0.000000e+00> : vector<5x128xf32>
    %241 = tpu.matmul %238, %240, %cst_196 {dimension_numbers = #tpu.dot_dimension_numbers<[1], [0], [0], [1], [0, 0, 1, 1], [], []>} : vector<5x256xf32>, vector<256x128xf32>, vector<5x128xf32> -> vector<5x128xf32>
    %242 = arith.addf %237, %241 : vector<5x128xf32>
    %c0_197 = arith.constant 0 : index
    %c0_198 = arith.constant 0 : index
    %243 = vector.load %arg5[%c0_197, %c0_198] : memref<1x128xf32, #tpu.memory_space<vmem>>, vector<1x128xf32>
    %244 = vector.broadcast %243 : vector<1x128xf32> to vector<5x128xf32>
    %245 = arith.addf %242, %244 : vector<5x128xf32>
    %cst_199 = arith.constant 0.000000e+00 : f32
    %246 = vector.broadcast %cst_199 : f32 to vector<5x128xf32>
    %247 = arith.cmpf ogt, %245, %246 : vector<5x128xf32>
    %cst_200 = arith.constant 0.00999999977 : f32
    %248 = vector.broadcast %cst_200 : f32 to vector<5x128xf32>
    %249 = arith.mulf %248, %245 : vector<5x128xf32>
    %250 = arith.select %247, %245, %249 : vector<5x128xi1>, vector<5x128xf32>
    %c0_201 = arith.constant 0 : index
    %c512_202 = arith.constant 512 : index
    %251 = vector.load %arg12[%c0_201, %c512_202] : memref<5x640xf32, #tpu.memory_space<vmem>>, vector<5x128xf32>
    tpu.vector_store %arg12[%c0_201, %c512_202], %250 {strides = array<i32>} : memref<5x640xf32, #tpu.memory_space<vmem>>, vector<5x128xf32>,
    %c0_203 = arith.constant 0 : index
    %c0_204 = arith.constant 0 : index
    %252 = vector.load %arg12[%c0_203, %c0_204] : memref<5x640xf32, #tpu.memory_space<vmem>>, vector<5x128xf32>
    %c0_205 = arith.constant 0 : index
    %c0_206 = arith.constant 0 : index
    %253 = vector.load %arg6[%c0_205, %c0_206] : memref<128x128xf32, #tpu.memory_space<vmem>>, vector<128x128xf32>
    %cst_207 = arith.constant dense<0.000000e+00> : vector<5x128xf32>
    %254 = tpu.matmul %252, %253, %cst_207 {dimension_numbers = #tpu.dot_dimension_numbers<[1], [0], [0], [1], [0, 0, 1, 1], [], []>} : vector<5x128xf32>, vector<128x128xf32>, vector<5x128xf32> -> vector<5x128xf32>
    %c0_208 = arith.constant 0 : index
    %c0_209 = arith.constant 0 : index
    %255 = vector.load %arg7[%c0_208, %c0_209] : memref<1x128xf32, #tpu.memory_space<vmem>>, vector<1x128xf32>
    %256 = vector.broadcast %255 : vector<1x128xf32> to vector<5x128xf32>
    %257 = arith.addf %254, %256 : vector<5x128xf32>
    %cst_210 = arith.constant 0.000000e+00 : f32
    %258 = vector.broadcast %cst_210 : f32 to vector<5x128xf32>
    %259 = arith.cmpf ogt, %257, %258 : vector<5x128xf32>
    %cst_211 = arith.constant 0.00999999977 : f32
    %260 = vector.broadcast %cst_211 : f32 to vector<5x128xf32>
    %261 = arith.mulf %260, %257 : vector<5x128xf32>
    %262 = arith.select %259, %257, %261 : vector<5x128xi1>, vector<5x128xf32>
    %c0_212 = arith.constant 0 : index
    %c0_213 = arith.constant 0 : index
    %263 = vector.load %arg13[%c0_212, %c0_213] : memref<5x640xf32, #tpu.memory_space<vmem>>, vector<5x128xf32>
    tpu.vector_store %arg13[%c0_212, %c0_213], %262 {strides = array<i32>} : memref<5x640xf32, #tpu.memory_space<vmem>>, vector<5x128xf32>,
    %c0_214 = arith.constant 0 : index
    %c128_215 = arith.constant 128 : index
    %264 = vector.load %arg12[%c0_214, %c128_215] : memref<5x640xf32, #tpu.memory_space<vmem>>, vector<5x128xf32>
    %c0_216 = arith.constant 0 : index
    %c0_217 = arith.constant 0 : index
    %265 = vector.load %arg6[%c0_216, %c0_217] : memref<128x128xf32, #tpu.memory_space<vmem>>, vector<128x128xf32>
    %cst_218 = arith.constant dense<0.000000e+00> : vector<5x128xf32>
    %266 = tpu.matmul %264, %265, %cst_218 {dimension_numbers = #tpu.dot_dimension_numbers<[1], [0], [0], [1], [0, 0, 1, 1], [], []>} : vector<5x128xf32>, vector<128x128xf32>, vector<5x128xf32> -> vector<5x128xf32>
    %c0_219 = arith.constant 0 : index
    %c0_220 = arith.constant 0 : index
    %267 = vector.load %arg7[%c0_219, %c0_220] : memref<1x128xf32, #tpu.memory_space<vmem>>, vector<1x128xf32>
    %268 = vector.broadcast %267 : vector<1x128xf32> to vector<5x128xf32>
    %269 = arith.addf %266, %268 : vector<5x128xf32>
    %cst_221 = arith.constant 0.000000e+00 : f32
    %270 = vector.broadcast %cst_221 : f32 to vector<5x128xf32>
    %271 = arith.cmpf ogt, %269, %270 : vector<5x128xf32>
    %cst_222 = arith.constant 0.00999999977 : f32
    %272 = vector.broadcast %cst_222 : f32 to vector<5x128xf32>
    %273 = arith.mulf %272, %269 : vector<5x128xf32>
    %274 = arith.select %271, %269, %273 : vector<5x128xi1>, vector<5x128xf32>
    %c0_223 = arith.constant 0 : index
    %c128_224 = arith.constant 128 : index
    %275 = vector.load %arg13[%c0_223, %c128_224] : memref<5x640xf32, #tpu.memory_space<vmem>>, vector<5x128xf32>
    tpu.vector_store %arg13[%c0_223, %c128_224], %274 {strides = array<i32>} : memref<5x640xf32, #tpu.memory_space<vmem>>, vector<5x128xf32>,
    %c0_225 = arith.constant 0 : index
    %c256_226 = arith.constant 256 : index
    %276 = vector.load %arg12[%c0_225, %c256_226] : memref<5x640xf32, #tpu.memory_space<vmem>>, vector<5x128xf32>
    %c0_227 = arith.constant 0 : index
    %c0_228 = arith.constant 0 : index
    %277 = vector.load %arg6[%c0_227, %c0_228] : memref<128x128xf32, #tpu.memory_space<vmem>>, vector<128x128xf32>
    %cst_229 = arith.constant dense<0.000000e+00> : vector<5x128xf32>
    %278 = tpu.matmul %276, %277, %cst_229 {dimension_numbers = #tpu.dot_dimension_numbers<[1], [0], [0], [1], [0, 0, 1, 1], [], []>} : vector<5x128xf32>, vector<128x128xf32>, vector<5x128xf32> -> vector<5x128xf32>
    %c0_230 = arith.constant 0 : index
    %c0_231 = arith.constant 0 : index
    %279 = vector.load %arg7[%c0_230, %c0_231] : memref<1x128xf32, #tpu.memory_space<vmem>>, vector<1x128xf32>
    %280 = vector.broadcast %279 : vector<1x128xf32> to vector<5x128xf32>
    %281 = arith.addf %278, %280 : vector<5x128xf32>
    %cst_232 = arith.constant 0.000000e+00 : f32
    %282 = vector.broadcast %cst_232 : f32 to vector<5x128xf32>
    %283 = arith.cmpf ogt, %281, %282 : vector<5x128xf32>
    %cst_233 = arith.constant 0.00999999977 : f32
    %284 = vector.broadcast %cst_233 : f32 to vector<5x128xf32>
    %285 = arith.mulf %284, %281 : vector<5x128xf32>
    %286 = arith.select %283, %281, %285 : vector<5x128xi1>, vector<5x128xf32>
    %c0_234 = arith.constant 0 : index
    %c256_235 = arith.constant 256 : index
    %287 = vector.load %arg13[%c0_234, %c256_235] : memref<5x640xf32, #tpu.memory_space<vmem>>, vector<5x128xf32>
    tpu.vector_store %arg13[%c0_234, %c256_235], %286 {strides = array<i32>} : memref<5x640xf32, #tpu.memory_space<vmem>>, vector<5x128xf32>,
    %c0_236 = arith.constant 0 : index
    %c384_237 = arith.constant 384 : index
    %288 = vector.load %arg12[%c0_236, %c384_237] : memref<5x640xf32, #tpu.memory_space<vmem>>, vector<5x128xf32>
    %c0_238 = arith.constant 0 : index
    %c0_239 = arith.constant 0 : index
    %289 = vector.load %arg6[%c0_238, %c0_239] : memref<128x128xf32, #tpu.memory_space<vmem>>, vector<128x128xf32>
    %cst_240 = arith.constant dense<0.000000e+00> : vector<5x128xf32>
    %290 = tpu.matmul %288, %289, %cst_240 {dimension_numbers = #tpu.dot_dimension_numbers<[1], [0], [0], [1], [0, 0, 1, 1], [], []>} : vector<5x128xf32>, vector<128x128xf32>, vector<5x128xf32> -> vector<5x128xf32>
    %c0_241 = arith.constant 0 : index
    %c0_242 = arith.constant 0 : index
    %291 = vector.load %arg7[%c0_241, %c0_242] : memref<1x128xf32, #tpu.memory_space<vmem>>, vector<1x128xf32>
    %292 = vector.broadcast %291 : vector<1x128xf32> to vector<5x128xf32>
    %293 = arith.addf %290, %292 : vector<5x128xf32>
    %cst_243 = arith.constant 0.000000e+00 : f32
    %294 = vector.broadcast %cst_243 : f32 to vector<5x128xf32>
    %295 = arith.cmpf ogt, %293, %294 : vector<5x128xf32>
    %cst_244 = arith.constant 0.00999999977 : f32
    %296 = vector.broadcast %cst_244 : f32 to vector<5x128xf32>
    %297 = arith.mulf %296, %293 : vector<5x128xf32>
    %298 = arith.select %295, %293, %297 : vector<5x128xi1>, vector<5x128xf32>
    %c0_245 = arith.constant 0 : index
    %c384_246 = arith.constant 384 : index
    %299 = vector.load %arg13[%c0_245, %c384_246] : memref<5x640xf32, #tpu.memory_space<vmem>>, vector<5x128xf32>
    tpu.vector_store %arg13[%c0_245, %c384_246], %298 {strides = array<i32>} : memref<5x640xf32, #tpu.memory_space<vmem>>, vector<5x128xf32>,
    %c0_247 = arith.constant 0 : index
    %c512_248 = arith.constant 512 : index
    %300 = vector.load %arg12[%c0_247, %c512_248] : memref<5x640xf32, #tpu.memory_space<vmem>>, vector<5x128xf32>
    %c0_249 = arith.constant 0 : index
    %c0_250 = arith.constant 0 : index
    %301 = vector.load %arg6[%c0_249, %c0_250] : memref<128x128xf32, #tpu.memory_space<vmem>>, vector<128x128xf32>
    %cst_251 = arith.constant dense<0.000000e+00> : vector<5x128xf32>
    %302 = tpu.matmul %300, %301, %cst_251 {dimension_numbers = #tpu.dot_dimension_numbers<[1], [0], [0], [1], [0, 0, 1, 1], [], []>} : vector<5x128xf32>, vector<128x128xf32>, vector<5x128xf32> -> vector<5x128xf32>
    %c0_252 = arith.constant 0 : index
    %c0_253 = arith.constant 0 : index
    %303 = vector.load %arg7[%c0_252, %c0_253] : memref<1x128xf32, #tpu.memory_space<vmem>>, vector<1x128xf32>
    %304 = vector.broadcast %303 : vector<1x128xf32> to vector<5x128xf32>
    %305 = arith.addf %302, %304 : vector<5x128xf32>
    %cst_254 = arith.constant 0.000000e+00 : f32
    %306 = vector.broadcast %cst_254 : f32 to vector<5x128xf32>
    %307 = arith.cmpf ogt, %305, %306 : vector<5x128xf32>
    %cst_255 = arith.constant 0.00999999977 : f32
    %308 = vector.broadcast %cst_255 : f32 to vector<5x128xf32>
    %309 = arith.mulf %308, %305 : vector<5x128xf32>
    %310 = arith.select %307, %305, %309 : vector<5x128xi1>, vector<5x128xf32>
    %c0_256 = arith.constant 0 : index
    %c512_257 = arith.constant 512 : index
    %311 = vector.load %arg13[%c0_256, %c512_257] : memref<5x640xf32, #tpu.memory_space<vmem>>, vector<5x128xf32>
    tpu.vector_store %arg13[%c0_256, %c512_257], %310 {strides = array<i32>} : memref<5x640xf32, #tpu.memory_space<vmem>>, vector<5x128xf32>,
    %cst_258 = arith.constant 0.000000e+00 : f32
    %312 = vector.broadcast %cst_258 : f32 to vector<1x128xf32>
    %c0_259 = arith.constant 0 : index
    %c0_260 = arith.constant 0 : index
    %313 = vector.load %arg13[%c0_259, %c0_260] : memref<5x640xf32, #tpu.memory_space<vmem>>, vector<1x640xf32>
    %c0_261 = arith.constant 0 : index
    %c0_262 = arith.constant 0 : index
    %c0_263 = arith.constant 0 : index
    %314 = vector.load %arg8[%c0_261, %c0_262, %c0_263] : memref<5x640x128xf32, #tpu.memory_space<vmem>>, vector<1x640x128xf32>
    %315 = vector.shape_cast %314 : vector<1x640x128xf32> to vector<640x128xf32>
    %cst_264 = arith.constant dense<0.000000e+00> : vector<1x128xf32>
    %316 = tpu.matmul %313, %315, %cst_264 {dimension_numbers = #tpu.dot_dimension_numbers<[1], [0], [0], [1], [0, 0, 1, 1], [], []>} : vector<1x640xf32>, vector<640x128xf32>, vector<1x128xf32> -> vector<1x128xf32>
    %317 = arith.addf %312, %316 : vector<1x128xf32>
    %c1_265 = arith.constant 1 : index
    %c0_266 = arith.constant 0 : index
    %318 = vector.load %arg13[%c1_265, %c0_266] : memref<5x640xf32, #tpu.memory_space<vmem>>, vector<1x640xf32>
    %c1_267 = arith.constant 1 : index
    %c0_268 = arith.constant 0 : index
    %c0_269 = arith.constant 0 : index
    %319 = vector.load %arg8[%c1_267, %c0_268, %c0_269] : memref<5x640x128xf32, #tpu.memory_space<vmem>>, vector<1x640x128xf32>
    %320 = vector.shape_cast %319 : vector<1x640x128xf32> to vector<640x128xf32>
    %cst_270 = arith.constant dense<0.000000e+00> : vector<1x128xf32>
    %321 = tpu.matmul %318, %320, %cst_270 {dimension_numbers = #tpu.dot_dimension_numbers<[1], [0], [0], [1], [0, 0, 1, 1], [], []>} : vector<1x640xf32>, vector<640x128xf32>, vector<1x128xf32> -> vector<1x128xf32>
    %322 = arith.addf %317, %321 : vector<1x128xf32>
    %c2_271 = arith.constant 2 : index
    %c0_272 = arith.constant 0 : index
    %323 = vector.load %arg13[%c2_271, %c0_272] : memref<5x640xf32, #tpu.memory_space<vmem>>, vector<1x640xf32>
    %c2_273 = arith.constant 2 : index
    %c0_274 = arith.constant 0 : index
    %c0_275 = arith.constant 0 : index
    %324 = vector.load %arg8[%c2_273, %c0_274, %c0_275] : memref<5x640x128xf32, #tpu.memory_space<vmem>>, vector<1x640x128xf32>
    %325 = vector.shape_cast %324 : vector<1x640x128xf32> to vector<640x128xf32>
    %cst_276 = arith.constant dense<0.000000e+00> : vector<1x128xf32>
    %326 = tpu.matmul %323, %325, %cst_276 {dimension_numbers = #tpu.dot_dimension_numbers<[1], [0], [0], [1], [0, 0, 1, 1], [], []>} : vector<1x640xf32>, vector<640x128xf32>, vector<1x128xf32> -> vector<1x128xf32>
    %327 = arith.addf %322, %326 : vector<1x128xf32>
    %c3 = arith.constant 3 : index
    %c0_277 = arith.constant 0 : index
    %328 = vector.load %arg13[%c3, %c0_277] : memref<5x640xf32, #tpu.memory_space<vmem>>, vector<1x640xf32>
    %c3_278 = arith.constant 3 : index
    %c0_279 = arith.constant 0 : index
    %c0_280 = arith.constant 0 : index
    %329 = vector.load %arg8[%c3_278, %c0_279, %c0_280] : memref<5x640x128xf32, #tpu.memory_space<vmem>>, vector<1x640x128xf32>
    %330 = vector.shape_cast %329 : vector<1x640x128xf32> to vector<640x128xf32>
    %cst_281 = arith.constant dense<0.000000e+00> : vector<1x128xf32>
    %331 = tpu.matmul %328, %330, %cst_281 {dimension_numbers = #tpu.dot_dimension_numbers<[1], [0], [0], [1], [0, 0, 1, 1], [], []>} : vector<1x640xf32>, vector<640x128xf32>, vector<1x128xf32> -> vector<1x128xf32>
    %332 = arith.addf %327, %331 : vector<1x128xf32>
    %c4 = arith.constant 4 : index
    %c0_282 = arith.constant 0 : index
    %333 = vector.load %arg13[%c4, %c0_282] : memref<5x640xf32, #tpu.memory_space<vmem>>, vector<1x640xf32>
    %c4_283 = arith.constant 4 : index
    %c0_284 = arith.constant 0 : index
    %c0_285 = arith.constant 0 : index
    %334 = vector.load %arg8[%c4_283, %c0_284, %c0_285] : memref<5x640x128xf32, #tpu.memory_space<vmem>>, vector<1x640x128xf32>
    %335 = vector.shape_cast %334 : vector<1x640x128xf32> to vector<640x128xf32>
    %cst_286 = arith.constant dense<0.000000e+00> : vector<1x128xf32>
    %336 = tpu.matmul %333, %335, %cst_286 {dimension_numbers = #tpu.dot_dimension_numbers<[1], [0], [0], [1], [0, 0, 1, 1], [], []>} : vector<1x640xf32>, vector<640x128xf32>, vector<1x128xf32> -> vector<1x128xf32>
    %337 = arith.addf %332, %336 : vector<1x128xf32>
    %c0_287 = arith.constant 0 : index
    %c0_288 = arith.constant 0 : index
    %338 = vector.load %arg9[%c0_287, %c0_288] : memref<1x128xf32, #tpu.memory_space<vmem>>, vector<1x128xf32>
    %339 = arith.addf %337, %338 : vector<1x128xf32>
    %cst_289 = arith.constant 0.000000e+00 : f32
    %340 = vector.broadcast %cst_289 : f32 to vector<1x128xf32>
    %341 = arith.cmpf ogt, %339, %340 : vector<1x128xf32>
    %cst_290 = arith.constant 0.00999999977 : f32
    %342 = vector.broadcast %cst_290 : f32 to vector<1x128xf32>
    %343 = arith.mulf %342, %339 : vector<1x128xf32>
    %344 = arith.select %341, %339, %343 : vector<1x128xi1>, vector<1x128xf32>
    %c0_291 = arith.constant 0 : index
    %c0_292 = arith.constant 0 : index
    %c0_293 = arith.constant 0 : index
    %345 = vector.load %arg10[%c0_291, %c0_292, %c0_293] : memref<1x1x128xf32, #tpu.memory_space<vmem>>, vector<1x1x128xf32>
    %346 = vector.shape_cast %345 : vector<1x1x128xf32> to vector<1x128xf32>
    %347 = vector.shape_cast %344 : vector<1x128xf32> to vector<1x1x128xf32>
    tpu.vector_store %arg10[%c0_291, %c0_292, %c0_293], %347 {strides = array<i32>} : memref<1x1x128xf32, #tpu.memory_space<vmem>>, vector<1x1x128xf32>,
    return
  }
  func.func @transform_0(%arg0: i32) -> (i32, i32, i32) {
    %c0_i32 = arith.constant 0 : i32
    %c0_i32_0 = arith.constant 0 : i32
    %c0_i32_1 = arith.constant 0 : i32
    return %arg0, %c0_i32, %c0_i32_0 : i32, i32, i32
  }
  func.func @transform_1(%arg0: i32) -> (i32, i32, i32) {
    %c0_i32 = arith.constant 0 : i32
    %c0_i32_0 = arith.constant 0 : i32
    %c0_i32_1 = arith.constant 0 : i32
    %c0_i32_2 = arith.constant 0 : i32
    return %c0_i32, %c0_i32_0, %c0_i32_1 : i32, i32, i32
  }
  func.func @transform_2(%arg0: i32) -> (i32, i32) {
    %c0_i32 = arith.constant 0 : i32
    %c0_i32_0 = arith.constant 0 : i32
    %c0_i32_1 = arith.constant 0 : i32
    return %c0_i32, %c0_i32_0 : i32, i32
  }
  func.func @transform_3(%arg0: i32) -> (i32, i32, i32) {
    %c0_i32 = arith.constant 0 : i32
    %c0_i32_0 = arith.constant 0 : i32
    %c0_i32_1 = arith.constant 0 : i32
    %c0_i32_2 = arith.constant 0 : i32
    return %c0_i32, %c0_i32_0, %c0_i32_1 : i32, i32, i32
  }
  func.func @transform_4(%arg0: i32) -> (i32, i32) {
    %c0_i32 = arith.constant 0 : i32
    %c0_i32_0 = arith.constant 0 : i32
    %c0_i32_1 = arith.constant 0 : i32
    return %c0_i32, %c0_i32_0 : i32, i32
  }
  func.func @transform_5(%arg0: i32) -> (i32, i32) {
    %c0_i32 = arith.constant 0 : i32
    %c0_i32_0 = arith.constant 0 : i32
    %c0_i32_1 = arith.constant 0 : i32
    return %c0_i32, %c0_i32_0 : i32, i32
  }
  func.func @transform_6(%arg0: i32) -> (i32, i32) {
    %c0_i32 = arith.constant 0 : i32
    %c0_i32_0 = arith.constant 0 : i32
    %c0_i32_1 = arith.constant 0 : i32
    return %c0_i32, %c0_i32_0 : i32, i32
  }
  func.func @transform_7(%arg0: i32) -> (i32, i32, i32) {
    %c0_i32 = arith.constant 0 : i32
    %c0_i32_0 = arith.constant 0 : i32
    %c0_i32_1 = arith.constant 0 : i32
    %c0_i32_2 = arith.constant 0 : i32
    return %c0_i32, %c0_i32_0, %c0_i32_1 : i32, i32, i32
  }
  func.func @transform_8(%arg0: i32) -> (i32, i32) {
    %c0_i32 = arith.constant 0 : i32
    %c0_i32_0 = arith.constant 0 : i32
    %c0_i32_1 = arith.constant 0 : i32
    return %c0_i32, %c0_i32_0 : i32, i32
  }
  func.func @transform_9(%arg0: i32) -> (i32, i32, i32) {
    %c0_i32 = arith.constant 0 : i32
    %c0_i32_0 = arith.constant 0 : i32
    %c0_i32_1 = arith.constant 0 : i32
    return %arg0, %c0_i32, %c0_i32_0 : i32, i32, i32
  }
}

</mosaic_0001>

<bundles_post_ra>
// kernel: _lambda_.1
= control target key start
LH: loop header
LB: loop body
LE: loop exit
PB: predicated region body
PF: predicated region fallthrough
CT: control target
= control target key end

     0   :  { %s8405_s0 = inlined_call_operand.vmem [shape: f32[2,8,32], index: 0, kind: input, shape index: {}]   ;;  %s8406_s1 = inlined_call_operand.hbm [shape: f32[3,12,128], index: 1, kind: input, shape index: {}]   ;;  %s8407_s2 = inlined_call_operand.hbm [shape: f32[1,128], index: 2, kind: input, shape index: {}]   ;;  %s8408_s3 = inlined_call_operand.hbm [shape: f32[2,256,128], index: 3, kind: input, shape index: {}]   ;;  %s8409_s4 = inlined_call_operand.hbm [shape: f32[1,128], index: 4, kind: input, shape index: {}]   ;;  %s8410_s5 = inlined_call_operand.hbm [shape: f32[128,128], index: 5, kind: input, shape index: {}]   ;;  %s8411_s6 = inlined_call_operand.hbm [shape: f32[1,128], index: 6, kind: input, shape index: {}]   ;;  %s8412_s7 = inlined_call_operand.hbm [shape: f32[5,640,128], index: 7, kind: input, shape index: {}]   ;;  %s8413_s8 = inlined_call_operand.hbm [shape: f32[1,128], index: 8, kind: input, shape index: {}]   ;;  %s8414_s9 = inlined_call_operand.hbm [shape: f32[2,1,128], index: 9, kind: output, shape index: {}]  }
   0x1   :  { %8466 = sst [smem:[#allocation47_spill]] %s8407_s2 }
   0x2   :  { %14 = vsyncpa [#allocation6], 0 }
   0x3   :  { %15 = vsyncpa [#allocation9], 0 }
   0x4   :  { %16 = vsyncpa [#allocation12], 0 }
   0x5   :  { %17 = vsyncpa [#allocation15], 0 }
   0x6   :  { %18 = vsyncpa [#allocation18], 0 }
   0x7   :  { %19 = vsyncpa [#allocation7], 0 }
   0x8   :  { %21 = vsyncpa [#allocation7 + $0x1], 0  ;;  %s7281_s30 = smov 0   ;;  %s7283_s10 = smov 0  }
   0x9   :  { %s7285_s11 = smov 0   ;;  %s7287_s12 = smov 0  }
   0xa LB: > { %s7302_s13 = sadd.s32 4294967295, %s7211_s12   ;;  %s5318_s14 = sadd.s32 4294967294, %s7211_s12   ;;  %s7211_s12 = sphi %s7287_s12, %s8541_s12   ;;  %s7207_s11 = sphi %s7285_s11, %s8540_s11   ;;  %s7203_s10 = sphi %s7283_s10, %s8539_s10   ;;  %s7199_s30 = sphi %s7281_s30, %s8538_s30  }
   0xb   : > { %s7306_s15 = sadd.s32 1, %s7211_s12   ;;  %s228_s16 = sadd.s32 1, %s7207_s11 }
   0xc   : > { %s225_s17 = ssub.s32 %s7211_s12, %s7306_s15  ;;  %p238_p0 = scmp.ne.s32.totalorder %s7207_s11, %s7203_s10 }
   0xd   : > { %p226_p1 = scmp.eq.s32.totalorder %s225_s17, 0  ;;  %p239_p2 = scmp.eq.s32.totalorder %s7302_s13, 1 }
   0xe   : > { %p244_p3 = scmp.ne.s32.totalorder %s7203_s10, %s7199_s30  ;;  %p245_p4 = scmp.eq.s32.totalorder %s5318_s14, 1 }
   0xf   : > { %s7317_s18 = scalar_select %p226_p1, %s7207_s11, %s228_s16  }
  0x10   : > { %p7319_p5 = por %p239_p2, %p238_p0  ;;  %p7323_p6 = por %p245_p4, %p244_p3 }
  0x11   : > { %p5319_p7 = scmp.ge.s32.totalorder %s7211_s12, 1  ;;  %p252_p8 = scmp.lt.s32.totalorder %s7211_s12, 3 }
  0x12   : > { %s8467_s19 = scalar_select %p7319_p5, 1, 0 }
  0x13   : > { %s8468_s20 = scalar_select %p7323_p6, 1, 0 }
  0x14   : > { %p8415_p9 = scmp.eq.s32.totalorder %s7302_s13, 0  ;;  %p7330_p10 = pnand %p5319_p7, %p252_p8 }
  0x15   : > { %s7213_s22 = smov [#allocation8]   ;;  %s7214_s24 = smov [#allocation11]  }
  0x16   : > { %s8469_s21 = scalar_select %p7330_p10, 1, 0 }
  0x17   : > { %s278_s23 = sshll.u32 %s7213_s22, 4  ;;  %p6828_p11 = pneg %p7330_p10  ;;  %s279_s23 = int_to_ptr.vmem [resolvable:$true] %s278_s23 }
  0x18   : > { %s302_s25 = sshll.u32 %s7214_s24, 4  ;;  %s7215_s27 = smov [#allocation14]   ;;  %s303_s25 = int_to_ptr.vmem [resolvable:$true] %s302_s25 }
  0x19   : > { %p7338_p12 = pnand %p8415_p9, %p6828_p11  ;;  %s326_s28 = sshll.u32 %s7215_s27, 4  ;;  %s7342_s28 = int_to_ptr.vmem [resolvable:$true] %s326_s28 }
  0x1a   : > { %s6934_s14 = scalar_lea.vmem %s279_s23, 16  ;;  %s6941_s16 = scalar_lea.vmem %s279_s23, 32 }
  0x1b   : > { %p7346_p13 = pneg %p7338_p12  ;;  %p6935_p0 = scmp.ne.s32.totalorder %s279_s23, %s6934_s14 }
  0x1c   : > { %p6942_p3 = scmp.lt.s32.totalorder %s279_s23, %s279_s23  ;;  %p6943_p4 = scmp.lt.s32.totalorder %s6941_s16, %s6934_s14 }
  0x1d   : > { %p6937_p1 = pnand %p6935_p0, %p7346_p13 }
  0x1e   : > { %p6944_p7 = por %p6943_p4, %p6942_p3 }
  0x1f   : > { %p6938_p2 = pneg %p6937_p1 }
  0x21   : > { %p6945_p8 = pnand %p6944_p7, %p6938_p2 }
  0x23   : > { %6948 = shalt.err (!%p6945_p8)
}
  0x24   : > { %s8472_s2 = sld [smem:[#allocation47_spill]]  ;;  %s6960_s24 = scalar_lea.vmem %s303_s25, 16 }
  0x25   : > { %p6961_p11 = scmp.ne.s32.totalorder %s303_s25, %s6960_s24  ;;  %s6967_s27 = scalar_lea.vmem %s303_s25, 32 }
  0x26   : > { %p6968_p0 = scmp.lt.s32.totalorder %s303_s25, %s303_s25  ;;  %p6969_p1 = scmp.lt.s32.totalorder %s6967_s27, %s6960_s24 }
  0x27   : > { %p6963_p9 = pnand %p6961_p11, %p7346_p13 }
  0x28   : > { %p6970_p5 = por %p6969_p1, %p6968_p0 }
  0x29   : > { %p6964_p6 = pneg %p6963_p9 }
  0x2a   : > { %6834 = dma.hbm_to_vmem [thread:$0]  (!%p7338_p12), %s8472_s2, 16, %s279_s23, [#allocation9]  }
  0x2b   : > { %p6971_p10 = pnand %p6970_p5, %p6964_p6 }
  0x2d   : > { %6974 = shalt.err (!%p6971_p10)
}
  0x2e   : > { %6840 = dma.hbm_to_vmem [thread:$0]  (!%p7338_p12), %s8409_s4, 16, %s303_s25, [#allocation12]  }
  0x2f   : > { %s6986_s23 = scalar_lea.vmem %s7342_s28, 16  ;;  %s6993_s17 = scalar_lea.vmem %s7342_s28, 32 }
  0x30   : > { %p6987_p2 = scmp.ne.s32.totalorder %s7342_s28, %s6986_s23  ;;  %p6994_p5 = scmp.lt.s32.totalorder %s7342_s28, %s7342_s28 }
  0x31   : > { %p6995_p6 = scmp.lt.s32.totalorder %s6993_s17, %s6986_s23 }
  0x32   : > { %p6989_p9 = pnand %p6987_p2, %p7346_p13 }
  0x33   : > { %p6996_p10 = por %p6995_p6, %p6994_p5 }
  0x34   : > { %p6990_p3 = pneg %p6989_p9 }
  0x36   : > { %p6997_p4 = pnand %p6996_p10, %p6990_p3 }
  0x38   : > { %7000 = shalt.err (!%p6997_p4)
}
  0x39   : > { %6846 = dma.hbm_to_vmem [thread:$0]  (!%p7338_p12), %s8411_s6, 16, %s7342_s28, [#allocation15]  }
  0x3a   : > { %s7216_s25 = smov [#allocation5]  }
  0x3b   : > { %s264_s27 = sshll.u32 %s7216_s25, 4  ;;  %s265_s27 = int_to_ptr.vmem [resolvable:$true] %s264_s27 }
  0x3c   : > { %s7012_s14 = scalar_lea.vmem %s265_s27, 768  ;;  %p7020_p0 = scmp.lt.s32.totalorder %s265_s27, %s265_s27 }
  0x3d   : > { %p7013_p7 = scmp.ne.s32.totalorder %s265_s27, %s7012_s14  ;;  %p7021_p1 = scmp.lt.s32.totalorder %s7012_s14, %s7012_s14 }
  0x3f   : > { %p7015_p8 = pnand %p7013_p7, %p7346_p13  ;;  %p7022_p2 = por %p7021_p1, %p7020_p0 }
  0x41   : > { %p7016_p11 = pneg %p7015_p8 }
  0x43   : > { %p7023_p9 = pnand %p7022_p2, %p7016_p11 }
  0x45   : > { %7026 = shalt.err (!%p7023_p9)
}
  0x46   : > { %s7217_s16 = smov 128   ;;  %s7218_s23 = smov 8  }
  0x47   : > { %6831 = dma.hbm_to_vmem [thread:$0]  (!%p7338_p12), %s8406_s1, 768, %s265_s27, [#allocation6], %s7217_s16, %s7217_s16, %s7218_s23  }
  0x48   : > { %s7219_s22 = smov [#allocation10]   ;;  %s7220_s25 = smov [#allocation13]  }
  0x49   : > { %s288_s24 = sshll.u32 %s7219_s22, 4  ;;  %s312_s2 = sshll.u32 %s7220_s25, 4  ;;  %s289_s24 = int_to_ptr.vmem [resolvable:$true] %s288_s24  ;;  %s313_s2 = int_to_ptr.vmem [resolvable:$true] %s312_s2 }
  0x4a   : > { %s7038_s14 = scalar_lea.vmem %s289_s24, 8192  ;;  %p7046_p10 = scmp.lt.s32.totalorder %s289_s24, %s289_s24 }
  0x4b   : > { %p7039_p3 = scmp.ne.s32.totalorder %s289_s24, %s7038_s14  ;;  %p7047_p4 = scmp.lt.s32.totalorder %s7038_s14, %s7038_s14 }
  0x4d   : > { %p7041_p5 = pnand %p7039_p3, %p7346_p13  ;;  %p7048_p7 = por %p7047_p4, %p7046_p10 }
  0x4f   : > { %p7042_p6 = pneg %p7041_p5 }
  0x51   : > { %p7049_p8 = pnand %p7048_p7, %p7042_p6 }
  0x53   : > { %7052 = shalt.err (!%p7049_p8)
}
  0x54   : > { %6837 = dma.hbm_to_vmem [thread:$0]  (!%p7338_p12), %s8408_s3, 8192, %s289_s24, [#allocation9], %s7217_s16, %s7217_s16, %s7218_s23  }
  0x55   : > { %s7064_s17 = scalar_lea.vmem %s313_s2, 2048  ;;  %p7072_p2 = scmp.lt.s32.totalorder %s313_s2, %s313_s2 }
  0x56   : > { %p7065_p11 = scmp.ne.s32.totalorder %s313_s2, %s7064_s17  ;;  %p7073_p9 = scmp.lt.s32.totalorder %s7064_s17, %s7064_s17 }
  0x58   : > { %p7067_p0 = pnand %p7065_p11, %p7346_p13  ;;  %p7074_p3 = por %p7073_p9, %p7072_p2 }
  0x5a   : > { %p7068_p1 = pneg %p7067_p0 }
  0x5c   : > { %p7075_p5 = pnand %p7074_p3, %p7068_p1 }
  0x5e   : > { %7078 = shalt.err (!%p7075_p5)
}
  0x5f   : > { %6843 = dma.hbm_to_vmem [thread:$0]  (!%p7338_p12), %s8410_s5, 2048, %s313_s2, [#allocation12], %s7217_s16, %s7217_s16, %s7218_s23  }
  0x60   : > { %s7221_s24 = smov [#allocation16]   ;;  %s7222_s27 = smov [#allocation17]  }
  0x61   : > { %s336_s14 = sshll.u32 %s7221_s24, 4  ;;  %s350_s28 = sshll.u32 %s7222_s27, 4  ;;  %s337_s14 = int_to_ptr.vmem [resolvable:$true] %s336_s14  ;;  %s351_s28 = int_to_ptr.vmem [resolvable:$true] %s350_s28 }
  0x62   : > { %s7090_s17 = scalar_lea.vmem %s337_s14, 51200  ;;  %p7098_p7 = scmp.lt.s32.totalorder %s337_s14, %s337_s14 }
  0x63   : > { %p7091_p6 = scmp.ne.s32.totalorder %s337_s14, %s7090_s17  ;;  %p7099_p8 = scmp.lt.s32.totalorder %s7090_s17, %s7090_s17 }
  0x65   : > { %p7093_p10 = pnand %p7091_p6, %p7346_p13  ;;  %p7100_p11 = por %p7099_p8, %p7098_p7 }
  0x67   : > { %p7094_p4 = pneg %p7093_p10 }
  0x69   : > { %p7101_p0 = pnand %p7100_p11, %p7094_p4 }
  0x6b   : > { %7104 = shalt.err (!%p7101_p0)
}
  0x6c   : > { %6849 = dma.hbm_to_vmem [thread:$0]  (!%p7338_p12), %s8412_s7, 51200, %s337_s14, [#allocation15], %s7217_s16, %s7217_s16, %s7218_s23  }
  0x6d   : > { %s7116_s25 = scalar_lea.vmem %s351_s28, 16  ;;  %s7123_s24 = scalar_lea.vmem %s351_s28, 32 }
  0x6e   : > { %p7117_p1 = scmp.ne.s32.totalorder %s351_s28, %s7116_s25  ;;  %p7124_p3 = scmp.lt.s32.totalorder %s351_s28, %s351_s28 }
  0x6f   : > { %p7125_p5 = scmp.lt.s32.totalorder %s7123_s24, %s7116_s25 }
  0x70   : > { %p7119_p2 = pnand %p7117_p1, %p7346_p13 }
  0x71   : > { %p7126_p6 = por %p7125_p5, %p7124_p3 }
  0x72   : > { %p7120_p9 = pneg %p7119_p2 }
  0x74   : > { %p7127_p10 = pnand %p7126_p6, %p7120_p9 }
  0x76   : > { %7130 = shalt.err (!%p7127_p10)
}
  0x77   : > { %6852 = dma.hbm_to_vmem [thread:$0]  (!%p7338_p12), %s8413_s8, 16, %s351_s28, [#allocation18]  }
  0x78   : > { %p8473_p4 = scmp.ne.s32.totalorder %s8469_s21, 0 }
  0x7a   : > { %370 = sbr.rel (%p8473_p4) target bundleno = 1492 (0x5d4), region = 56 }
  0x7f   : > { %p8474_p7 = scmp.eq.s32.totalorder %s7302_s13, 0 }
  0x81   : > { %7174 = dma.done.wait (%p8474_p7), [#allocation6], 768   ;;  %p8475_p13 = pmov %p8474_p7 }
  0x82   : > { %p8476_p8 = pmov %p8474_p7 }
  0x83   : > { %7176 = vsyncadd (%p8475_p13), [#allocation6], 4294966528 }
  0x84   : > { %7178 = dma.done.wait (%p8476_p8), [#allocation9], 8208   ;;  %p8477_p11 = pmov %p8474_p7 }
  0x85   : > { %p8478_p0 = pmov %p8474_p7 }
  0x86   : > { %7180 = vsyncadd (%p8477_p11), [#allocation9], 4294959088 }
  0x87   : > { %7182 = dma.done.wait (%p8478_p0), [#allocation12], 2064   ;;  %p8479_p12 = pmov %p8478_p0 }
  0x88   : > { %p8480_p1 = pmov %p8478_p0 }
  0x89   : > { %7184 = vsyncadd (%p8479_p12), [#allocation12], 4294965232 }
  0x8a   : > { %7186 = dma.done.wait (%p8480_p1), [#allocation15], 51216   ;;  %p8481_p2 = pmov %p8478_p0 }
  0x8b   : > { %p8482_p9 = pmov %p8478_p0 }
  0x8c   : > { %7188 = vsyncadd (%p8481_p2), [#allocation15], 4294916080 }
  0x8d   : > { %7190 = dma.done.wait (%p8482_p9), [#allocation18], 16   ;;  %p8483_p3 = pmov %p8478_p0 }
  0x8e   : > { %p432_p5 = scmp.lt.s32.totalorder %s7302_s13, 1  ;;  %v8418_v0 = vmov 0.0   ;;  %vm7224_vm0 = vmmov 0   ;;  %vm447_vm1 = vcmask 1043456   ;;  %v441_v2 = vld [vmem:[#allocation5 + $0x18] sm:$0xf] }
  0x8f   : > { %7192 = vsyncadd (%p8483_p3), [#allocation18], 4294967280  ;;  %6318 = vmatprep.subr.mxu0 %v8418_v0  ;;  %6325 = vmatprep.subr.mxu1 %v8418_v0  ;;  %v7458_v5 = vld [vmem:[#allocation5 + $0x10] sm:$0xff]  ;;  %v438_v6 = vld [vmem:[#allocation5 + $0x8] sm:$0xf]  ;;  %vm444_vm2 = vcmask 97280  }
  0x90   : > { %s433_s21 = scalar_select %p432_p5, %s7302_s13, 1  ;;  %6322 = vmatprep.mubr.msk.f32.mxu0 %vm7224_vm0, %v8418_v0  ;;  %6329 = vmatprep.mubr.msk.f32.mxu1 %vm7224_vm0, %v8418_v0  ;;  %v7462_v7 = vld [vmem:[#allocation5] sm:$0xff]  ;;  %v598_v8 = vld [vmem:[#allocation5 + $0x28] sm:$0xf]  ;;  %v691_v10 = vld [vmem:[#allocation5 + $0x18] sm:$0xf] }
  0x91   : > { %6319 = vmatpush3.msk.msra.mxu0 %vm447_vm1, %v441_v2  ;;  %6326 = vmatpush3.msk.msra.mxu1 %vm447_vm1, %v438_v6  ;;  %s7225_s14 = smov 124   ;;  %v7470_v9 = vld [vmem:[#allocation5 + $0x20] sm:$0xff]  ;;  %s7226_s28 = smov 120   ;;  %v689_v11 = vld [vmem:[#allocation5 + $0x8] sm:$0xf]  ;;  %v7612_v51 = vld [vmem:[#allocation10 + $0xe0] sm:$0xff] }
  0x92   : > { %s5338_s26 = sshll.u32 %s433_s21, 3  ;;  %6320 = vmatprep.subr.mxu0 %v8418_v0  ;;  %6327 = vmatprep.subr.mxu1 %v8418_v0  ;;  %s7227_s2 = smov 116   ;;  %v847_v12 = vld [vmem:[#allocation5 + $0x28] sm:$0xf]  ;;  %v941_v15 = vld [vmem:[#allocation5 + $0x18] sm:$0xf] }
  0x93   : > { %s435_s23 = scalar_lea.vmem %s8405_s0, %s5338_s26  ;;  %6321 = vmatpush3.msra.mxu0 %v7458_v5  ;;  %6328 = vmatpush3.msra.mxu1 %v7462_v7  ;;  %s7228_s22 = smov 112   ;;  %v939_v18 = vld [vmem:[#allocation5 + $0x8] sm:$0xf]  ;;  %v1191_v22 = vld [vmem:[#allocation5 + $0x18] sm:$0xf] }
  0x94   : > { %v436_v1 = vld [vmem:[%s435_s23] sm:$0xff]  ;;  %6332 = vmatprep.subr.mxu0 %v8418_v0  ;;  %6339 = vmatprep.subr.mxu1 %v8418_v0  ;;  %s7229_s25 = smov 108   ;;  %v1097_v19 = vld [vmem:[#allocation5 + $0x28] sm:$0xf]  ;;  %v1441_v28 = vld [vmem:[#allocation5 + $0x18] sm:$0xf] }
  0x95   : > { %v443_v3 = vrot.slane %v436_v1, 1  ;;  %v599_v4 = vrot.slane %v436_v1, 2  ;;  %6330 = vmatmul.mubr.msk.f32.vlgmr.msra.gmra.mxu1 %vm444_vm2, %v436_v1  ;;  %v1189_v24 = vld [vmem:[#allocation5 + $0x8] sm:$0xf]  ;;  %v1691_v34 = vld [vmem:[#allocation5 + $0x18] sm:$0xf] }
  0x96   : > { %6340 = vmatpush3.msk.msra.mxu1 %vm447_vm1, %v691_v10  ;;  %6343 = vmatprep.mubr.msk.f32.mxu1 %vm7224_vm0, %v8418_v0  ;;  %v1347_v25 = vld [vmem:[#allocation5 + $0x28] sm:$0xf]  ;;  %v7600_v47 = vld [vmem:[#allocation10 + $0xe8] sm:$0xff]  ;;  %v7618_v53 = vld [vmem:[#allocation10 + $0x60] sm:$0xff]  ;;  %s430_s24 = sand.u32 1, %s7203_s10   ;;  %s5391_s27 = sshll.u32 %s7302_s13, 4 }
  0x97   : > { %692 = vrot.lane.b32.xlu0 %v443_v3, %s7225_s14  ;;  %848 = vrot.lane.b32.xlu1 %v599_v4, %s7225_s14  ;;  %v1439_v30 = vld [vmem:[#allocation5 + $0x8] sm:$0xf]  ;;  %v7606_v49 = vld [vmem:[#allocation10 + $0x68] sm:$0xff]  ;;  %v7620_v54 = vld [vmem:[#allocation10 + $0x1e0] sm:$0xff]  ;;  %s431_s17 = scalar_lea.vmem [#allocation19], %s430_s24  ;;  %s8370_s16 = scalar_lea.hbm %s8414_s9, %s5391_s27 }
  0x98   : > { %6323 = vmatmul.mubr.msk.f32.vlgmr.msra.gmra.mxu0 %vm444_vm2, %v443_v3  ;;  %6341 = vmatprep.subr.mxu1 %v8418_v0  ;;  %v1597_v31 = vld [vmem:[#allocation5 + $0x28] sm:$0xf]  ;;  %v7608_v50 = vld [vmem:[#allocation10 + $0x1e8] sm:$0xff]  ;;  %v7626_v56 = vld [vmem:[#allocation10 + $0x160] sm:$0xff]  ;;  %s5184_s21 = sshll.u32 %s431_s17, 4  ;;  %s5172_s23 = scalar_lea.sflag [#allocation7], %s430_s24  ;;  %s5185_s21 = int_to_ptr.vmem [resolvable:$true] %s5184_s21 }
  0x99   : > { %6333 = vmatpush3.msk.msra.mxu0 %vm447_vm1, %v598_v8  ;;  %6336 = vmatprep.mubr.msk.f32.mxu0 %vm7224_vm0, %v8418_v0  ;;  %v1689_v36 = vld [vmem:[#allocation5 + $0x8] sm:$0xf]  ;;  %v7614_v52 = vld [vmem:[#allocation10 + $0x168] sm:$0xff]  ;;  %v7669_v6 = vld [vmem:[#allocation10 + $0x40] sm:$0xff]  ;;  %p8536_p10 = scmp.ne.s32.totalorder %s8467_s19, 0 }
  0x9a   : > { %6334 = vmatprep.subr.mxu0 %v8418_v0  ;;  %6342 = vmatpush3.msra.mxu1 %v7458_v5  ;;  %v1847_v37 = vld [vmem:[#allocation5 + $0x28] sm:$0xf]  ;;  %v7651_v63 = vld [vmem:[#allocation10 + $0xc8] sm:$0xff] }
  0x9b   : > { %769 = vrot.lane.b32.xlu0 %v436_v1, %s7225_s14  ;;  %942 = vrot.lane.b32.xlu1 %v443_v3, %s7226_s28  ;;  %v7577_v40 = vld [vmem:[#allocation10 + $0xf8] sm:$0xff]  ;;  %v7588_v43 = vld [vmem:[#allocation10 + $0xf0] sm:$0xff]  ;;  %v7657_v2 = vld [vmem:[#allocation10 + $0x48] sm:$0xff]  ;;  %s7131_s14 = scalar_lea.vmem %s5185_s21, 16 }
  0x9c   : > { %6335 = vmatpush3.msra.mxu0 %v7470_v9  ;;  %6353 = vmatprep.subr.mxu1 %v8418_v0  ;;  %8484 = vst [vmem:[#allocation26_spill] sm:$0xff] %v7577_v40  ;;  %v7581_v41 = vld [vmem:[#allocation10 + $0x78] sm:$0xff]  ;;  %v7594_v45 = vld [vmem:[#allocation10 + $0x70] sm:$0xff]  ;;  %p7132_p6 = scmp.ne.s32.totalorder %s5185_s21, %s7131_s14 }
  0x9d   : > { %6337 = vmatmul.mubr.msk.f32.vlgmr.msra.gmra.mxu0 %vm444_vm2, %v599_v4  ;;  %6346 = vmatprep.subr.mxu0 %v8418_v0  ;;  %v7583_v42 = vld [vmem:[#allocation10 + $0x1f8] sm:$0xff]  ;;  %v7596_v46 = vld [vmem:[#allocation10 + $0x1f0] sm:$0xff] }
  0x9e   : > { %6347 = vmatpush3.msk.msra.mxu0 %vm447_vm1, %v689_v11  ;;  %6350 = vmatprep.mubr.msk.f32.mxu0 %vm7224_vm0, %v8418_v0  ;;  %8485 = vst [vmem:[#allocation27_spill] sm:$0xff] %v7583_v42  ;;  %v7590_v44 = vld [vmem:[#allocation10 + $0x178] sm:$0xff]  ;;  %v7602_v48 = vld [vmem:[#allocation10 + $0x170] sm:$0xff]  ;;  %p7133_p4 = pnand %p7132_p6, %p8536_p10 }
  0x9f   : > { %1019 = vrot.lane.b32.xlu0 %v436_v1, %s7226_s28  ;;  %1098 = vrot.lane.b32.xlu1 %v599_v4, %s7226_s28  ;;  %v7624_v55 = vld [vmem:[#allocation10 + $0xd8] sm:$0xff]  ;;  %v7639_v59 = vld [vmem:[#allocation10 + $0xd0] sm:$0xff]  ;;  %s7230_s28 = smov [#allocation19]  }
  0xa0   : > { %6348 = vmatprep.subr.mxu0 %v8418_v0  ;;  %v7630_v57 = vld [vmem:[#allocation10 + $0x58] sm:$0xff]  ;;  %v7645_v61 = vld [vmem:[#allocation10 + $0x50] sm:$0xff]  ;;  %p7134_p7 = pneg %p7133_p4  ;;  %s7135_s13 = sshll.u32 %s7230_s28, 4  ;;  %s7136_s13 = int_to_ptr.vmem [resolvable:$false] %s7135_s13 }
  0xa1   : > { %6349 = vmatpush3.msra.mxu0 %v7462_v7  ;;  %v7637_v58 = vld [vmem:[#allocation10 + $0x1d8] sm:$0xff]  ;;  %v7649_v62 = vld [vmem:[#allocation10 + $0x1d0] sm:$0xff]  ;;  %p7138_p13 = scmp.lt.s32.totalorder %s5185_s21, %s7136_s13 }
  0xa2   : > { %6360 = vmatprep.subr.mxu0 %v8418_v0  ;;  %v7643_v60 = vld [vmem:[#allocation10 + $0x158] sm:$0xff] }
  0xa3   : > { %1192 = vrot.lane.b32.xlu0 %v443_v3, %s7227_s2  ;;  %1269 = vrot.lane.b32.xlu1 %v436_v1, %s7227_s2  ;;  %v7675_v8 = vld [vmem:[#allocation10 + $0xb8] sm:$0xff] }
  0xa4   : > { %v7681_v10 = vld [vmem:[#allocation10 + $0x38] sm:$0xff] }
  0xa5   : > { %v7685_v11 = vld [vmem:[#allocation10 + $0x1b8] sm:$0xff] }
  0xa7   : > { %1348 = vrot.lane.b32.xlu0 %v599_v4, %s7227_s2  ;;  %1442 = vrot.lane.b32.xlu1 %v443_v3, %s7228_s22  ;;  %s7137_s2 = scalar_lea.vmem %s7136_s13, 32 }
  0xa8   : > { %p7139_p8 = scmp.lt.s32.totalorder %s7137_s2, %s7131_s14 }
  0xaa   : > { %p7140_p11 = por %p7139_p8, %p7138_p13 }
  0xab   : > { %1519 = vrot.lane.b32.xlu0 %v436_v1, %s7228_s22  ;;  %1598 = vrot.lane.b32.xlu1 %v599_v4, %s7228_s22 }
  0xac   : > { %p7141_p0 = pnand %p7140_p11, %p7134_p7 }
  0xaf   : > { %1692 = vrot.lane.b32.xlu0 %v443_v3, %s7229_s25  ;;  %1769 = vrot.lane.b32.xlu1 %v436_v1, %s7229_s25  ;;  %v7655_v1 = vld [vmem:[#allocation10 + $0x150] sm:$0xff]  ;;  %v7661_v3 = vld [vmem:[#allocation10 + $0x1c8] sm:$0xff] }
  0xb3   : > { %1848 = vrot.lane.b32.xlu0 %v599_v4, %s7229_s25  ;;  %v7663_v4 = vld [vmem:[#allocation10 + $0xc0] sm:$0xff] }
 0x109   : > { %v693_v13 = vpop.permute.xlu0 %692  ;;  %v849_v14 = vpop.permute.xlu1 %848 }
 0x10a   : > { %6344 = vmatmul.mubr.msk.f32.vlgmr.msra.gmra.mxu1 %vm444_vm2, %v693_v13  ;;  %v7691_v13 = vld [vmem:[#allocation10 + $0x138] sm:$0xff] }
 0x10b   : > { %6354 = vmatpush3.msk.msra.mxu1 %vm447_vm1, %v847_v12  ;;  %6357 = vmatprep.mubr.msk.f32.mxu1 %vm7224_vm0, %v8418_v0  ;;  %v7687_v12 = vld [vmem:[#allocation10 + $0xb0] sm:$0xff] }
 0x10c   : > { %6355 = vmatprep.subr.mxu1 %v8418_v0 }
 0x10d   : > { %6356 = vmatpush3.msra.mxu1 %v7470_v9  ;;  %v770_v16 = vpop.permute.xlu0 %769  ;;  %v943_v17 = vpop.permute.xlu1 %942 }
 0x10e   : > { %6351 = vmatmul.mubr.msk.f32.vlgmr.msra.gmra.mxu0 %vm444_vm2, %v770_v16  ;;  %6358 = vmatmul.mubr.msk.f32.vlgmr.msra.gmra.mxu1 %vm444_vm2, %v849_v14  ;;  %v7693_v14 = vld [vmem:[#allocation10 + $0x30] sm:$0xff]  ;;  %v7699_v16 = vld [vmem:[#allocation10 + $0xa8] sm:$0xff] }
 0x10f   : > { %6361 = vmatpush3.msk.msra.mxu0 %vm447_vm1, %v941_v15  ;;  %6367 = vmatprep.subr.mxu1 %v8418_v0  ;;  %v7697_v15 = vld [vmem:[#allocation10 + $0x1b0] sm:$0xff] }
 0x110   : > { %6362 = vmatprep.subr.mxu0 %v8418_v0  ;;  %6364 = vmatprep.mubr.msk.f32.mxu0 %vm7224_vm0, %v8418_v0 }
 0x111   : > { %6363 = vmatpush3.msra.mxu0 %v7458_v5  ;;  %6368 = vmatpush3.msk.msra.mxu1 %vm447_vm1, %v939_v18  ;;  %v1020_v20 = vpop.permute.xlu0 %1019  ;;  %v1099_v21 = vpop.permute.xlu1 %1098  ;;  %v7705_v18 = vld [vmem:[#allocation10 + $0x28] sm:$0xff] }
 0x112   : > { %6365 = vmatmul.mubr.msk.f32.vlgmr.msra.gmra.mxu0 %vm444_vm2, %v943_v17  ;;  %6369 = vmatprep.subr.mxu1 %v8418_v0  ;;  %v7703_v17 = vld [vmem:[#allocation10 + $0x130] sm:$0xff] }
 0x113   : > { %6374 = vmatprep.subr.mxu0 %v8418_v0  ;;  %6370 = vmatpush3.msra.mxu1 %v7462_v7 }
 0x114   : > { %6371 = vmatprep.mubr.msk.f32.mxu1 %vm7224_vm0, %v8418_v0  ;;  %6375 = vmatpush3.msk.msra.mxu0 %vm447_vm1, %v1097_v19  ;;  %v7709_v19 = vld [vmem:[#allocation10 + $0x1a8] sm:$0xff] }
 0x115   : > { %6372 = vmatmul.mubr.msk.f32.vlgmr.msra.gmra.mxu1 %vm444_vm2, %v1020_v20  ;;  %6376 = vmatprep.subr.mxu0 %v8418_v0  ;;  %v1193_v23 = vpop.permute.xlu0 %1192  ;;  %v1270_v26 = vpop.permute.xlu1 %1269  ;;  %v7711_v20 = vld [vmem:[#allocation10 + $0xa0] sm:$0xff] }
 0x116   : > { %6377 = vmatpush3.msra.mxu0 %v7470_v9  ;;  %6378 = vmatprep.mubr.msk.f32.mxu0 %vm7224_vm0, %v8418_v0 }
 0x117   : > { %6379 = vmatmul.mubr.msk.f32.vlgmr.msra.gmra.mxu0 %vm444_vm2, %v1099_v21  ;;  %6381 = vmatprep.subr.mxu1 %v8418_v0  ;;  %v7715_v21 = vld [vmem:[#allocation10 + $0x128] sm:$0xff] }
 0x118   : > { %6382 = vmatpush3.msk.msra.mxu1 %vm447_vm1, %v1191_v22  ;;  %6388 = vmatprep.subr.mxu0 %v8418_v0  ;;  %v7717_v22 = vld [vmem:[#allocation10 + $0x20] sm:$0xff] }
 0x119   : > { %6383 = vmatprep.subr.mxu1 %v8418_v0  ;;  %6385 = vmatprep.mubr.msk.f32.mxu1 %vm7224_vm0, %v8418_v0  ;;  %v1349_v27 = vpop.permute.xlu0 %1348  ;;  %v1443_v29 = vpop.permute.xlu1 %1442  ;;  %8486 = vst [vmem:[#allocation28_spill] sm:$0xff] %v7717_v22 }
 0x11a   : > { %6384 = vmatpush3.msra.mxu1 %v7458_v5  ;;  %6389 = vmatpush3.msk.msra.mxu0 %vm447_vm1, %v1189_v24  ;;  %v7723_v24 = vld [vmem:[#allocation10 + $0x98] sm:$0xff] }
 0x11b   : > { %6386 = vmatmul.mubr.msk.f32.vlgmr.msra.gmra.mxu1 %vm444_vm2, %v1193_v23  ;;  %6390 = vmatprep.subr.mxu0 %v8418_v0  ;;  %v7721_v23 = vld [vmem:[#allocation10 + $0x1a0] sm:$0xff]  ;;  %8488 = vst [vmem:[#allocation30_spill] sm:$0xff] %v7723_v24 }
 0x11c   : > { %6395 = vmatprep.subr.mxu1 %v8418_v0  ;;  %6391 = vmatpush3.msra.mxu0 %v7462_v7  ;;  %8487 = vst [vmem:[#allocation29_spill] sm:$0xff] %v7721_v23 }
 0x11d   : > { %6392 = vmatprep.mubr.msk.f32.mxu0 %vm7224_vm0, %v8418_v0  ;;  %6396 = vmatpush3.msk.msra.mxu1 %vm447_vm1, %v1347_v25  ;;  %v1520_v32 = vpop.permute.xlu0 %1519  ;;  %v1599_v33 = vpop.permute.xlu1 %1598  ;;  %v7727_v25 = vld [vmem:[#allocation10 + $0x120] sm:$0xff] }
 0x11e   : > { %6393 = vmatmul.mubr.msk.f32.vlgmr.msra.gmra.mxu0 %vm444_vm2, %v1270_v26  ;;  %6397 = vmatprep.subr.mxu1 %v8418_v0  ;;  %8489 = vst [vmem:[#allocation31_spill] sm:$0xff] %v7727_v25  ;;  %v7729_v26 = vld [vmem:[#allocation10 + $0x18] sm:$0xff] }
 0x11f   : > { %6398 = vmatpush3.msra.mxu1 %v7470_v9  ;;  %6399 = vmatprep.mubr.msk.f32.mxu1 %vm7224_vm0, %v8418_v0  ;;  %8490 = vst [vmem:[#allocation32_spill] sm:$0xff] %v7729_v26 }
 0x120   : > { %6400 = vmatmul.mubr.msk.f32.vlgmr.msra.gmra.mxu1 %vm444_vm2, %v1349_v27  ;;  %6402 = vmatprep.subr.mxu0 %v8418_v0  ;;  %v7731_v27 = vld [vmem:[#allocation10 + $0x198] sm:$0xff] }
 0x121   : > { %6403 = vmatpush3.msk.msra.mxu0 %vm447_vm1, %v1441_v28  ;;  %6409 = vmatprep.subr.mxu1 %v8418_v0  ;;  %v1693_v35 = vpop.permute.xlu0 %1692  ;;  %v1770_v38 = vpop.permute.xlu1 %1769  ;;  %8491 = vst [vmem:[#allocation33_spill] sm:$0xff] %v7731_v27 }
 0x122   : > { %6404 = vmatprep.subr.mxu0 %v8418_v0  ;;  %6406 = vmatprep.mubr.msk.f32.mxu0 %vm7224_vm0, %v8418_v0 }
 0x123   : > { %6405 = vmatpush3.msra.mxu0 %v7458_v5  ;;  %6410 = vmatpush3.msk.msra.mxu1 %vm447_vm1, %v1439_v30  ;;  %v7737_v30 = vld [vmem:[#allocation10 + $0x118] sm:$0xff] }
 0x124   : > { %6407 = vmatmul.mubr.msk.f32.vlgmr.msra.gmra.mxu0 %vm444_vm2, %v1443_v29  ;;  %6411 = vmatprep.subr.mxu1 %v8418_v0  ;;  %v7735_v29 = vld [vmem:[#allocation10 + $0x90] sm:$0xff]  ;;  %8493 = vst [vmem:[#allocation35_spill] sm:$0xff] %v7737_v30 }
 0x125   : > { %6416 = vmatprep.subr.mxu0 %v8418_v0  ;;  %6412 = vmatpush3.msra.mxu1 %v7462_v7  ;;  %v1849_v39 = vpop.permute.xlu0 %1848  ;;  %8492 = vst [vmem:[#allocation34_spill] sm:$0xff] %v7735_v29 }
 0x126   : > { %6413 = vmatprep.mubr.msk.f32.mxu1 %vm7224_vm0, %v8418_v0  ;;  %6417 = vmatpush3.msk.msra.mxu0 %vm447_vm1, %v1597_v31  ;;  %v7739_v31 = vld [vmem:[#allocation10 + $0x10] sm:$0xff] }
 0x127   : > { %6414 = vmatmul.mubr.msk.f32.vlgmr.msra.gmra.mxu1 %vm444_vm2, %v1520_v32  ;;  %6418 = vmatprep.subr.mxu0 %v8418_v0  ;;  %8494 = vst [vmem:[#allocation36_spill] sm:$0xff] %v7739_v31  ;;  %v7743_v32 = vld [vmem:[#allocation10 + $0x190] sm:$0xff] }
 0x128   : > { %6419 = vmatpush3.msra.mxu0 %v7470_v9  ;;  %6420 = vmatprep.mubr.msk.f32.mxu0 %vm7224_vm0, %v8418_v0  ;;  %8495 = vst [vmem:[#allocation37_spill] sm:$0xff] %v7743_v32 }
 0x129   : > { %6421 = vmatmul.mubr.msk.f32.vlgmr.msra.gmra.mxu0 %vm444_vm2, %v1599_v33  ;;  %6423 = vmatprep.subr.mxu1 %v8418_v0  ;;  %v7745_v33 = vld [vmem:[#allocation10 + $0x88] sm:$0xff] }
 0x12a   : > { %6424 = vmatpush3.msk.msra.mxu1 %vm447_vm1, %v1691_v34  ;;  %6430 = vmatprep.subr.mxu0 %v8418_v0  ;;  %8496 = vst [vmem:[#allocation38_spill] sm:$0xff] %v7745_v33  ;;  %v7747_v34 = vld [vmem:[#allocation10 + $0x110] sm:$0xff] }
 0x12b   : > { %6425 = vmatprep.subr.mxu1 %v8418_v0  ;;  %6427 = vmatprep.mubr.msk.f32.mxu1 %vm7224_vm0, %v8418_v0  ;;  %8497 = vst [vmem:[#allocation39_spill] sm:$0xff] %v7747_v34 }
 0x12c   : > { %6426 = vmatpush3.msra.mxu1 %v7458_v5  ;;  %6431 = vmatpush3.msk.msra.mxu0 %vm447_vm1, %v1689_v36  ;;  %v7667_v5 = vld [vmem:[#allocation10 + $0x148] sm:$0xff] }
 0x12d   : > { %6428 = vmatmul.mubr.msk.f32.vlgmr.msra.gmra.mxu1 %vm444_vm2, %v1693_v35  ;;  %6432 = vmatprep.subr.mxu0 %v8418_v0  ;;  %v7751_v36 = vld [vmem:[#allocation10 + $0x8] sm:$0xff] }
 0x12e   : > { %6437 = vmatprep.subr.mxu1 %v8418_v0  ;;  %6433 = vmatpush3.msra.mxu0 %v7462_v7  ;;  %v7673_v7 = vld [vmem:[#allocation10 + $0x1c0] sm:$0xff]  ;;  %8498 = vst [vmem:[#allocation40_spill] sm:$0xff] %v7751_v36 }
 0x12f   : > { %6434 = vmatprep.mubr.msk.f32.mxu0 %vm7224_vm0, %v8418_v0  ;;  %6438 = vmatpush3.msk.msra.mxu1 %vm447_vm1, %v1847_v37  ;;  %v7753_v37 = vld [vmem:[#allocation10 + $0x188] sm:$0xff] }
 0x130   : > { %6435 = vmatmul.mubr.msk.f32.vlgmr.msra.gmra.mxu0 %vm444_vm2, %v1770_v38  ;;  %6439 = vmatprep.subr.mxu1 %v8418_v0  ;;  %8499 = vst [vmem:[#allocation41_spill] sm:$0xff] %v7753_v37  ;;  %v7755_v38 = vld [vmem:[#allocation10 + $0x80] sm:$0xff] }
 0x131   : > { %6440 = vmatpush3.msra.mxu1 %v7470_v9  ;;  %6441 = vmatprep.mubr.msk.f32.mxu1 %vm7224_vm0, %v8418_v0  ;;  %v7679_v9 = vld [vmem:[#allocation10 + $0x140] sm:$0xff]  ;;  %8500 = vst [vmem:[#allocation42_spill] sm:$0xff] %v7755_v38  ;;  %v7759_v0 = vld [vmem:[#allocation10 + $0x108] sm:$0xff] }
 0x132   : > { %6442 = vmatmul.mubr.msk.f32.vlgmr.msra.gmra.mxu1 %vm444_vm2, %v1849_v39  ;;  %5483 = vmatprep.subr.mxu1 %v7577_v40  ;;  %8501 = vst [vmem:[#allocation43_spill] sm:$0xff] %v7759_v0 }
 0x133   : > { %5484 = vmatpush3.msra.mxu1 %v7581_v41  ;;  %5448 = vmatprep.subr.mxu0 %v7583_v42 }
 0x134   : > { %5485 = vmatprep.subr.mxu1 %v7588_v43  ;;  %5449 = vmatpush3.msra.mxu0 %v7590_v44 }
 0x135   : > { %5486 = vmatpush3.msra.mxu1 %v7594_v45  ;;  %5450 = vmatprep.subr.mxu0 %v7596_v46 }
 0x136   : > { %5487 = vmatprep.subr.mxu1 %v7600_v47  ;;  %5451 = vmatpush3.msra.mxu0 %v7602_v48 }
 0x137   : > { %5488 = vmatpush3.msra.mxu1 %v7606_v49  ;;  %5452 = vmatprep.subr.mxu0 %v7608_v50 }
 0x138   : > { %5489 = vmatprep.subr.mxu1 %v7612_v51  ;;  %5453 = vmatpush3.msra.mxu0 %v7614_v52 }
 0x139   : > { %5490 = vmatpush3.msra.mxu1 %v7618_v53  ;;  %5454 = vmatprep.subr.mxu0 %v7620_v54 }
 0x13a   : > { %5491 = vmatprep.subr.mxu1 %v7624_v55  ;;  %5455 = vmatpush3.msra.mxu0 %v7626_v56 }
 0x13b   : > { %5492 = vmatpush3.msra.mxu1 %v7630_v57  ;;  %5456 = vmatprep.subr.mxu0 %v7637_v58 }
 0x13c   : > { %5493 = vmatprep.subr.mxu1 %v7639_v59  ;;  %5457 = vmatpush3.msra.mxu0 %v7643_v60 }
 0x13d   : > { %5494 = vmatpush3.msra.mxu1 %v7645_v61  ;;  %5458 = vmatprep.subr.mxu0 %v7649_v62 }
 0x13e   : > { %5495 = vmatprep.subr.mxu1 %v7651_v63  ;;  %5459 = vmatpush3.msra.mxu0 %v7655_v1 }
 0x13f   : > { %5496 = vmatpush3.msra.mxu1 %v7657_v2  ;;  %5460 = vmatprep.subr.mxu0 %v7661_v3 }
 0x140   : > { %5497 = vmatprep.subr.mxu1 %v7663_v4  ;;  %5461 = vmatpush3.msra.mxu0 %v7667_v5 }
 0x141   : > { %5498 = vmatpush3.msra.mxu1 %v7669_v6  ;;  %5462 = vmatprep.subr.mxu0 %v7673_v7 }
 0x142   : > { %5499 = vmatprep.subr.mxu1 %v7675_v8  ;;  %5463 = vmatpush3.msra.mxu0 %v7679_v9 }
 0x143   : > { %5500 = vmatpush3.msra.mxu1 %v7681_v10  ;;  %5464 = vmatprep.subr.mxu0 %v7685_v11 }
 0x144   : > { %5501 = vmatprep.subr.mxu1 %v7687_v12  ;;  %5465 = vmatpush3.msra.mxu0 %v7691_v13 }
 0x145   : > { %5502 = vmatpush3.msra.mxu1 %v7693_v14  ;;  %5466 = vmatprep.subr.mxu0 %v7697_v15 }
 0x146   : > { %5503 = vmatprep.subr.mxu1 %v7699_v16  ;;  %5467 = vmatpush3.msra.mxu0 %v7703_v17 }
 0x147   : > { %5504 = vmatpush3.msra.mxu1 %v7705_v18  ;;  %5468 = vmatprep.subr.mxu0 %v7709_v19 }
 0x148   : > { %5505 = vmatprep.subr.mxu1 %v7711_v20  ;;  %5469 = vmatpush3.msra.mxu0 %v7715_v21 }
 0x149   : > { %5506 = vmatpush3.msra.mxu1 %v7717_v22  ;;  %5470 = vmatprep.subr.mxu0 %v7721_v23 }
 0x14a   : > { %5507 = vmatprep.subr.mxu1 %v7723_v24  ;;  %5471 = vmatpush3.msra.mxu0 %v7727_v25 }
 0x14b   : > { %5508 = vmatpush3.msra.mxu1 %v7729_v26  ;;  %5472 = vmatprep.subr.mxu0 %v7731_v27  ;;  %v7767_v27 = vld [vmem:[#allocation8] ss:$0 sm:$0xff] }
 0x14c   : > { %5509 = vmatprep.subr.mxu1 %v7735_v29  ;;  %5473 = vmatpush3.msra.mxu0 %v7737_v30  ;;  %v7761_v29 = vld [vmem:[#allocation10] sm:$0xff] }
 0x14d   : > { %5510 = vmatpush3.msra.mxu1 %v7739_v31  ;;  %5474 = vmatprep.subr.mxu0 %v7743_v32  ;;  %8502 = vst [vmem:[#allocation44_spill] sm:$0xff] %v7761_v29  ;;  %v7765_v31 = vld [vmem:[#allocation10 + $0x180] sm:$0xff] }
 0x14e   : > { %5511 = vmatprep.subr.mxu1 %v7745_v33  ;;  %5475 = vmatpush3.msra.mxu0 %v7747_v34  ;;  %8503 = vst [vmem:[#allocation45_spill] sm:$0xff] %v7765_v31 }
 0x14f   : > { %5512 = vmatpush3.msra.mxu1 %v7751_v36  ;;  %5476 = vmatprep.subr.mxu0 %v7753_v37 }
 0x150   : > { %5513 = vmatprep.subr.mxu1 %v7755_v38  ;;  %5477 = vmatpush3.msra.mxu0 %v7759_v0 }
 0x151   : > { %5514 = vmatpush3.msra.mxu1 %v7761_v29  ;;  %5478 = vmatprep.subr.mxu0 %v7765_v31 }
 0x152   : > { %5553 = vmatprep.subr.mxu1 %v7577_v40 }
 0x155   : > { %v592_v39 = vpop.f32.mrf.mxu1 }
 0x157   : > { %v6331_v26 = vpop.f32.mrf.mxu1 }
 0x158   : > { %v517_v28 = vpop.f32.mrf.mxu0 }
 0x15a   : > { %v6324_v35 = vpop.f32.mrf.mxu0 }
 0x15b   : > { %v593_v35 = vadd.f32 %v592_v39, %v517_v28  ;;  %v7775_v39 = vld [vmem:[#allocation10 + $0x100] sm:$0xff] }
 0x15c   : > { %8504 = vst [vmem:[#allocation46_spill] sm:$0xff] %v7775_v39  ;;  %5479 = vmatpush3.msra.mxu0 %v7775_v39 }
 0x15d   : > { %v671_v30 = vpop.f32.mrf.mxu0  ;;  %5518 = vmatprep.subr.mxu0 %v7583_v42 }
 0x15e   : > { %v675_v33 = vadd.f32 %v671_v30, %v593_v35 }
 0x15f   : > { %v6338_v28 = vpop.f32.mrf.mxu0 }
 0x160   : > { %v683_v36 = vadd.f32 %v7767_v27, %v675_v33 }
 0x162   : > { %vm684_vm3 = vcmp.gt.f32.partialorder %v683_v36, 0.0  ;;  %v685_v26 = vmul.f32 0.01, %v683_v36 }
 0x164   : > { %v686_v30 = vsel %vm684_vm3, %v683_v36, %v685_v26 }
 0x165   : > { %687 = vst [vmem:[#allocation2 + $0x28] sm:$0x3f] %v686_v30 }
 0x1ca   : > { %v765_v35 = vpop.f32.mrf.mxu1 }
 0x1cc   : > { %v6345_v0 = vpop.f32.mrf.mxu1 }
 0x1ce   : > { %v842_v29 = vpop.f32.mrf.mxu0  ;;  %v921_v28 = vpop.f32.mrf.mxu1 }
 0x1cf   : > { %v843_v38 = vadd.f32 %v842_v29, %v765_v35 }
 0x1d0   : > { %v6352_v31 = vpop.f32.mrf.mxu0  ;;  %v6359_v37 = vpop.f32.mrf.mxu1 }
 0x1d1   : > { %v925_v40 = vadd.f32 %v921_v28, %v843_v38  ;;  %v1972_v38 = vld [vmem:[#allocation2 + $0x28] sm:$0x3e] }
 0x1d2   : > { %v1015_v34 = vpop.f32.mrf.mxu0 }
 0x1d3   : > { %v933_v32 = vadd.f32 %v7767_v27, %v925_v40 }
 0x1d4   : > { %v6366_v33 = vpop.f32.mrf.mxu0 }
 0x1d5   : > { %vm934_vm4 = vcmp.gt.f32.partialorder %v933_v32, 0.0  ;;  %v935_v39 = vmul.f32 0.01, %v933_v32  ;;  %v1092_v25 = vpop.f32.mrf.mxu1 }
 0x1d6   : > { %v1093_v42 = vadd.f32 %v1092_v25, %v1015_v34  ;;  %v1938_v25 = vld [vmem:[#allocation2 + $0x28] sm:$0x1f] }
 0x1d7   : > { %v936_v24 = vsel %vm934_vm4, %v933_v32, %v935_v39  ;;  %v1171_v23 = vpop.f32.mrf.mxu0  ;;  %v6373_v36 = vpop.f32.mrf.mxu1 }
 0x1d8   : > { %937 = vst [vmem:[#allocation2 + $0x10] sm:$0x3f] %v936_v24  ;;  %v1175_v26 = vadd.f32 %v1171_v23, %v1093_v42  ;;  %v2009_v42 = vrot.slane %v1972_v38, 1 }
 0x1d9   : > { %v6380_v0 = vpop.f32.mrf.mxu0 }
 0x1da   : > { %v1183_v30 = vadd.f32 %v7767_v27, %v1175_v26 }
 0x1db   : > { %v1265_v29 = vpop.f32.mrf.mxu1 }
 0x1dc   : > { %vm1184_vm5 = vcmp.gt.f32.partialorder %v1183_v30, 0.0  ;;  %v1185_v31 = vmul.f32 0.01, %v1183_v30 }
 0x1dd   : > { %v6387_v37 = vpop.f32.mrf.mxu1 }
 0x1de   : > { %v1186_v35 = vsel %vm1184_vm5, %v1183_v30, %v1185_v31  ;;  %v1342_v40 = vpop.f32.mrf.mxu0 }
 0x1df   : > { %v1939_v28 = vld [vmem:[#allocation2 + $0x10] sm:$0x1f]  ;;  %1187 = vst [vmem:[#allocation2 + $0x8] sm:$0x3f] %v1186_v35  ;;  %v1343_v22 = vadd.f32 %v1342_v40, %v1265_v29 }
 0x1e0   : > { %v1973_v33 = vld [vmem:[#allocation2 + $0x10] sm:$0x3e]  ;;  %2147 = vmatprep.mubr.f32.mxu1 %v1939_v28  ;;  %v1421_v34 = vpop.f32.mrf.mxu1  ;;  %v6394_v24 = vpop.f32.mrf.mxu0 }
 0x1e1   : > { %v2010_v32 = vrot.slane %v1973_v33, 1  ;;  %2148 = vmatmul.mubr.f32.vlgmr.msra.gmra.mxu1 %v1938_v25  ;;  %v1425_v23 = vadd.f32 %v1421_v34, %v1343_v22 }
 0x1e2   : > { %5554 = vmatpush3.msra.mxu1 %v7581_v41  ;;  %v6401_v39 = vpop.f32.mrf.mxu1 }
 0x1e3   : > { %2077 = vmatprep.mubr.f32.mxu0 %v2010_v32  ;;  %5555 = vmatprep.subr.mxu1 %v7588_v43  ;;  %v1433_v36 = vadd.f32 %v7767_v27, %v1425_v23  ;;  %v5380_v23 = vld [vmem:[#allocation8] ss:$0 sm:$0xff] }
 0x1e4   : > { %2078 = vmatmul.mubr.f32.vlgmr.msra.gmra.mxu0 %v2009_v42  ;;  %5556 = vmatpush3.msra.mxu1 %v7594_v45  ;;  %v1515_v26 = vpop.f32.mrf.mxu0 }
 0x1e5   : > { %5519 = vmatpush3.msra.mxu0 %v7590_v44  ;;  %5557 = vmatprep.subr.mxu1 %v7600_v47  ;;  %vm1434_vm6 = vcmp.gt.f32.partialorder %v1433_v36, 0.0  ;;  %v1435_v22 = vmul.f32 0.01, %v1433_v36 }
 0x1e6   : > { %5520 = vmatprep.subr.mxu0 %v7596_v46  ;;  %5558 = vmatpush3.msra.mxu1 %v7606_v49  ;;  %v6408_v0 = vpop.f32.mrf.mxu0 }
 0x1e7   : > { %5521 = vmatpush3.msra.mxu0 %v7602_v48  ;;  %5559 = vmatprep.subr.mxu1 %v7612_v51  ;;  %v1436_v30 = vsel %vm1434_vm6, %v1433_v36, %v1435_v22  ;;  %v1592_v29 = vpop.f32.mrf.mxu1 }
 0x1e8   : > { %5522 = vmatprep.subr.mxu0 %v7608_v50  ;;  %5560 = vmatpush3.msra.mxu1 %v7618_v53  ;;  %1437 = vst [vmem:[#allocation2] sm:$0x3f] %v1436_v30  ;;  %v1593_v31 = vadd.f32 %v1592_v29, %v1515_v26  ;;  %v8505_v30 = vld [vmem:[#allocation28_spill] sm:$0xff]  ;;  %v8506_v29 = vld [vmem:[#allocation29_spill] sm:$0xff] }
 0x1e9   : > { %5523 = vmatpush3.msra.mxu0 %v7614_v52  ;;  %5561 = vmatprep.subr.mxu1 %v7624_v55  ;;  %v1671_v37 = vpop.f32.mrf.mxu0  ;;  %v6415_v38 = vpop.f32.mrf.mxu1 }
 0x1ea   : > { %5524 = vmatprep.subr.mxu0 %v7620_v54  ;;  %5562 = vmatpush3.msra.mxu1 %v7630_v57  ;;  %v1675_v35 = vadd.f32 %v1671_v37, %v1593_v31  ;;  %v8507_v31 = vld [vmem:[#allocation30_spill] sm:$0xff]  ;;  %v2200_v37 = vld [vmem:[#allocation2 + $0x8] sm:$0x3e] }
 0x1eb   : > { %5525 = vmatpush3.msra.mxu0 %v7626_v56  ;;  %5563 = vmatprep.subr.mxu1 %v7639_v59  ;;  %v6422_v40 = vpop.f32.mrf.mxu0 }
 0x1ec   : > { %5526 = vmatprep.subr.mxu0 %v7637_v58  ;;  %5564 = vmatpush3.msra.mxu1 %v7645_v61  ;;  %v1683_v28 = vadd.f32 %v7767_v27, %v1675_v35  ;;  %v8508_v35 = vld [vmem:[#allocation31_spill] sm:$0xff]  ;;  %v8509_v40 = vld [vmem:[#allocation32_spill] sm:$0xff] }
 0x1ed   : > { %5527 = vmatpush3.msra.mxu0 %v7643_v60  ;;  %5565 = vmatprep.subr.mxu1 %v7651_v63  ;;  %v1765_v33 = vpop.f32.mrf.mxu1 }
 0x1ee   : > { %5528 = vmatprep.subr.mxu0 %v7649_v62  ;;  %5566 = vmatpush3.msra.mxu1 %v7657_v2  ;;  %vm1684_vm7 = vcmp.gt.f32.partialorder %v1683_v28, 0.0  ;;  %v1685_v25 = vmul.f32 0.01, %v1683_v28 }
 0x1ef   : > { %5529 = vmatpush3.msra.mxu0 %v7655_v1  ;;  %5567 = vmatprep.subr.mxu1 %v7663_v4  ;;  %v6429_v32 = vpop.f32.mrf.mxu1 }
 0x1f0   : > { %5530 = vmatprep.subr.mxu0 %v7661_v3  ;;  %5568 = vmatpush3.msra.mxu1 %v7669_v6  ;;  %v1686_v27 = vsel %vm1684_vm7, %v1683_v28, %v1685_v25  ;;  %v1842_v34 = vpop.f32.mrf.mxu0  ;;  %v8510_v28 = vld [vmem:[#allocation33_spill] sm:$0xff]  ;;  %v2166_v25 = vld [vmem:[#allocation2 + $0x8] sm:$0x1f] }
 0x1f1   : > { %5531 = vmatpush3.msra.mxu0 %v7667_v5  ;;  %5569 = vmatprep.subr.mxu1 %v7675_v8  ;;  %1687 = vst [vmem:[#allocation2 + $0x18] sm:$0x3f] %v1686_v27  ;;  %v1843_v24 = vadd.f32 %v1842_v34, %v1765_v33  ;;  %v8511_v33 = vld [vmem:[#allocation34_spill] sm:$0xff]  ;;  %v8512_v32 = vld [vmem:[#allocation35_spill] sm:$0xff]  ;;  %v8513_v27 = vld [vmem:[#allocation36_spill] sm:$0xff]  ;;  %v2236_v34 = vrot.slane %v2200_v37, 1 }
 0x1f2   : > { %5532 = vmatprep.subr.mxu0 %v7673_v7  ;;  %5570 = vmatpush3.msra.mxu1 %v7681_v10  ;;  %v1921_v42 = vpop.f32.mrf.mxu1  ;;  %v6436_v39 = vpop.f32.mrf.mxu0  ;;  %v2165_v37 = vld [vmem:[#allocation2 + $0x10] sm:$0x1f] }
 0x1f3   : > { %5533 = vmatpush3.msra.mxu0 %v7679_v9  ;;  %5571 = vmatprep.subr.mxu1 %v7687_v12  ;;  %v1925_v36 = vadd.f32 %v1921_v42, %v1843_v24  ;;  %v8514_v24 = vld [vmem:[#allocation37_spill] sm:$0xff]  ;;  %v8515_v42 = vld [vmem:[#allocation38_spill] sm:$0xff]  ;;  %v8517_v39 = vld [vmem:[#allocation40_spill] sm:$0xff] }
 0x1f4   : > { %5534 = vmatprep.subr.mxu0 %v7685_v11  ;;  %5572 = vmatpush3.msra.mxu1 %v7693_v14  ;;  %v6443_v26 = vpop.f32.mrf.mxu1 }
 0x1f5   : > { %5535 = vmatpush3.msra.mxu0 %v7691_v13  ;;  %5573 = vmatprep.subr.mxu1 %v7699_v16  ;;  %v1933_v22 = vadd.f32 %v5380_v23, %v1925_v36  ;;  %v8516_v23 = vld [vmem:[#allocation39_spill] sm:$0xff]  ;;  %v8518_v36 = vld [vmem:[#allocation41_spill] sm:$0xff] }
 0x1f6   : > { %5536 = vmatprep.subr.mxu0 %v7697_v15  ;;  %5574 = vmatpush3.msra.mxu1 %v7705_v18  ;;  %v2199_v26 = vld [vmem:[#allocation2 + $0x10] sm:$0x3e] }
 0x1f7   : > { %5537 = vmatpush3.msra.mxu0 %v7703_v17  ;;  %5575 = vmatprep.subr.mxu1 %v7711_v20  ;;  %vm1934_vm8 = vcmp.gt.f32.partialorder %v1933_v22, 0.0  ;;  %v1935_v0 = vmul.f32 0.01, %v1933_v22 }
 0x1f8   : > { %5538 = vmatprep.subr.mxu0 %v7709_v19  ;;  %5576 = vmatpush3.msra.mxu1 %v8505_v30 }
 0x1f9   : > { %5539 = vmatpush3.msra.mxu0 %v7715_v21  ;;  %5577 = vmatprep.subr.mxu1 %v8507_v31  ;;  %v1936_v38 = vsel %vm1934_vm8, %v1933_v22, %v1935_v0  ;;  %v8519_v22 = vld [vmem:[#allocation42_spill] sm:$0xff]  ;;  %v8520_v0 = vld [vmem:[#allocation43_spill] sm:$0xff] }
 0x1fa   : > { %5540 = vmatprep.subr.mxu0 %v8506_v29  ;;  %5578 = vmatpush3.msra.mxu1 %v8509_v40  ;;  %1937 = vst [vmem:[#allocation2 + $0x20] sm:$0x3f] %v1936_v38  ;;  %v8521_v38 = vld [vmem:[#allocation44_spill] sm:$0xff] }
 0x1fb   : > { %5541 = vmatpush3.msra.mxu0 %v8508_v35  ;;  %5579 = vmatprep.subr.mxu1 %v8511_v33 }
 0x1fc   : > { %5542 = vmatprep.subr.mxu0 %v8510_v28  ;;  %5580 = vmatpush3.msra.mxu1 %v8513_v27  ;;  %v8522_v27 = vld [vmem:[#allocation45_spill] sm:$0xff] }
 0x1fd   : > { %5543 = vmatpush3.msra.mxu0 %v8512_v32  ;;  %5581 = vmatprep.subr.mxu1 %v8515_v42  ;;  %v2235_v42 = vrot.slane %v2199_v26, 1  ;;  %v8526_v26 = vld [vmem:[#allocation36_spill] sm:$0xff] }
 0x1fe   : > { %5544 = vmatprep.subr.mxu0 %v8514_v24  ;;  %2373 = vmatprep.mubr.f32.mxu1 %v2166_v25  ;;  %v8523_v25 = vld [vmem:[#allocation26_spill] sm:$0xff] }
 0x1ff   : > { %5545 = vmatpush3.msra.mxu0 %v8516_v23  ;;  %5582 = vmatpush3.msra.mxu1 %v8517_v39  ;;  %v8524_v23 = vld [vmem:[#allocation46_spill] sm:$0xff] }
 0x200   : > { %5546 = vmatprep.subr.mxu0 %v8518_v36  ;;  %2303 = vmatprep.mubr.f32.mxu0 %v2236_v34  ;;  %v8525_v36 = vld [vmem:[#allocation27_spill] sm:$0xff] }
 0x201   : > { %5583 = vmatprep.subr.mxu1 %v8519_v22  ;;  %5547 = vmatpush3.msra.mxu0 %v8520_v0  ;;  %v2426_v34 = vld [vmem:[#allocation2] sm:$0x3e] }
 0x202   : > { %5584 = vmatpush3.msra.mxu1 %v8521_v38  ;;  %5548 = vmatprep.subr.mxu0 %v8522_v27 }
 0x203   : > { %2374 = vmatmul.mubr.f32.vlgmr.msra.gmra.mxu1 %v2165_v37  ;;  %5623 = vmatprep.subr.mxu1 %v8523_v25  ;;  %v2462_v37 = vrot.slane %v2426_v34, 1  ;;  %v2391_v34 = vld [vmem:[#allocation2 + $0x8] sm:$0x1f] }
 0x204   : > { %5549 = vmatpush3.msra.mxu0 %v8524_v23  ;;  %5624 = vmatpush3.msra.mxu1 %v7581_v41 }
 0x205   : > { %2304 = vmatmul.mubr.f32.vlgmr.msra.gmra.mxu0 %v2235_v42  ;;  %5588 = vmatprep.subr.mxu0 %v8525_v36  ;;  %v2392_v42 = vld [vmem:[#allocation2] sm:$0x1f] }
 0x206   : > { %5625 = vmatprep.subr.mxu1 %v7588_v43  ;;  %5589 = vmatpush3.msra.mxu0 %v7590_v44 }
 0x207   : > { %5626 = vmatpush3.msra.mxu1 %v7594_v45  ;;  %5590 = vmatprep.subr.mxu0 %v7596_v46 }
 0x208   : > { %5627 = vmatprep.subr.mxu1 %v7600_v47  ;;  %5591 = vmatpush3.msra.mxu0 %v7602_v48 }
 0x209   : > { %5628 = vmatpush3.msra.mxu1 %v7606_v49  ;;  %5592 = vmatprep.subr.mxu0 %v7608_v50 }
 0x20a   : > { %5629 = vmatprep.subr.mxu1 %v7612_v51  ;;  %5593 = vmatpush3.msra.mxu0 %v7614_v52 }
 0x20b   : > { %5630 = vmatpush3.msra.mxu1 %v7618_v53  ;;  %5594 = vmatprep.subr.mxu0 %v7620_v54 }
 0x20c   : > { %5631 = vmatprep.subr.mxu1 %v7624_v55  ;;  %5595 = vmatpush3.msra.mxu0 %v7626_v56 }
 0x20d   : > { %5632 = vmatpush3.msra.mxu1 %v7630_v57  ;;  %5596 = vmatprep.subr.mxu0 %v7637_v58 }
 0x20e   : > { %5633 = vmatprep.subr.mxu1 %v7639_v59  ;;  %5597 = vmatpush3.msra.mxu0 %v7643_v60 }
 0x20f   : > { %5634 = vmatpush3.msra.mxu1 %v7645_v61  ;;  %5598 = vmatprep.subr.mxu0 %v7649_v62 }
 0x210   : > { %5635 = vmatprep.subr.mxu1 %v7651_v63  ;;  %5599 = vmatpush3.msra.mxu0 %v7655_v1 }
 0x211   : > { %5636 = vmatpush3.msra.mxu1 %v7657_v2  ;;  %5600 = vmatprep.subr.mxu0 %v7661_v3 }
 0x212   : > { %5637 = vmatprep.subr.mxu1 %v7663_v4  ;;  %5601 = vmatpush3.msra.mxu0 %v7667_v5 }
 0x213   : > { %5638 = vmatpush3.msra.mxu1 %v7669_v6  ;;  %5602 = vmatprep.subr.mxu0 %v7673_v7 }
 0x214   : > { %5639 = vmatprep.subr.mxu1 %v7675_v8  ;;  %5603 = vmatpush3.msra.mxu0 %v7679_v9 }
 0x215   : > { %5640 = vmatpush3.msra.mxu1 %v7681_v10  ;;  %5604 = vmatprep.subr.mxu0 %v7685_v11 }
 0x216   : > { %5641 = vmatprep.subr.mxu1 %v7687_v12  ;;  %5605 = vmatpush3.msra.mxu0 %v7691_v13 }
 0x217   : > { %5642 = vmatpush3.msra.mxu1 %v7693_v14  ;;  %5606 = vmatprep.subr.mxu0 %v7697_v15 }
 0x218   : > { %5643 = vmatprep.subr.mxu1 %v7699_v16  ;;  %5607 = vmatpush3.msra.mxu0 %v7703_v17 }
 0x219   : > { %5644 = vmatpush3.msra.mxu1 %v7705_v18  ;;  %5608 = vmatprep.subr.mxu0 %v7709_v19 }
 0x21a   : > { %5645 = vmatprep.subr.mxu1 %v7711_v20  ;;  %5609 = vmatpush3.msra.mxu0 %v7715_v21 }
 0x21b   : > { %5646 = vmatpush3.msra.mxu1 %v8505_v30  ;;  %5610 = vmatprep.subr.mxu0 %v8506_v29  ;;  %v8527_v29 = vld [vmem:[#allocation38_spill] sm:$0xff] }
 0x21c   : > { %5647 = vmatprep.subr.mxu1 %v8507_v31  ;;  %5611 = vmatpush3.msra.mxu0 %v8508_v35  ;;  %v8528_v31 = vld [vmem:[#allocation39_spill] sm:$0xff] }
 0x21d   : > { %5648 = vmatpush3.msra.mxu1 %v8509_v40  ;;  %5612 = vmatprep.subr.mxu0 %v8510_v28  ;;  %v8529_v40 = vld [vmem:[#allocation41_spill] sm:$0xff]  ;;  %v2425_v28 = vld [vmem:[#allocation2 + $0x8] sm:$0x3e] }
 0x21e   : > { %5649 = vmatprep.subr.mxu1 %v8511_v33  ;;  %5613 = vmatpush3.msra.mxu0 %v8512_v32 }
 0x21f   : > { %5650 = vmatpush3.msra.mxu1 %v8526_v26  ;;  %5614 = vmatprep.subr.mxu0 %v8514_v24 }
 0x220   : > { %5651 = vmatprep.subr.mxu1 %v8527_v29  ;;  %2599 = vmatprep.mubr.f32.mxu1 %v2392_v42  ;;  %v2461_v29 = vrot.slane %v2425_v28, 1  ;;  %v2851_v28 = vld [vmem:[#allocation10 + $0x30] sm:$0xff]  ;;  %v2848_v42 = vld [vmem:[#allocation10 + $0x18] sm:$0xff] }
 0x221   : > { %5615 = vmatpush3.msra.mxu0 %v8528_v31  ;;  %5652 = vmatpush3.msra.mxu1 %v8517_v39 }
 0x222   : > { %5616 = vmatprep.subr.mxu0 %v8529_v40  ;;  %2529 = vmatprep.mubr.f32.mxu0 %v2462_v37  ;;  %v2863_v37 = vld [vmem:[#allocation10 + $0x90] sm:$0xff] }
 0x223   : > { %5653 = vmatprep.subr.mxu1 %v8519_v22  ;;  %5617 = vmatpush3.msra.mxu0 %v8520_v0 }
 0x224   : > { %5654 = vmatpush3.msra.mxu1 %v8521_v38  ;;  %5618 = vmatprep.subr.mxu0 %v8522_v27 }
 0x225   : > { %2600 = vmatmul.mubr.f32.vlgmr.msra.gmra.mxu1 %v2391_v34  ;;  %5693 = vmatprep.subr.mxu1 %v8523_v25  ;;  %v2883_v25 = vld [vmem:[#allocation10 + $0x120] sm:$0xff]  ;;  %v2878_v34 = vld [vmem:[#allocation2 + $0x20] sm:$0x3e] }
 0x226   : > { %5619 = vmatpush3.msra.mxu0 %v8524_v23  ;;  %5694 = vmatpush3.msra.mxu1 %v7581_v41  ;;  %v8530_v41 = vld [vmem:[#allocation29_spill] sm:$0xff] }
 0x227   : > { %2530 = vmatmul.mubr.f32.vlgmr.msra.gmra.mxu0 %v2461_v29  ;;  %5658 = vmatprep.subr.mxu0 %v8525_v36  ;;  %v2852_v29 = vld [vmem:[#allocation10 + $0x38] sm:$0xff]  ;;  %v2884_v36 = vld [vmem:[#allocation10 + $0x128] sm:$0xff] }
 0x228   : > { %5695 = vmatprep.subr.mxu1 %v7588_v43  ;;  %5659 = vmatpush3.msra.mxu0 %v7590_v44  ;;  %v8531_v43 = vld [vmem:[#allocation30_spill] sm:$0xff] }
 0x229   : > { %5696 = vmatpush3.msra.mxu1 %v7594_v45  ;;  %5660 = vmatprep.subr.mxu0 %v7596_v46  ;;  %v2652_v44 = vld [vmem:[#allocation2 + $0x18] sm:$0x3e]  ;;  %v8532_v45 = vld [vmem:[#allocation32_spill] sm:$0xff] }
 0x22a   : > { %5697 = vmatprep.subr.mxu1 %v7600_v47  ;;  %5661 = vmatpush3.msra.mxu0 %v7602_v48  ;;  %v8533_v46 = vld [vmem:[#allocation33_spill] sm:$0xff]  ;;  %v2688_v48 = vrot.slane %v2652_v44, 1  ;;  %v2844_v44 = vld [vmem:[#allocation2 + $0x20] sm:$0x1f] }
 0x22b   : > { %5698 = vmatpush3.msra.mxu1 %v7606_v49  ;;  %5662 = vmatprep.subr.mxu0 %v7608_v50  ;;  %v2618_v47 = vld [vmem:[#allocation2 + $0x18] sm:$0x1f]  ;;  %v2651_v50 = vld [vmem:[#allocation2] sm:$0x3e] }
 0x22c   : > { %5699 = vmatprep.subr.mxu1 %v7612_v51  ;;  %5663 = vmatpush3.msra.mxu0 %v7614_v52  ;;  %v8534_v49 = vld [vmem:[#allocation38_spill] sm:$0xff]  ;;  %v2876_v51 = vld [vmem:[#allocation10 + $0xf8] sm:$0xff] }
 0x22d   : > { %5700 = vmatpush3.msra.mxu1 %v7618_v53  ;;  %5664 = vmatprep.subr.mxu0 %v7620_v54  ;;  %v2617_v52 = vld [vmem:[#allocation2] sm:$0x1f]  ;;  %v2860_v53 = vld [vmem:[#allocation10 + $0x78] sm:$0xff]  ;;  %v2687_v54 = vrot.slane %v2651_v50, 1 }
 0x22e   : > { %5701 = vmatprep.subr.mxu1 %v7624_v55  ;;  %5665 = vmatpush3.msra.mxu0 %v7626_v56  ;;  %v2910_v55 = vld [vmem:[#allocation10 + $0x1f8] sm:$0xff]  ;;  %v2875_v56 = vld [vmem:[#allocation10 + $0xf0] sm:$0xff]  ;;  %v2896_v50 = vld [vmem:[#allocation10 + $0x188] sm:$0xff] }
 0x22f   : > { %5702 = vmatpush3.msra.mxu1 %v7630_v57  ;;  %5666 = vmatprep.subr.mxu0 %v7637_v58  ;;  %v2894_v57 = vld [vmem:[#allocation10 + $0x178] sm:$0xff]  ;;  %v2859_v58 = vld [vmem:[#allocation10 + $0x70] sm:$0xff] }
 0x230   : > { %5703 = vmatprep.subr.mxu1 %v7639_v59  ;;  %5667 = vmatpush3.msra.mxu0 %v7643_v60  ;;  %v2909_v59 = vld [vmem:[#allocation10 + $0x1f0] sm:$0xff]  ;;  %v2874_v60 = vld [vmem:[#allocation10 + $0xe8] sm:$0xff] }
 0x231   : > { %5704 = vmatpush3.msra.mxu1 %v7645_v61  ;;  %5668 = vmatprep.subr.mxu0 %v7649_v62  ;;  %v2893_v61 = vld [vmem:[#allocation10 + $0x170] sm:$0xff]  ;;  %v2858_v62 = vld [vmem:[#allocation10 + $0x68] sm:$0xff] }
 0x232   : > { %5705 = vmatprep.subr.mxu1 %v7651_v63  ;;  %5669 = vmatpush3.msra.mxu0 %v7655_v1  ;;  %v2908_v63 = vld [vmem:[#allocation10 + $0x1e8] sm:$0xff]  ;;  %v2873_v1 = vld [vmem:[#allocation10 + $0xe0] sm:$0xff] }
 0x233   : > { %5706 = vmatpush3.msra.mxu1 %v7657_v2  ;;  %5670 = vmatprep.subr.mxu0 %v7661_v3  ;;  %v2892_v2 = vld [vmem:[#allocation10 + $0x168] sm:$0xff]  ;;  %v2857_v3 = vld [vmem:[#allocation10 + $0x60] sm:$0xff] }
 0x234   : > { %5707 = vmatprep.subr.mxu1 %v7663_v4  ;;  %5671 = vmatpush3.msra.mxu0 %v7667_v5  ;;  %v2907_v4 = vld [vmem:[#allocation10 + $0x1e0] sm:$0xff]  ;;  %v2872_v5 = vld [vmem:[#allocation10 + $0xd8] sm:$0xff] }
 0x235   : > { %5708 = vmatpush3.msra.mxu1 %v7669_v6  ;;  %5672 = vmatprep.subr.mxu0 %v7673_v7  ;;  %v2891_v6 = vld [vmem:[#allocation10 + $0x160] sm:$0xff]  ;;  %v2856_v7 = vld [vmem:[#allocation10 + $0x58] sm:$0xff] }
 0x236   : > { %5709 = vmatprep.subr.mxu1 %v7675_v8  ;;  %5673 = vmatpush3.msra.mxu0 %v7679_v9  ;;  %v2906_v8 = vld [vmem:[#allocation10 + $0x1d8] sm:$0xff]  ;;  %v2871_v9 = vld [vmem:[#allocation10 + $0xd0] sm:$0xff] }
 0x237   : > { %5710 = vmatpush3.msra.mxu1 %v7681_v10  ;;  %5674 = vmatprep.subr.mxu0 %v7685_v11  ;;  %v2890_v10 = vld [vmem:[#allocation10 + $0x158] sm:$0xff]  ;;  %v2855_v11 = vld [vmem:[#allocation10 + $0x50] sm:$0xff] }
 0x238   : > { %5711 = vmatprep.subr.mxu1 %v7687_v12  ;;  %5675 = vmatpush3.msra.mxu0 %v7691_v13  ;;  %v2905_v12 = vld [vmem:[#allocation10 + $0x1d0] sm:$0xff]  ;;  %v2870_v13 = vld [vmem:[#allocation10 + $0xc8] sm:$0xff] }
 0x239   : > { %5712 = vmatpush3.msra.mxu1 %v7693_v14  ;;  %5676 = vmatprep.subr.mxu0 %v7697_v15  ;;  %v2889_v14 = vld [vmem:[#allocation10 + $0x150] sm:$0xff]  ;;  %v2854_v15 = vld [vmem:[#allocation10 + $0x48] sm:$0xff] }
 0x23a   : > { %5713 = vmatprep.subr.mxu1 %v7699_v16  ;;  %5677 = vmatpush3.msra.mxu0 %v7703_v17  ;;  %v2904_v16 = vld [vmem:[#allocation10 + $0x1c8] sm:$0xff]  ;;  %v2869_v17 = vld [vmem:[#allocation10 + $0xc0] sm:$0xff] }
 0x23b   : > { %5714 = vmatpush3.msra.mxu1 %v7705_v18  ;;  %5678 = vmatprep.subr.mxu0 %v7709_v19  ;;  %v2888_v18 = vld [vmem:[#allocation10 + $0x148] sm:$0xff]  ;;  %v2853_v19 = vld [vmem:[#allocation10 + $0x40] sm:$0xff] }
 0x23c   : > { %5715 = vmatprep.subr.mxu1 %v7711_v20  ;;  %5679 = vmatpush3.msra.mxu0 %v7715_v21  ;;  %v2903_v20 = vld [vmem:[#allocation10 + $0x1c0] sm:$0xff]  ;;  %v2868_v21 = vld [vmem:[#allocation10 + $0xb8] sm:$0xff] }
 0x23d   : > { %5716 = vmatpush3.msra.mxu1 %v8505_v30  ;;  %5680 = vmatprep.subr.mxu0 %v8530_v41  ;;  %v2887_v30 = vld [vmem:[#allocation10 + $0x140] sm:$0xff]  ;;  %v2882_v41 = vld [vmem:[#allocation10 + $0x118] sm:$0xff] }
 0x23e   : > { %5717 = vmatprep.subr.mxu1 %v8531_v43  ;;  %5681 = vmatpush3.msra.mxu0 %v8508_v35  ;;  %v2867_v35 = vld [vmem:[#allocation10 + $0xb0] sm:$0xff] }
 0x23f   : > { %5718 = vmatpush3.msra.mxu1 %v8532_v45  ;;  %5682 = vmatprep.subr.mxu0 %v8533_v46  ;;  %v2847_v43 = vld [vmem:[#allocation10 + $0x10] sm:$0xff]  ;;  %v2862_v46 = vld [vmem:[#allocation10 + $0x88] sm:$0xff] }
 0x240   : > { %5719 = vmatprep.subr.mxu1 %v8511_v33  ;;  %5683 = vmatpush3.msra.mxu0 %v8512_v32  ;;  %v2901_v33 = vld [vmem:[#allocation10 + $0x1b0] sm:$0xff]  ;;  %v2866_v32 = vld [vmem:[#allocation10 + $0xa8] sm:$0xff] }
 0x241   : > { %5720 = vmatpush3.msra.mxu1 %v8526_v26  ;;  %5684 = vmatprep.subr.mxu0 %v8514_v24  ;;  %v2850_v24 = vld [vmem:[#allocation10 + $0x28] sm:$0xff]  ;;  %v2898_v26 = vld [vmem:[#allocation10 + $0x198] sm:$0xff]  ;;  %v2897_v45 = vld [vmem:[#allocation10 + $0x190] sm:$0xff] }
 0x242   : > { %5721 = vmatprep.subr.mxu1 %v8534_v49  ;;  %2825 = vmatprep.mubr.f32.mxu1 %v2618_v47  ;;  %v2881_v47 = vld [vmem:[#allocation10 + $0x110] sm:$0xff]  ;;  %v2846_v49 = vld [vmem:[#allocation10 + $0x8] sm:$0xff] }
 0x243   : > { %5685 = vmatpush3.msra.mxu0 %v8528_v31  ;;  %5722 = vmatpush3.msra.mxu1 %v8517_v39  ;;  %v2902_v31 = vld [vmem:[#allocation10 + $0x1b8] sm:$0xff]  ;;  %v2865_v39 = vld [vmem:[#allocation10 + $0xa0] sm:$0xff] }
 0x244   : > { %5686 = vmatprep.subr.mxu0 %v8529_v40  ;;  %2755 = vmatprep.mubr.f32.mxu0 %v2688_v48  ;;  %v2886_v40 = vld [vmem:[#allocation10 + $0x138] sm:$0xff]  ;;  %v2914_v48 = vrot.slane %v2878_v34, 1 }
 0x245   : > { %5723 = vmatprep.subr.mxu1 %v8519_v22  ;;  %5687 = vmatpush3.msra.mxu0 %v8520_v0  ;;  %v2849_v22 = vld [vmem:[#allocation10 + $0x20] sm:$0xff] }
 0x246   : > { %5724 = vmatpush3.msra.mxu1 %v8521_v38  ;;  %5688 = vmatprep.subr.mxu0 %v8522_v27  ;;  %v2885_v27 = vld [vmem:[#allocation10 + $0x130] sm:$0xff]  ;;  %v2899_v0 = vld [vmem:[#allocation10 + $0x1a0] sm:$0xff]  ;;  %v2864_v38 = vld [vmem:[#allocation10 + $0x98] sm:$0xff] }
 0x247   : > { %2826 = vmatmul.mubr.f32.vlgmr.msra.gmra.mxu1 %v2617_v52  ;;  %5763 = vmatprep.subr.mxu1 %v2876_v51  ;;  %v2861_v51 = vld [vmem:[#allocation10 + $0x80] sm:$0xff]  ;;  %v2880_v52 = vld [vmem:[#allocation10 + $0x108] sm:$0xff] }
 0x248   : > { %5689 = vmatpush3.msra.mxu0 %v8524_v23  ;;  %5764 = vmatpush3.msra.mxu1 %v2860_v53  ;;  %v2900_v23 = vld [vmem:[#allocation10 + $0x1a8] sm:$0xff]  ;;  %v2845_v53 = vld [vmem:[#allocation10] sm:$0xff] }
 0x249   : > { %2756 = vmatmul.mubr.f32.vlgmr.msra.gmra.mxu0 %v2687_v54  ;;  %5728 = vmatprep.subr.mxu0 %v2910_v55  ;;  %v2895_v54 = vld [vmem:[#allocation10 + $0x180] sm:$0xff] }
 0x24a   : > { %5765 = vmatprep.subr.mxu1 %v2875_v56  ;;  %5729 = vmatpush3.msra.mxu0 %v2894_v57  ;;  %v2877_v55 = vld [vmem:[#allocation2 + $0x18] sm:$0x3e] }
 0x24b   : > { %5766 = vmatpush3.msra.mxu1 %v2859_v58  ;;  %5730 = vmatprep.subr.mxu0 %v2909_v59  ;;  %v2879_v56 = vld [vmem:[#allocation10 + $0x100] sm:$0xff]  ;;  %v2913_v58 = vrot.slane %v2877_v55, 1 }
 0x24c   : > { %5767 = vmatprep.subr.mxu1 %v2874_v60  ;;  %5731 = vmatpush3.msra.mxu0 %v2893_v61  ;;  %v2843_v57 = vld [vmem:[#allocation2 + $0x18] sm:$0x1f]  ;;  %v7974_v59 = vld [vmem:[#allocation13 + $0x78] sm:$0xff]  ;;  %v8535_v60 = vmov 0.0   ;;  %v7978_v61 = vld [vmem:[#allocation13 + $0x70] sm:$0xff] }
 0x24d   : > { %5768 = vmatpush3.msra.mxu1 %v2858_v62  ;;  %5732 = vmatprep.subr.mxu0 %v2908_v63  ;;  %v7984_v62 = vld [vmem:[#allocation13 + $0x68] sm:$0xff]  ;;  %v7990_v63 = vld [vmem:[#allocation13 + $0x60] sm:$0xff] }
 0x24e   : > { %5769 = vmatprep.subr.mxu1 %v2873_v1  ;;  %5733 = vmatpush3.msra.mxu0 %v2892_v2  ;;  %v7996_v1 = vld [vmem:[#allocation13 + $0x58] sm:$0xff]  ;;  %v8002_v2 = vld [vmem:[#allocation13 + $0x50] sm:$0xff] }
 0x24f   : > { %5770 = vmatpush3.msra.mxu1 %v2857_v3  ;;  %5734 = vmatprep.subr.mxu0 %v2907_v4  ;;  %v8008_v3 = vld [vmem:[#allocation13 + $0x48] sm:$0xff]  ;;  %v8014_v4 = vld [vmem:[#allocation13 + $0x40] sm:$0xff] }
 0x250   : > { %5771 = vmatprep.subr.mxu1 %v2872_v5  ;;  %5735 = vmatpush3.msra.mxu0 %v2891_v6  ;;  %v8020_v5 = vld [vmem:[#allocation13 + $0x38] sm:$0xff]  ;;  %v8026_v6 = vld [vmem:[#allocation13 + $0x30] sm:$0xff] }
 0x251   : > { %5772 = vmatpush3.msra.mxu1 %v2856_v7  ;;  %5736 = vmatprep.subr.mxu0 %v2906_v8  ;;  %v8032_v7 = vld [vmem:[#allocation13 + $0x28] sm:$0xff]  ;;  %v8038_v8 = vld [vmem:[#allocation13 + $0x20] sm:$0xff] }
 0x252   : > { %5773 = vmatprep.subr.mxu1 %v2871_v9  ;;  %5737 = vmatpush3.msra.mxu0 %v2890_v10  ;;  %v8044_v9 = vld [vmem:[#allocation13 + $0x18] sm:$0xff]  ;;  %v8050_v10 = vld [vmem:[#allocation13 + $0x10] sm:$0xff] }
 0x253   : > { %5774 = vmatpush3.msra.mxu1 %v2855_v11  ;;  %5738 = vmatprep.subr.mxu0 %v2905_v12  ;;  %v8056_v11 = vld [vmem:[#allocation13 + $0x8] sm:$0xff]  ;;  %v8062_v12 = vld [vmem:[#allocation13] sm:$0xff] }
 0x254   : > { %5775 = vmatprep.subr.mxu1 %v2870_v13  ;;  %5739 = vmatpush3.msra.mxu0 %v2889_v14 }
 0x255   : > { %5776 = vmatpush3.msra.mxu1 %v2854_v15  ;;  %5740 = vmatprep.subr.mxu0 %v2904_v16 }
 0x256   : > { %5777 = vmatprep.subr.mxu1 %v2869_v17  ;;  %5741 = vmatpush3.msra.mxu0 %v2888_v18 }
 0x257   : > { %5778 = vmatpush3.msra.mxu1 %v2853_v19  ;;  %5742 = vmatprep.subr.mxu0 %v2903_v20  ;;  %v8076_v19 = vld [vmem:[#allocation11] ss:$0 sm:$0xff] }
 0x258   : > { %5779 = vmatprep.subr.mxu1 %v2868_v21  ;;  %5743 = vmatpush3.msra.mxu0 %v2887_v30 }
 0x259   : > { %5780 = vmatpush3.msra.mxu1 %v2852_v29  ;;  %5744 = vmatprep.subr.mxu0 %v2902_v31 }
 0x25a   : > { %5781 = vmatprep.subr.mxu1 %v2867_v35  ;;  %5745 = vmatpush3.msra.mxu0 %v2886_v40 }
 0x25b   : > { %5782 = vmatpush3.msra.mxu1 %v2851_v28  ;;  %5746 = vmatprep.subr.mxu0 %v2901_v33 }
 0x25c   : > { %5783 = vmatprep.subr.mxu1 %v2866_v32  ;;  %5747 = vmatpush3.msra.mxu0 %v2885_v27 }
 0x25d   : > { %5784 = vmatpush3.msra.mxu1 %v2850_v24  ;;  %5748 = vmatprep.subr.mxu0 %v2900_v23 }
 0x25e   : > { %5785 = vmatprep.subr.mxu1 %v2865_v39  ;;  %5749 = vmatpush3.msra.mxu0 %v2884_v36 }
 0x25f   : > { %5786 = vmatpush3.msra.mxu1 %v2849_v22  ;;  %5750 = vmatprep.subr.mxu0 %v2899_v0 }
 0x260   : > { %5787 = vmatprep.subr.mxu1 %v2864_v38  ;;  %5751 = vmatpush3.msra.mxu0 %v2883_v25 }
 0x261   : > { %5788 = vmatpush3.msra.mxu1 %v2848_v42  ;;  %5752 = vmatprep.subr.mxu0 %v2898_v26 }
 0x262   : > { %5789 = vmatprep.subr.mxu1 %v2863_v37  ;;  %5753 = vmatpush3.msra.mxu0 %v2882_v41 }
 0x263   : > { %5790 = vmatpush3.msra.mxu1 %v2847_v43  ;;  %3051 = vmatprep.mubr.f32.mxu1 %v2844_v44 }
 0x264   : > { %5754 = vmatprep.subr.mxu0 %v2897_v45  ;;  %5791 = vmatprep.subr.mxu1 %v2862_v46 }
 0x265   : > { %5755 = vmatpush3.msra.mxu0 %v2881_v47  ;;  %2981 = vmatprep.mubr.f32.mxu0 %v2914_v48 }
 0x266   : > { %5792 = vmatpush3.msra.mxu1 %v2846_v49  ;;  %5756 = vmatprep.subr.mxu0 %v2896_v50 }
 0x267   : > { %5793 = vmatprep.subr.mxu1 %v2861_v51  ;;  %5757 = vmatpush3.msra.mxu0 %v2880_v52 }
 0x268   : > { %5794 = vmatpush3.msra.mxu1 %v2845_v53  ;;  %5758 = vmatprep.subr.mxu0 %v2895_v54 }
 0x269   : > { %3052 = vmatmul.mubr.f32.vlgmr.msra.gmra.mxu1 %v2843_v57  ;;  %5759 = vmatpush3.msra.mxu0 %v2879_v56 }
 0x26a   : > { %6479 = vmatprep.subr.mxu1 %v8535_v60  ;;  %2982 = vmatmul.mubr.f32.vlgmr.msra.gmra.mxu0 %v2913_v58 }
 0x26b   : > { %6444 = vmatprep.subr.mxu0 %v8535_v60  ;;  %6476 = vmatprep.mubr.msk.f32.mxu0 %vm7224_vm0, %v8535_v60 }
 0x26c   : > { %6445 = vmatpush3.msra.mxu0 %v7974_v59  ;;  %6480 = vmatpush3.msra.mxu1 %v7974_v59 }
 0x26d   : > { %6446 = vmatprep.subr.mxu0 %v8535_v60  ;;  %6481 = vmatprep.subr.mxu1 %v8535_v60 }
 0x26e   : > { %6447 = vmatpush3.msra.mxu0 %v7978_v61  ;;  %6482 = vmatpush3.msra.mxu1 %v7978_v61 }
 0x26f   : > { %6448 = vmatprep.subr.mxu0 %v8535_v60  ;;  %6483 = vmatprep.subr.mxu1 %v8535_v60 }
 0x270   : > { %6449 = vmatpush3.msra.mxu0 %v7984_v62  ;;  %6484 = vmatpush3.msra.mxu1 %v7984_v62 }
 0x271   : > { %6450 = vmatprep.subr.mxu0 %v8535_v60  ;;  %6485 = vmatprep.subr.mxu1 %v8535_v60 }
 0x272   : > { %6451 = vmatpush3.msra.mxu0 %v7990_v63  ;;  %6486 = vmatpush3.msra.mxu1 %v7990_v63 }
 0x273   : > { %6452 = vmatprep.subr.mxu0 %v8535_v60  ;;  %6487 = vmatprep.subr.mxu1 %v8535_v60 }
 0x274   : > { %6453 = vmatpush3.msra.mxu0 %v7996_v1  ;;  %6488 = vmatpush3.msra.mxu1 %v7996_v1 }
 0x275   : > { %6454 = vmatprep.subr.mxu0 %v8535_v60  ;;  %6489 = vmatprep.subr.mxu1 %v8535_v60 }
 0x276   : > { %6455 = vmatpush3.msra.mxu0 %v8002_v2  ;;  %6490 = vmatpush3.msra.mxu1 %v8002_v2 }
 0x277   : > { %6456 = vmatprep.subr.mxu0 %v8535_v60  ;;  %6491 = vmatprep.subr.mxu1 %v8535_v60 }
 0x278   : > { %6457 = vmatpush3.msra.mxu0 %v8008_v3  ;;  %6492 = vmatpush3.msra.mxu1 %v8008_v3 }
 0x279   : > { %6458 = vmatprep.subr.mxu0 %v8535_v60  ;;  %6493 = vmatprep.subr.mxu1 %v8535_v60 }
 0x27a   : > { %6459 = vmatpush3.msra.mxu0 %v8014_v4  ;;  %6494 = vmatpush3.msra.mxu1 %v8014_v4 }
 0x27b   : > { %6460 = vmatprep.subr.mxu0 %v8535_v60  ;;  %6495 = vmatprep.subr.mxu1 %v8535_v60 }
 0x27c   : > { %6461 = vmatpush3.msra.mxu0 %v8020_v5  ;;  %6496 = vmatpush3.msra.mxu1 %v8020_v5 }
 0x27d   : > { %6462 = vmatprep.subr.mxu0 %v8535_v60  ;;  %6497 = vmatprep.subr.mxu1 %v8535_v60 }
 0x27e   : > { %6463 = vmatpush3.msra.mxu0 %v8026_v6  ;;  %6498 = vmatpush3.msra.mxu1 %v8026_v6 }
 0x27f   : > { %6464 = vmatprep.subr.mxu0 %v8535_v60  ;;  %6499 = vmatprep.subr.mxu1 %v8535_v60 }
 0x280   : > { %6465 = vmatpush3.msra.mxu0 %v8032_v7  ;;  %6500 = vmatpush3.msra.mxu1 %v8032_v7 }
 0x281   : > { %6466 = vmatprep.subr.mxu0 %v8535_v60  ;;  %6501 = vmatprep.subr.mxu1 %v8535_v60 }
 0x282   : > { %6467 = vmatpush3.msra.mxu0 %v8038_v8  ;;  %6502 = vmatpush3.msra.mxu1 %v8038_v8 }
 0x283   : > { %6468 = vmatprep.subr.mxu0 %v8535_v60  ;;  %6503 = vmatprep.subr.mxu1 %v8535_v60 }
 0x284   : > { %6469 = vmatpush3.msra.mxu0 %v8044_v9  ;;  %6504 = vmatpush3.msra.mxu1 %v8044_v9 }
 0x285   : > { %6470 = vmatprep.subr.mxu0 %v8535_v60  ;;  %6505 = vmatprep.subr.mxu1 %v8535_v60 }
 0x286   : > { %6471 = vmatpush3.msra.mxu0 %v8050_v10  ;;  %6506 = vmatpush3.msra.mxu1 %v8050_v10 }
 0x287   : > { %6472 = vmatprep.subr.mxu0 %v8535_v60  ;;  %6507 = vmatprep.subr.mxu1 %v8535_v60 }
 0x288   : > { %6473 = vmatpush3.msra.mxu0 %v8056_v11  ;;  %6508 = vmatpush3.msra.mxu1 %v8056_v11 }
 0x289   : > { %6474 = vmatprep.subr.mxu0 %v8535_v60  ;;  %6509 = vmatprep.subr.mxu1 %v8535_v60 }
 0x28a   : > { %6475 = vmatpush3.msra.mxu0 %v8062_v12  ;;  %6510 = vmatpush3.msra.mxu1 %v8062_v12 }
 0x28b   : > { %6511 = vmatprep.mubr.msk.f32.mxu1 %vm7224_vm0, %v8535_v60  ;;  %6514 = vmatprep.subr.mxu0 %v8535_v60 }
 0x28c   : > { %6549 = vmatprep.subr.mxu1 %v8535_v60 }
 0x2a1   : > { %v5515_v13 = vpop.f32.mrf.mxu1 }
 0x2a3   : > { %v5516_v15 = vpop.f32.mrf.mxu1 }
 0x2a4   : > { %v5480_v14 = vpop.f32.mrf.mxu0  ;;  %v5517_v17 = vadd.f32 %v5516_v15, %v5515_v13  ;;  %v3693_v13 = vld [vmem:[#allocation16 + $0x3f0] sm:$0xff]  ;;  %v3708_v15 = vld [vmem:[#allocation16 + $0x468] sm:$0xff] }
 0x2a6   : > { %v5481_v16 = vpop.f32.mrf.mxu0 }
 0x2a7   : > { %v5482_v18 = vadd.f32 %v5481_v16, %v5480_v14  ;;  %v3676_v14 = vld [vmem:[#allocation16 + $0x368] sm:$0xff] }
 0x2a8   : > { %v3660_v16 = vld [vmem:[#allocation16 + $0x2e8] sm:$0xff] }
 0x2a9   : > { %v2150_v20 = vadd.f32 %v5517_v17, %v5482_v18  ;;  %v3692_v17 = vld [vmem:[#allocation16 + $0x3e8] sm:$0xff]  ;;  %v3675_v18 = vld [vmem:[#allocation16 + $0x360] sm:$0xff] }
 0x2ab   : > { %v2160_v21 = vadd.f32 %v8076_v19, %v2150_v20  ;;  %v3659_v20 = vld [vmem:[#allocation16 + $0x2e0] sm:$0xff] }
 0x2ad   : > { %vm2161_vm9 = vcmp.gt.f32.partialorder %v2160_v21, 0.0  ;;  %v2162_v30 = vmul.f32 0.01, %v2160_v21 }
 0x2af   : > { %v2163_v29 = vsel %vm2161_vm9, %v2160_v21, %v2162_v30  ;;  %v3691_v21 = vld [vmem:[#allocation16 + $0x3e0] sm:$0xff]  ;;  %v3674_v30 = vld [vmem:[#allocation16 + $0x358] sm:$0xff] }
 0x2b0   : > { %2164 = vst [vmem:[#allocation3] sm:$0x1f] %v2163_v29  ;;  %v3706_v29 = vld [vmem:[#allocation16 + $0x458] sm:$0xff] }
 0x2b7   : > { %v3069_v31 = vld [vmem:[#allocation3] sm:$0x1f] }
 0x2b8   : > { %6477 = vmatmul.mubr.f32.vlgmr.msra.gmra.mxu0 %v3069_v31  ;;  %v3658_v31 = vld [vmem:[#allocation16 + $0x2d8] sm:$0xff] }
 0x2b9   : > { %6515 = vmatpush3.msra.mxu0 %v7974_v59  ;;  %6546 = vmatprep.mubr.msk.f32.mxu0 %vm7224_vm0, %v8535_v60 }
 0x2ba   : > { %6516 = vmatprep.subr.mxu0 %v8535_v60 }
 0x2bb   : > { %6517 = vmatpush3.msra.mxu0 %v7978_v61 }
 0x2bc   : > { %6518 = vmatprep.subr.mxu0 %v8535_v60 }
 0x2bd   : > { %6519 = vmatpush3.msra.mxu0 %v7984_v62 }
 0x2be   : > { %6520 = vmatprep.subr.mxu0 %v8535_v60 }
 0x2bf   : > { %6521 = vmatpush3.msra.mxu0 %v7990_v63 }
 0x2c0   : > { %6522 = vmatprep.subr.mxu0 %v8535_v60 }
 0x2c1   : > { %6523 = vmatpush3.msra.mxu0 %v7996_v1 }
 0x2c2   : > { %6524 = vmatprep.subr.mxu0 %v8535_v60 }
 0x2c3   : > { %v5585_v35 = vpop.f32.mrf.mxu1  ;;  %6525 = vmatpush3.msra.mxu0 %v8002_v2 }
 0x2c4   : > { %6526 = vmatprep.subr.mxu0 %v8535_v60 }
 0x2c5   : > { %v5550_v40 = vpop.f32.mrf.mxu0  ;;  %v5586_v28 = vpop.f32.mrf.mxu1  ;;  %6527 = vmatpush3.msra.mxu0 %v8008_v3 }
 0x2c6   : > { %6528 = vmatprep.subr.mxu0 %v8535_v60  ;;  %v5587_v32 = vadd.f32 %v5586_v28, %v5585_v35  ;;  %v3690_v35 = vld [vmem:[#allocation16 + $0x3d8] sm:$0xff]  ;;  %v3705_v28 = vld [vmem:[#allocation16 + $0x450] sm:$0xff] }
 0x2c7   : > { %v5551_v33 = vpop.f32.mrf.mxu0  ;;  %6529 = vmatpush3.msra.mxu0 %v8014_v4 }
 0x2c8   : > { %v5552_v27 = vadd.f32 %v5551_v33, %v5550_v40  ;;  %6530 = vmatprep.subr.mxu0 %v8535_v60  ;;  %v3673_v40 = vld [vmem:[#allocation16 + $0x350] sm:$0xff] }
 0x2c9   : > { %6531 = vmatpush3.msra.mxu0 %v8020_v5  ;;  %v3657_v33 = vld [vmem:[#allocation16 + $0x2d0] sm:$0xff] }
 0x2ca   : > { %v2376_v24 = vadd.f32 %v5587_v32, %v5552_v27  ;;  %6532 = vmatprep.subr.mxu0 %v8535_v60  ;;  %v3689_v32 = vld [vmem:[#allocation16 + $0x3d0] sm:$0xff]  ;;  %v3672_v27 = vld [vmem:[#allocation16 + $0x348] sm:$0xff] }
 0x2cb   : > { %6533 = vmatpush3.msra.mxu0 %v8026_v6 }
 0x2cc   : > { %v2386_v23 = vadd.f32 %v8076_v19, %v2376_v24  ;;  %6534 = vmatprep.subr.mxu0 %v8535_v60  ;;  %v3704_v24 = vld [vmem:[#allocation16 + $0x448] sm:$0xff] }
 0x2cd   : > { %6535 = vmatpush3.msra.mxu0 %v8032_v7 }
 0x2ce   : > { %vm2387_vm10 = vcmp.gt.f32.partialorder %v2386_v23, 0.0  ;;  %v2388_v39 = vmul.f32 0.01, %v2386_v23  ;;  %6536 = vmatprep.subr.mxu0 %v8535_v60 }
 0x2cf   : > { %6537 = vmatpush3.msra.mxu0 %v8038_v8 }
 0x2d0   : > { %v2389_v36 = vsel %vm2387_vm10, %v2386_v23, %v2388_v39  ;;  %6538 = vmatprep.subr.mxu0 %v8535_v60  ;;  %v3656_v23 = vld [vmem:[#allocation16 + $0x2c8] sm:$0xff] }
 0x2d1   : > { %2390 = vst [vmem:[#allocation3 + $0x8] sm:$0x1f] %v2389_v36  ;;  %6539 = vmatpush3.msra.mxu0 %v8044_v9  ;;  %v3688_v39 = vld [vmem:[#allocation16 + $0x3c8] sm:$0xff]  ;;  %v8183_v36 = vld [vmem:[#allocation14] ss:$0 sm:$0xff] }
 0x2d2   : > { %6540 = vmatprep.subr.mxu0 %v8535_v60 }
 0x2d3   : > { %6541 = vmatpush3.msra.mxu0 %v8050_v10 }
 0x2d4   : > { %6542 = vmatprep.subr.mxu0 %v8535_v60 }
 0x2d5   : > { %6543 = vmatpush3.msra.mxu0 %v8056_v11 }
 0x2d6   : > { %6544 = vmatprep.subr.mxu0 %v8535_v60 }
 0x2d7   : > { %6545 = vmatpush3.msra.mxu0 %v8062_v12 }
 0x2d8   : > { %v3167_v22 = vld [vmem:[#allocation3 + $0x8] sm:$0x1f]  ;;  %6584 = vmatprep.subr.mxu0 %v8535_v60 }
 0x2d9   : > { %6512 = vmatmul.mubr.f32.vlgmr.msra.gmra.mxu1 %v3167_v22 }
 0x2da   : > { %6550 = vmatpush3.msra.mxu1 %v7974_v59  ;;  %6581 = vmatprep.mubr.msk.f32.mxu1 %vm7224_vm0, %v8535_v60 }
 0x2db   : > { %6551 = vmatprep.subr.mxu1 %v8535_v60 }
 0x2dc   : > { %6552 = vmatpush3.msra.mxu1 %v7978_v61 }
 0x2dd   : > { %6553 = vmatprep.subr.mxu1 %v8535_v60 }
 0x2de   : > { %6554 = vmatpush3.msra.mxu1 %v7984_v62 }
 0x2df   : > { %6555 = vmatprep.subr.mxu1 %v8535_v60 }
 0x2e0   : > { %6556 = vmatpush3.msra.mxu1 %v7990_v63 }
 0x2e1   : > { %6557 = vmatprep.subr.mxu1 %v8535_v60 }
 0x2e2   : > { %6558 = vmatpush3.msra.mxu1 %v7996_v1 }
 0x2e3   : > { %6559 = vmatprep.subr.mxu1 %v8535_v60 }
 0x2e4   : > { %6560 = vmatpush3.msra.mxu1 %v8002_v2 }
 0x2e5   : > { %v5655_v0 = vpop.f32.mrf.mxu1  ;;  %6561 = vmatprep.subr.mxu1 %v8535_v60 }
 0x2e6   : > { %6562 = vmatpush3.msra.mxu1 %v8008_v3 }
 0x2e7   : > { %v5620_v38 = vpop.f32.mrf.mxu0  ;;  %v5656_v25 = vpop.f32.mrf.mxu1  ;;  %6563 = vmatprep.subr.mxu1 %v8535_v60 }
 0x2e8   : > { %6564 = vmatpush3.msra.mxu1 %v8014_v4  ;;  %v5657_v26 = vadd.f32 %v5656_v25, %v5655_v0 }
 0x2e9   : > { %v5621_v42 = vpop.f32.mrf.mxu0  ;;  %6565 = vmatprep.subr.mxu1 %v8535_v60 }
 0x2ea   : > { %v5622_v37 = vadd.f32 %v5621_v42, %v5620_v38  ;;  %6566 = vmatpush3.msra.mxu1 %v8020_v5 }
 0x2eb   : > { %6567 = vmatprep.subr.mxu1 %v8535_v60 }
 0x2ec   : > { %v2602_v34 = vadd.f32 %v5657_v26, %v5622_v37  ;;  %6568 = vmatpush3.msra.mxu1 %v8026_v6  ;;  %v3671_v26 = vld [vmem:[#allocation16 + $0x340] sm:$0xff] }
 0x2ed   : > { %6569 = vmatprep.subr.mxu1 %v8535_v60  ;;  %v3703_v37 = vld [vmem:[#allocation16 + $0x440] sm:$0xff] }
 0x2ee   : > { %v2612_v41 = vadd.f32 %v8076_v19, %v2602_v34  ;;  %6570 = vmatpush3.msra.mxu1 %v8032_v7  ;;  %v3655_v34 = vld [vmem:[#allocation16 + $0x2c0] sm:$0xff] }
 0x2ef   : > { %6571 = vmatprep.subr.mxu1 %v8535_v60 }
 0x2f0   : > { %vm2613_vm11 = vcmp.gt.f32.partialorder %v2612_v41, 0.0  ;;  %v2614_v43 = vmul.f32 0.01, %v2612_v41  ;;  %6572 = vmatpush3.msra.mxu1 %v8038_v8 }
 0x2f1   : > { %6573 = vmatprep.subr.mxu1 %v8535_v60 }
 0x2f2   : > { %v2615_v44 = vsel %vm2613_vm11, %v2612_v41, %v2614_v43  ;;  %6574 = vmatpush3.msra.mxu1 %v8044_v9  ;;  %v3687_v41 = vld [vmem:[#allocation16 + $0x3c0] sm:$0xff]  ;;  %v3670_v43 = vld [vmem:[#allocation16 + $0x338] sm:$0xff] }
 0x2f3   : > { %2616 = vst [vmem:[#allocation3 + $0x20] sm:$0x1f] %v2615_v44  ;;  %6575 = vmatprep.subr.mxu1 %v8535_v60  ;;  %v3702_v44 = vld [vmem:[#allocation16 + $0x438] sm:$0xff] }
 0x2f4   : > { %6576 = vmatpush3.msra.mxu1 %v8050_v10 }
 0x2f5   : > { %6577 = vmatprep.subr.mxu1 %v8535_v60 }
 0x2f6   : > { %6578 = vmatpush3.msra.mxu1 %v8056_v11 }
 0x2f7   : > { %6579 = vmatprep.subr.mxu1 %v8535_v60 }
 0x2f8   : > { %6580 = vmatpush3.msra.mxu1 %v8062_v12 }
 0x2fa   : > { %v3265_v45 = vld [vmem:[#allocation3 + $0x20] sm:$0x1f] }
 0x2fb   : > { %6547 = vmatmul.mubr.f32.vlgmr.msra.gmra.mxu0 %v3265_v45  ;;  %v3654_v45 = vld [vmem:[#allocation16 + $0x2b8] sm:$0xff] }
 0x2fc   : > { %6585 = vmatpush3.msra.mxu0 %v7974_v59  ;;  %6616 = vmatprep.mubr.msk.f32.mxu0 %vm7224_vm0, %v8535_v60 }
 0x2fd   : > { %6586 = vmatprep.subr.mxu0 %v8535_v60 }
 0x2fe   : > { %6587 = vmatpush3.msra.mxu0 %v7978_v61 }
 0x2ff   : > { %6588 = vmatprep.subr.mxu0 %v8535_v60 }
 0x300   : > { %6589 = vmatpush3.msra.mxu0 %v7984_v62 }
 0x301   : > { %6590 = vmatprep.subr.mxu0 %v8535_v60 }
 0x302   : > { %6591 = vmatpush3.msra.mxu0 %v7990_v63 }
 0x303   : > { %6592 = vmatprep.subr.mxu0 %v8535_v60 }
 0x304   : > { %6593 = vmatpush3.msra.mxu0 %v7996_v1 }
 0x305   : > { %6594 = vmatprep.subr.mxu0 %v8535_v60 }
 0x306   : > { %6595 = vmatpush3.msra.mxu0 %v8002_v2 }
 0x307   : > { %v5725_v46 = vpop.f32.mrf.mxu1  ;;  %6596 = vmatprep.subr.mxu0 %v8535_v60 }
 0x308   : > { %6597 = vmatpush3.msra.mxu0 %v8008_v3 }
 0x309   : > { %v5690_v47 = vpop.f32.mrf.mxu0  ;;  %v5726_v48 = vpop.f32.mrf.mxu1  ;;  %6598 = vmatprep.subr.mxu0 %v8535_v60 }
 0x30a   : > { %6599 = vmatpush3.msra.mxu0 %v8014_v4  ;;  %v5727_v50 = vadd.f32 %v5726_v48, %v5725_v46  ;;  %v3686_v46 = vld [vmem:[#allocation16 + $0x3b8] sm:$0xff]  ;;  %v3701_v48 = vld [vmem:[#allocation16 + $0x430] sm:$0xff] }
 0x30b   : > { %v5691_v49 = vpop.f32.mrf.mxu0  ;;  %6600 = vmatprep.subr.mxu0 %v8535_v60 }
 0x30c   : > { %v5692_v51 = vadd.f32 %v5691_v49, %v5690_v47  ;;  %6601 = vmatpush3.msra.mxu0 %v8020_v5  ;;  %v3669_v47 = vld [vmem:[#allocation16 + $0x330] sm:$0xff] }
 0x30d   : > { %6602 = vmatprep.subr.mxu0 %v8535_v60  ;;  %v3653_v49 = vld [vmem:[#allocation16 + $0x2b0] sm:$0xff] }
 0x30e   : > { %v2828_v52 = vadd.f32 %v5727_v50, %v5692_v51  ;;  %6603 = vmatpush3.msra.mxu0 %v8026_v6  ;;  %v3678_v6 = vld [vmem:[#allocation16 + $0x378] sm:$0xff]  ;;  %v3685_v50 = vld [vmem:[#allocation16 + $0x3b0] sm:$0xff]  ;;  %v3668_v51 = vld [vmem:[#allocation16 + $0x328] sm:$0xff] }
 0x30f   : > { %6604 = vmatprep.subr.mxu0 %v8535_v60  ;;  %5883 = vmatprep.subr.mxu1 %v3678_v6  ;;  %v3696_v6 = vld [vmem:[#allocation16 + $0x408] sm:$0xff] }
 0x310   : > { %v2838_v53 = vadd.f32 %v8076_v19, %v2828_v52  ;;  %6605 = vmatpush3.msra.mxu0 %v8032_v7  ;;  %v3710_v7 = vld [vmem:[#allocation16 + $0x478] sm:$0xff]  ;;  %v3700_v52 = vld [vmem:[#allocation16 + $0x428] sm:$0xff] }
 0x311   : > { %6606 = vmatprep.subr.mxu0 %v8535_v60 }
 0x312   : > { %vm2839_vm12 = vcmp.gt.f32.partialorder %v2838_v53, 0.0  ;;  %v2840_v54 = vmul.f32 0.01, %v2838_v53  ;;  %6607 = vmatpush3.msra.mxu0 %v8038_v8  ;;  %v3662_v8 = vld [vmem:[#allocation16 + $0x2f8] sm:$0xff] }
 0x313   : > { %6608 = vmatprep.subr.mxu0 %v8535_v60 }
 0x314   : > { %v2841_v55 = vsel %vm2839_vm12, %v2838_v53, %v2840_v54  ;;  %6609 = vmatpush3.msra.mxu0 %v8044_v9  ;;  %v3694_v9 = vld [vmem:[#allocation16 + $0x3f8] sm:$0xff]  ;;  %v3652_v53 = vld [vmem:[#allocation16 + $0x2a8] sm:$0xff] }
 0x315   : > { %2842 = vst [vmem:[#allocation3 + $0x18] sm:$0x1f] %v2841_v55  ;;  %6610 = vmatprep.subr.mxu0 %v8535_v60  ;;  %v3684_v54 = vld [vmem:[#allocation16 + $0x3a8] sm:$0xff]  ;;  %v3667_v55 = vld [vmem:[#allocation16 + $0x320] sm:$0xff] }
 0x316   : > { %6611 = vmatpush3.msra.mxu0 %v8050_v10  ;;  %v3677_v10 = vld [vmem:[#allocation16 + $0x370] sm:$0xff] }
 0x317   : > { %6612 = vmatprep.subr.mxu0 %v8535_v60 }
 0x318   : > { %6613 = vmatpush3.msra.mxu0 %v8056_v11  ;;  %v3709_v11 = vld [vmem:[#allocation16 + $0x470] sm:$0xff] }
 0x319   : > { %6614 = vmatprep.subr.mxu0 %v8535_v60 }
 0x31a   : > { %6615 = vmatpush3.msra.mxu0 %v8062_v12  ;;  %v3661_v12 = vld [vmem:[#allocation16 + $0x2f0] sm:$0xff] }
 0x31b   : > { %5918 = vmatprep.subr.mxu0 %v3710_v7  ;;  %v3648_v7 = vld [vmem:[#allocation16 + $0x288] sm:$0xff] }
 0x31c   : > { %v3363_v56 = vld [vmem:[#allocation3 + $0x18] sm:$0x1f] }
 0x31d   : > { %6582 = vmatmul.mubr.f32.vlgmr.msra.gmra.mxu1 %v3363_v56  ;;  %v3699_v56 = vld [vmem:[#allocation16 + $0x420] sm:$0xff] }
 0x31e   : > { %5884 = vmatpush3.msra.mxu1 %v3662_v8  ;;  %v3680_v8 = vld [vmem:[#allocation16 + $0x388] sm:$0xff] }
 0x31f   : > { %5885 = vmatprep.subr.mxu1 %v3677_v10  ;;  %v3695_v10 = vld [vmem:[#allocation16 + $0x400] sm:$0xff] }
 0x320   : > { %5886 = vmatpush3.msra.mxu1 %v3661_v12  ;;  %v3679_v12 = vld [vmem:[#allocation16 + $0x380] sm:$0xff] }
 0x321   : > { %5887 = vmatprep.subr.mxu1 %v3676_v14 }
 0x322   : > { %5888 = vmatpush3.msra.mxu1 %v3660_v16 }
 0x323   : > { %5889 = vmatprep.subr.mxu1 %v3675_v18 }
 0x324   : > { %5890 = vmatpush3.msra.mxu1 %v3659_v20 }
 0x325   : > { %5891 = vmatprep.subr.mxu1 %v3674_v30 }
 0x326   : > { %5892 = vmatpush3.msra.mxu1 %v3658_v31 }
 0x327   : > { %5893 = vmatprep.subr.mxu1 %v3673_v40 }
 0x328   : > { %5894 = vmatpush3.msra.mxu1 %v3657_v33 }
 0x329   : > { %v5795_v57 = vpop.f32.mrf.mxu1  ;;  %5895 = vmatprep.subr.mxu1 %v3672_v27 }
 0x32a   : > { %v5760_v58 = vpop.f32.mrf.mxu0  ;;  %5896 = vmatpush3.msra.mxu1 %v3656_v23  ;;  %v3728_v23 = vlaneseq }
 0x32b   : > { %v5796_v59 = vpop.f32.mrf.mxu1  ;;  %5897 = vmatprep.subr.mxu1 %v3671_v26 }
 0x32c   : > { %v5761_v61 = vpop.f32.mrf.mxu0  ;;  %v5797_v62 = vadd.f32 %v5796_v59, %v5795_v57  ;;  %5898 = vmatpush3.msra.mxu1 %v3655_v34  ;;  %v3651_v57 = vld [vmem:[#allocation16 + $0x2a0] sm:$0xff]  ;;  %v3666_v59 = vld [vmem:[#allocation16 + $0x318] sm:$0xff] }
 0x32d   : > { %v5762_v63 = vadd.f32 %v5761_v61, %v5760_v58  ;;  %5899 = vmatprep.subr.mxu1 %v3670_v43  ;;  %v3683_v58 = vld [vmem:[#allocation16 + $0x3a0] sm:$0xff]  ;;  %v3698_v61 = vld [vmem:[#allocation16 + $0x418] sm:$0xff] }
 0x32e   : > { %5900 = vmatpush3.msra.mxu1 %v3654_v45 }
 0x32f   : > { %v3054_v1 = vadd.f32 %v5797_v62, %v5762_v63  ;;  %5901 = vmatprep.subr.mxu1 %v3669_v47  ;;  %v3650_v62 = vld [vmem:[#allocation16 + $0x298] sm:$0xff] }
 0x330   : > { %5902 = vmatpush3.msra.mxu1 %v3653_v49  ;;  %v3682_v63 = vld [vmem:[#allocation16 + $0x398] sm:$0xff] }
 0x331   : > { %v3064_v2 = vadd.f32 %v8076_v19, %v3054_v1  ;;  %v3707_v19 = vld [vmem:[#allocation16 + $0x460] sm:$0xff]  ;;  %5903 = vmatprep.subr.mxu1 %v3668_v51  ;;  %v3665_v1 = vld [vmem:[#allocation16 + $0x310] sm:$0xff] }
 0x332   : > { %5904 = vmatpush3.msra.mxu1 %v3652_v53 }
 0x333   : > { %vm3065_vm13 = vcmp.gt.f32.partialorder %v3064_v2, 0.0  ;;  %v3066_v3 = vmul.f32 0.01, %v3064_v2  ;;  %5905 = vmatprep.subr.mxu1 %v3667_v55  ;;  %v3726_v55 = vld [vmem:[#allocation16 + $0x4f8] sm:$0xff] }
 0x334   : > { %5906 = vmatpush3.msra.mxu1 %v3651_v57 }
 0x335   : > { %v3067_v4 = vsel %vm3065_vm13, %v3064_v2, %v3066_v3  ;;  %v3697_v2 = vld [vmem:[#allocation16 + $0x410] sm:$0xff]  ;;  %5907 = vmatprep.subr.mxu1 %v3666_v59 }
 0x336   : > { %3068 = vst [vmem:[#allocation3 + $0x10] sm:$0x1f] %v3067_v4  ;;  %v3649_v3 = vld [vmem:[#allocation16 + $0x290] sm:$0xff]  ;;  %5908 = vmatpush3.msra.mxu1 %v3650_v62 }
 0x337   : > { %v3681_v4 = vld [vmem:[#allocation16 + $0x390] sm:$0xff]  ;;  %5909 = vmatprep.subr.mxu1 %v3665_v1 }
 0x338   : > { %5910 = vmatpush3.msra.mxu1 %v3649_v3  ;;  %v3576_v1 = vld [vmem:[#allocation16 + $0x70] sm:$0xff]  ;;  %v3591_v3 = vld [vmem:[#allocation16 + $0xe8] sm:$0xff] }
 0x33d   : > { %v3461_v5 = vld [vmem:[#allocation3 + $0x10] sm:$0x1f] }
 0x33e   : > { %6617 = vmatmul.mubr.f32.vlgmr.msra.gmra.mxu0 %v3461_v5  ;;  %v3664_v5 = vld [vmem:[#allocation16 + $0x308] sm:$0xff] }
 0x33f   : > { %5919 = vmatpush3.msra.mxu0 %v3694_v9  ;;  %v3663_v9 = vld [vmem:[#allocation16 + $0x300] sm:$0xff]  ;;  %5911 = vmatprep.subr.mxu1 %v3664_v5 }
 0x340   : > { %5920 = vmatprep.subr.mxu0 %v3709_v11  ;;  %v3647_v11 = vld [vmem:[#allocation16 + $0x280] sm:$0xff]  ;;  %5912 = vmatpush3.msra.mxu1 %v3648_v7 }
 0x341   : > { %5921 = vmatpush3.msra.mxu0 %v3693_v13  ;;  %5913 = vmatprep.subr.mxu1 %v3663_v9  ;;  %v3593_v13 = vld [vmem:[#allocation16 + $0xf8] sm:$0xff] }
 0x342   : > { %5922 = vmatprep.subr.mxu0 %v3708_v15  ;;  %5914 = vmatpush3.msra.mxu1 %v3647_v11  ;;  %v3723_v11 = vld [vmem:[#allocation16 + $0x4e0] sm:$0xff] }
 0x343   : > { %5923 = vmatpush3.msra.mxu0 %v3692_v17  ;;  %6619 = vmatprep.subr.mxu1 %v8535_v60 }
 0x344   : > { %5924 = vmatprep.subr.mxu0 %v3707_v19 }
 0x345   : > { %5925 = vmatpush3.msra.mxu0 %v3691_v21 }
 0x346   : > { %5926 = vmatprep.subr.mxu0 %v3706_v29 }
 0x347   : > { %5927 = vmatpush3.msra.mxu0 %v3690_v35 }
 0x348   : > { %5928 = vmatprep.subr.mxu0 %v3705_v28 }
 0x349   : > { %5929 = vmatpush3.msra.mxu0 %v3689_v32 }
 0x34a   : > { %5930 = vmatprep.subr.mxu0 %v3704_v24 }
 0x34b   : > { %5931 = vmatpush3.msra.mxu0 %v3688_v39 }
 0x34c   : > { %5932 = vmatprep.subr.mxu0 %v3703_v37 }
 0x34d   : > { %5933 = vmatpush3.msra.mxu0 %v3687_v41 }
 0x34e   : > { %5934 = vmatprep.subr.mxu0 %v3702_v44 }
 0x34f   : > { %5935 = vmatpush3.msra.mxu0 %v3686_v46 }
 0x350   : > { %5936 = vmatprep.subr.mxu0 %v3701_v48 }
 0x351   : > { %5937 = vmatpush3.msra.mxu0 %v3685_v50 }
 0x352   : > { %5938 = vmatprep.subr.mxu0 %v3700_v52 }
 0x353   : > { %5939 = vmatpush3.msra.mxu0 %v3684_v54 }
 0x354   : > { %5940 = vmatprep.subr.mxu0 %v3699_v56  ;;  %v3577_v56 = vld [vmem:[#allocation16 + $0x78] sm:$0xff] }
 0x355   : > { %5941 = vmatpush3.msra.mxu0 %v3683_v58  ;;  %v3592_v58 = vld [vmem:[#allocation16 + $0xf0] sm:$0xff] }
 0x356   : > { %5942 = vmatprep.subr.mxu0 %v3698_v61  ;;  %v3725_v61 = vld [vmem:[#allocation16 + $0x4f0] sm:$0xff] }
 0x357   : > { %5943 = vmatpush3.msra.mxu0 %v3682_v63 }
 0x358   : > { %5944 = vmatprep.subr.mxu0 %v3697_v2 }
 0x359   : > { %5945 = vmatpush3.msra.mxu0 %v3681_v4  ;;  %v3724_v4 = vld [vmem:[#allocation16 + $0x4e8] sm:$0xff] }
 0x35a   : > { %5946 = vmatprep.subr.mxu0 %v3696_v6 }
 0x35b   : > { %5947 = vmatpush3.msra.mxu0 %v3680_v8  ;;  %v3575_v8 = vld [vmem:[#allocation16 + $0x68] sm:$0xff] }
 0x35c   : > { %5948 = vmatprep.subr.mxu0 %v3695_v10  ;;  %v3590_v10 = vld [vmem:[#allocation16 + $0xe0] sm:$0xff] }
 0x35d   : > { %5949 = vmatpush3.msra.mxu0 %v3679_v12  ;;  %v3574_v12 = vld [vmem:[#allocation16 + $0x60] sm:$0xff] }
 0x35e   : > { %5970 = vmatprep.subr.mxu0 %v3593_v13  ;;  %v3589_v13 = vld [vmem:[#allocation16 + $0xd8] sm:$0xff] }
 0x378   : > { %v3159_v22 = vpop.f32.mrf.mxu0 }
 0x379   : > { %v3160_v0 = vadd.f32 %v8183_v36, %v3159_v22 }
 0x37a   : > { %v6478_v38 = vpop.f32.mrf.mxu0 }
 0x37b   : > { %vm3163_vm14 = vcmp.gt.f32.partialorder %v3160_v0, 0.0  ;;  %v3164_v25 = vmul.f32 0.01, %v3160_v0 }
 0x37d   : > { %v3165_v42 = vsel %vm3163_vm14, %v3160_v0, %v3164_v25  ;;  %v3729_v0 = vshrl.u32 %v3728_v23, 7  ;;  %v3583_v23 = vld [vmem:[#allocation16 + $0xa8] sm:$0xff] }
 0x37e   : > { %3166 = vst [vmem:[#allocation4] sm:$0x1f] %v3165_v42 }
 0x37f   : > { %v8191_v38 = vsub.s32 1, %v3729_v0  ;;  %v8193_v42 = vsub.s32 3, %v3729_v0  ;;  %v8195_v26 = vsub.s32 0, %v3729_v0  ;;  %v8197_v37 = vsub.s32 2, %v3729_v0 }
 0x380   : > { %v8203_v48 = vsub.s32 4, %v3729_v0  ;;  %v3582_v0 = vld [vmem:[#allocation16 + $0xa0] sm:$0xff] }
 0x399   : > { %v3257_v14 = vpop.f32.mrf.mxu1 }
 0x39a   : > { %v3258_v15 = vadd.f32 %v8183_v36, %v3257_v14  ;;  %v3722_v14 = vld [vmem:[#allocation16 + $0x4d8] sm:$0xff] }
 0x39b   : > { %v6513_v16 = vpop.f32.mrf.mxu1 }
 0x39c   : > { %vm3261_vm15 = vcmp.gt.f32.partialorder %v3258_v15, 0.0  ;;  %v3262_v17 = vmul.f32 0.01, %v3258_v15  ;;  %v3573_v16 = vld [vmem:[#allocation16 + $0x58] sm:$0xff] }
 0x39e   : > { %v3263_v18 = vsel %vm3261_vm15, %v3258_v15, %v3262_v17  ;;  %v3588_v17 = vld [vmem:[#allocation16 + $0xd0] sm:$0xff] }
 0x39f   : > { %3264 = vst [vmem:[#allocation4 + $0x8] sm:$0x1f] %v3263_v18  ;;  %v3721_v18 = vld [vmem:[#allocation16 + $0x4d0] sm:$0xff] }
 0x3bb   : > { %v3355_v19 = vpop.f32.mrf.mxu0 }
 0x3bc   : > { %v3356_v20 = vadd.f32 %v8183_v36, %v3355_v19  ;;  %v3572_v19 = vld [vmem:[#allocation16 + $0x50] sm:$0xff] }
 0x3bd   : > { %v6548_v21 = vpop.f32.mrf.mxu0 }
 0x3be   : > { %vm3359_vm1 = vcmp.gt.f32.partialorder %v3356_v20, 0.0  ;;  %v3360_v30 = vmul.f32 0.01, %v3356_v20  ;;  %v3720_v21 = vld [vmem:[#allocation16 + $0x4c8] sm:$0xff] }
 0x3c0   : > { %v3361_v29 = vsel %vm3359_vm1, %v3356_v20, %v3360_v30  ;;  %v3587_v20 = vld [vmem:[#allocation16 + $0xc8] sm:$0xff] }
 0x3c1   : > { %3362 = vst [vmem:[#allocation4 + $0x10] sm:$0x1f] %v3361_v29  ;;  %v3571_v30 = vld [vmem:[#allocation16 + $0x48] sm:$0xff]  ;;  %v3586_v29 = vld [vmem:[#allocation16 + $0xc0] sm:$0xff] }
 0x3dd   : > { %v3453_v31 = vpop.f32.mrf.mxu1 }
 0x3de   : > { %v3454_v35 = vadd.f32 %v8183_v36, %v3453_v31  ;;  %v3719_v31 = vld [vmem:[#allocation16 + $0x4c0] sm:$0xff] }
 0x3df   : > { %v6583_v40 = vpop.f32.mrf.mxu1 }
 0x3e0   : > { %vm3457_vm2 = vcmp.gt.f32.partialorder %v3454_v35, 0.0  ;;  %v3458_v28 = vmul.f32 0.01, %v3454_v35  ;;  %v3585_v40 = vld [vmem:[#allocation16 + $0xb8] sm:$0xff] }
 0x3e2   : > { %v3459_v33 = vsel %vm3457_vm2, %v3454_v35, %v3458_v28  ;;  %v3570_v35 = vld [vmem:[#allocation16 + $0x40] sm:$0xff]  ;;  %v3718_v28 = vld [vmem:[#allocation16 + $0x4b8] sm:$0xff] }
 0x3e3   : > { %3460 = vst [vmem:[#allocation4 + $0x18] sm:$0x1f] %v3459_v33  ;;  %v3569_v33 = vld [vmem:[#allocation16 + $0x38] sm:$0xff] }
 0x3ea   : > { %v3643_v25 = vld [vmem:[#allocation4 + $0x1] ss:$8 sm:$0xf]  ;;  %v3559_v34 = vld [vmem:[#allocation4] ss:$8 sm:$0xf] }
 0x3eb   : > { %v4200_v41 = vld [vmem:[#allocation4 + $0x2] ss:$8 sm:$0xf]  ;;  %v4522_v54 = vld [vmem:[#allocation4 + $0x3] ss:$8 sm:$0xf] }
 0x3ec   : > { %v4844_v7 = vld [vmem:[#allocation4 + $0x4] ss:$8 sm:$0xf] }
 0x3fe   : > { %v3551_v32 = vpop.f32.mrf.mxu0 }
 0x3ff   : > { %v3552_v27 = vadd.f32 %v8183_v36, %v3551_v32  ;;  %v3584_v32 = vld [vmem:[#allocation16 + $0xb0] sm:$0xff] }
 0x400   : > { %v6618_v24 = vpop.f32.mrf.mxu0 }
 0x401   : > { %vm3555_vm3 = vcmp.gt.f32.partialorder %v3552_v27, 0.0  ;;  %v3556_v39 = vmul.f32 0.01, %v3552_v27  ;;  %v3568_v24 = vld [vmem:[#allocation16 + $0x30] sm:$0xff] }
 0x403   : > { %v3557_v22 = vsel %vm3555_vm3, %v3552_v27, %v3556_v39  ;;  %v3717_v27 = vld [vmem:[#allocation16 + $0x4b0] sm:$0xff]  ;;  %v3716_v39 = vld [vmem:[#allocation16 + $0x4a8] sm:$0xff] }
 0x404   : > { %3558 = vst [vmem:[#allocation4 + $0x20] sm:$0x1f] %v3557_v22  ;;  %v3567_v22 = vld [vmem:[#allocation16 + $0x28] sm:$0xff] }
 0x40b   : > { %v3644_v43 = vld [vmem:[#allocation4 + $0x1] ss:$8 sm:$0x10]  ;;  %v3560_v36 = vld [vmem:[#allocation4] ss:$8 sm:$0x10] }
 0x40c   : > { %v8199_v44 = vor.u32 %v3644_v43, %v3643_v25  ;;  %v8201_v45 = vor.u32 %v3560_v36, %v3559_v34  ;;  %v4201_v46 = vld [vmem:[#allocation4 + $0x2] ss:$8 sm:$0x10]  ;;  %v4523_v47 = vld [vmem:[#allocation4 + $0x3] ss:$8 sm:$0x10] }
 0x40d   : > { %v8205_v49 = vor.u32 %v4201_v46, %v4200_v41  ;;  %v8215_v57 = vor.u32 %v4523_v47, %v4522_v54  ;;  %v4845_v62 = vld [vmem:[#allocation4 + $0x4] ss:$8 sm:$0x10]  ;;  %v3581_v41 = vld [vmem:[#allocation16 + $0x98] sm:$0xff]  ;;  %v3580_v46 = vld [vmem:[#allocation16 + $0x90] sm:$0xff] }
 0x40e   : > { %v3735_v50 = vrot.slane %v8199_v44, %v8191_v38  ;;  %v3743_v51 = vrot.slane %v8199_v44, %v8193_v42  ;;  %v3731_v52 = vrot.slane %v8199_v44, %v8195_v26  ;;  %v3739_v53 = vrot.slane %v8199_v44, %v8197_v37  ;;  %v3715_v25 = vld [vmem:[#allocation16 + $0x4a0] sm:$0xff]  ;;  %v3714_v43 = vld [vmem:[#allocation16 + $0x498] sm:$0xff]  ;;  %v3713_v47 = vld [vmem:[#allocation16 + $0x490] sm:$0xff] }
 0x40f   : > { %v3975_v59 = vrot.slane %v8201_v45, %v8197_v37  ;;  %v3971_v63 = vrot.slane %v8201_v45, %v8191_v38  ;;  %v4304_v2 = vrot.slane %v8205_v49, %v8203_v48  ;;  %v4618_v5 = vrot.slane %v8215_v57, %v8197_v37  ;;  %v3566_v34 = vld [vmem:[#allocation16 + $0x20] sm:$0xff]  ;;  %v3565_v36 = vld [vmem:[#allocation16 + $0x18] sm:$0xff] }
 0x410   : > { %3817 = vmatprep.mubr.f32.mxu1 %v3735_v50  ;;  %3887 = vmatprep.mubr.f32.mxu0 %v3743_v51  ;;  %v4626_v6 = vrot.slane %v8215_v57, %v8203_v48  ;;  %v8228_v9 = vor.u32 %v4845_v62, %v4844_v7  ;;  %v3564_v50 = vld [vmem:[#allocation16 + $0x10] sm:$0xff]  ;;  %v3579_v51 = vld [vmem:[#allocation16 + $0x88] sm:$0xff]  ;;  %v3578_v54 = vld [vmem:[#allocation16 + $0x80] sm:$0xff] }
 0x411   : > { %3818 = vmatmul.mubr.f32.vlgmr.msra.gmra.mxu1 %v3731_v52  ;;  %3888 = vmatmul.mubr.f32.vlgmr.msra.gmra.mxu0 %v3739_v53  ;;  %v3712_v52 = vld [vmem:[#allocation16 + $0x488] sm:$0xff]  ;;  %v3625_v62 = vld [vmem:[#allocation16 + $0x1f8] sm:$0xff]  ;;  %v3640_v7 = vld [vmem:[#allocation16 + $0x270] sm:$0xff] }
 0x412   : > { %6620 = vmatpush3.msra.mxu1 %v3726_v55  ;;  %5971 = vmatpush3.msra.mxu0 %v3577_v56  ;;  %v4948_v15 = vrot.slane %v8228_v9, %v8203_v48  ;;  %v3563_v53 = vld [vmem:[#allocation16 + $0x8] sm:$0xff]  ;;  %v3711_v55 = vld [vmem:[#allocation16 + $0x480] sm:$0xff] }
 0x413   : > { %6621 = vmatprep.subr.mxu1 %v8535_v60  ;;  %5972 = vmatprep.subr.mxu0 %v3592_v58  ;;  %v3562_v56 = vld [vmem:[#allocation16] sm:$0xff]  ;;  %v3747_v58 = vrot.slane %v8199_v44, %v8203_v48  ;;  %v3608_v44 = vld [vmem:[#allocation16 + $0x170] sm:$0xff] }
 0x414   : > { %4053 = vmatprep.mubr.f32.mxu0 %v3971_v63  ;;  %6622 = vmatpush3.msra.mxu1 %v3725_v61  ;;  %v3967_v61 = vrot.slane %v8201_v45, %v8195_v26  ;;  %v3609_v63 = vld [vmem:[#allocation16 + $0x178] sm:$0xff] }
 0x415   : > { %5973 = vmatpush3.msra.mxu0 %v3576_v1  ;;  %6623 = vmatprep.subr.mxu1 %v8535_v60  ;;  %v3979_v1 = vrot.slane %v8201_v45, %v8193_v42 }
 0x416   : > { %5974 = vmatprep.subr.mxu0 %v3591_v3  ;;  %6624 = vmatpush3.msra.mxu1 %v3724_v4  ;;  %v3641_v3 = vld [vmem:[#allocation16 + $0x278] sm:$0xff]  ;;  %v3624_v4 = vld [vmem:[#allocation16 + $0x1f0] sm:$0xff] }
 0x417   : > { %5975 = vmatpush3.msra.mxu0 %v3575_v8  ;;  %6625 = vmatprep.subr.mxu1 %v8535_v60  ;;  %v3623_v8 = vld [vmem:[#allocation16 + $0x1e8] sm:$0xff] }
 0x418   : > { %5976 = vmatprep.subr.mxu0 %v3590_v10  ;;  %6626 = vmatpush3.msra.mxu1 %v3723_v11  ;;  %v3607_v10 = vld [vmem:[#allocation16 + $0x168] sm:$0xff] }
 0x419   : > { %5977 = vmatpush3.msra.mxu0 %v3574_v12  ;;  %6627 = vmatprep.subr.mxu1 %v8535_v60  ;;  %v3639_v11 = vld [vmem:[#allocation16 + $0x268] sm:$0xff]  ;;  %v3622_v12 = vld [vmem:[#allocation16 + $0x1e0] sm:$0xff] }
 0x41a   : > { %5978 = vmatprep.subr.mxu0 %v3589_v13  ;;  %6628 = vmatpush3.msra.mxu1 %v3722_v14  ;;  %v3606_v13 = vld [vmem:[#allocation16 + $0x160] sm:$0xff] }
 0x41b   : > { %5979 = vmatpush3.msra.mxu0 %v3573_v16  ;;  %6629 = vmatprep.subr.mxu1 %v8535_v60  ;;  %v3638_v14 = vld [vmem:[#allocation16 + $0x260] sm:$0xff]  ;;  %v3621_v16 = vld [vmem:[#allocation16 + $0x1d8] sm:$0xff] }
 0x41c   : > { %5980 = vmatprep.subr.mxu0 %v3588_v17  ;;  %6630 = vmatpush3.msra.mxu1 %v3721_v18  ;;  %v3605_v17 = vld [vmem:[#allocation16 + $0x158] sm:$0xff] }
 0x41d   : > { %5981 = vmatpush3.msra.mxu0 %v3572_v19  ;;  %6631 = vmatprep.subr.mxu1 %v8535_v60  ;;  %v3637_v18 = vld [vmem:[#allocation16 + $0x258] sm:$0xff]  ;;  %v3620_v19 = vld [vmem:[#allocation16 + $0x1d0] sm:$0xff] }
 0x41e   : > { %5982 = vmatprep.subr.mxu0 %v3587_v20  ;;  %6632 = vmatpush3.msra.mxu1 %v3720_v21  ;;  %v3604_v20 = vld [vmem:[#allocation16 + $0x150] sm:$0xff] }
 0x41f   : > { %5983 = vmatpush3.msra.mxu0 %v3571_v30  ;;  %6633 = vmatprep.subr.mxu1 %v8535_v60  ;;  %v3636_v21 = vld [vmem:[#allocation16 + $0x250] sm:$0xff]  ;;  %v3619_v30 = vld [vmem:[#allocation16 + $0x1c8] sm:$0xff] }
 0x420   : > { %5984 = vmatprep.subr.mxu0 %v3586_v29  ;;  %6634 = vmatpush3.msra.mxu1 %v3719_v31  ;;  %v3603_v29 = vld [vmem:[#allocation16 + $0x148] sm:$0xff] }
 0x421   : > { %5985 = vmatpush3.msra.mxu0 %v3570_v35  ;;  %6635 = vmatprep.subr.mxu1 %v8535_v60  ;;  %v3635_v31 = vld [vmem:[#allocation16 + $0x248] sm:$0xff]  ;;  %v3618_v35 = vld [vmem:[#allocation16 + $0x1c0] sm:$0xff] }
 0x422   : > { %5986 = vmatprep.subr.mxu0 %v3585_v40  ;;  %6636 = vmatpush3.msra.mxu1 %v3718_v28  ;;  %v3602_v40 = vld [vmem:[#allocation16 + $0x140] sm:$0xff] }
 0x423   : > { %5987 = vmatpush3.msra.mxu0 %v3569_v33  ;;  %6637 = vmatprep.subr.mxu1 %v8535_v60  ;;  %v3634_v28 = vld [vmem:[#allocation16 + $0x240] sm:$0xff]  ;;  %v3617_v33 = vld [vmem:[#allocation16 + $0x1b8] sm:$0xff] }
 0x424   : > { %5988 = vmatprep.subr.mxu0 %v3584_v32  ;;  %6638 = vmatpush3.msra.mxu1 %v3717_v27  ;;  %v3601_v32 = vld [vmem:[#allocation16 + $0x138] sm:$0xff] }
 0x425   : > { %5989 = vmatpush3.msra.mxu0 %v3568_v24  ;;  %6639 = vmatprep.subr.mxu1 %v8535_v60  ;;  %v3633_v27 = vld [vmem:[#allocation16 + $0x238] sm:$0xff]  ;;  %v3616_v24 = vld [vmem:[#allocation16 + $0x1b0] sm:$0xff] }
 0x426   : > { %5990 = vmatprep.subr.mxu0 %v3583_v23  ;;  %6640 = vmatpush3.msra.mxu1 %v3716_v39  ;;  %v3600_v23 = vld [vmem:[#allocation16 + $0x130] sm:$0xff] }
 0x427   : > { %5991 = vmatpush3.msra.mxu0 %v3567_v22  ;;  %6641 = vmatprep.subr.mxu1 %v8535_v60  ;;  %v3632_v39 = vld [vmem:[#allocation16 + $0x230] sm:$0xff]  ;;  %v3615_v22 = vld [vmem:[#allocation16 + $0x1a8] sm:$0xff] }
 0x428   : > { %5992 = vmatprep.subr.mxu0 %v3582_v0  ;;  %6642 = vmatpush3.msra.mxu1 %v3715_v25  ;;  %v3599_v0 = vld [vmem:[#allocation16 + $0x128] sm:$0xff] }
 0x429   : > { %5993 = vmatpush3.msra.mxu0 %v3566_v34  ;;  %6643 = vmatprep.subr.mxu1 %v8535_v60  ;;  %v3631_v25 = vld [vmem:[#allocation16 + $0x228] sm:$0xff]  ;;  %v3614_v34 = vld [vmem:[#allocation16 + $0x1a0] sm:$0xff] }
 0x42a   : > { %5994 = vmatprep.subr.mxu0 %v3581_v41  ;;  %6644 = vmatpush3.msra.mxu1 %v3714_v43  ;;  %v3598_v41 = vld [vmem:[#allocation16 + $0x120] sm:$0xff] }
 0x42b   : > { %5995 = vmatpush3.msra.mxu0 %v3565_v36  ;;  %6645 = vmatprep.subr.mxu1 %v8535_v60  ;;  %v3630_v43 = vld [vmem:[#allocation16 + $0x220] sm:$0xff]  ;;  %v3613_v36 = vld [vmem:[#allocation16 + $0x198] sm:$0xff] }
 0x42c   : > { %5996 = vmatprep.subr.mxu0 %v3580_v46  ;;  %6646 = vmatpush3.msra.mxu1 %v3713_v47  ;;  %v3597_v46 = vld [vmem:[#allocation16 + $0x118] sm:$0xff] }
 0x42d   : > { %5997 = vmatpush3.msra.mxu0 %v3564_v50  ;;  %6647 = vmatprep.subr.mxu1 %v8535_v60  ;;  %v3629_v47 = vld [vmem:[#allocation16 + $0x218] sm:$0xff]  ;;  %v3612_v50 = vld [vmem:[#allocation16 + $0x190] sm:$0xff] }
 0x42e   : > { %5998 = vmatprep.subr.mxu0 %v3579_v51  ;;  %6648 = vmatpush3.msra.mxu1 %v3712_v52  ;;  %v3596_v51 = vld [vmem:[#allocation16 + $0x110] sm:$0xff] }
 0x42f   : > { %5999 = vmatpush3.msra.mxu0 %v3563_v53  ;;  %6649 = vmatprep.subr.mxu1 %v8535_v60  ;;  %v3628_v52 = vld [vmem:[#allocation16 + $0x210] sm:$0xff]  ;;  %v3611_v53 = vld [vmem:[#allocation16 + $0x188] sm:$0xff] }
 0x430   : > { %6000 = vmatprep.subr.mxu0 %v3578_v54  ;;  %6650 = vmatpush3.msra.mxu1 %v3711_v55  ;;  %v3595_v54 = vld [vmem:[#allocation16 + $0x108] sm:$0xff] }
 0x431   : > { %6651 = vmatprep.mubr.msk.f32.mxu1 %vm7224_vm0, %v8535_v60  ;;  %6001 = vmatpush3.msra.mxu0 %v3562_v56  ;;  %v3627_v55 = vld [vmem:[#allocation16 + $0x208] sm:$0xff]  ;;  %v3610_v56 = vld [vmem:[#allocation16 + $0x180] sm:$0xff] }
 0x432   : > { %6652 = vmatmul.mubr.f32.vlgmr.msra.gmra.mxu1 %v3747_v58  ;;  %4054 = vmatmul.mubr.f32.vlgmr.msra.gmra.mxu0 %v3967_v61  ;;  %v3594_v58 = vld [vmem:[#allocation16 + $0x100] sm:$0xff] }
 0x433   : > { %6005 = vmatprep.subr.mxu1 %v3625_v62  ;;  %6654 = vmatprep.subr.mxu0 %v8535_v60  ;;  %v3626_v61 = vld [vmem:[#allocation16 + $0x200] sm:$0xff]  ;;  %v3983_v62 = vrot.slane %v8201_v45, %v8203_v48  ;;  %v4233_v45 = vld [vmem:[#allocation16 + $0x5e8] sm:$0xff] }
 0x434   : > { %6006 = vmatpush3.msra.mxu1 %v3609_v63  ;;  %4123 = vmatprep.mubr.f32.mxu1 %v3979_v1  ;;  %v4235_v63 = vld [vmem:[#allocation16 + $0x5f8] sm:$0xff] }
 0x435   : > { %6655 = vmatpush3.msra.mxu0 %v3641_v3  ;;  %6007 = vmatprep.subr.mxu1 %v3624_v4  ;;  %v4267_v1 = vld [vmem:[#allocation16 + $0x6f8] sm:$0xff]  ;;  %v4292_v4 = vrot.slane %v8205_v49, %v8191_v38 }
 0x436   : > { %6656 = vmatprep.subr.mxu0 %v8535_v60  ;;  %6008 = vmatpush3.msra.mxu1 %v3608_v44  ;;  %v4219_v3 = vld [vmem:[#allocation16 + $0x578] sm:$0xff] }
 0x437   : > { %6657 = vmatpush3.msra.mxu0 %v3640_v7  ;;  %6009 = vmatprep.subr.mxu1 %v3623_v8  ;;  %v4251_v44 = vld [vmem:[#allocation16 + $0x678] sm:$0xff]  ;;  %v4300_v7 = vrot.slane %v8205_v49, %v8193_v42  ;;  %v4234_v8 = vld [vmem:[#allocation16 + $0x5f0] sm:$0xff] }
 0x438   : > { %6658 = vmatprep.subr.mxu0 %v8535_v60  ;;  %6010 = vmatpush3.msra.mxu1 %v3607_v10  ;;  %v4266_v10 = vld [vmem:[#allocation16 + $0x6f0] sm:$0xff] }
 0x439   : > { %6659 = vmatpush3.msra.mxu0 %v3639_v11  ;;  %6011 = vmatprep.subr.mxu1 %v3622_v12  ;;  %v4218_v11 = vld [vmem:[#allocation16 + $0x570] sm:$0xff] }
 0x43a   : > { %6660 = vmatprep.subr.mxu0 %v8535_v60  ;;  %6012 = vmatpush3.msra.mxu1 %v3606_v13  ;;  %v4250_v12 = vld [vmem:[#allocation16 + $0x670] sm:$0xff]  ;;  %v4217_v13 = vld [vmem:[#allocation16 + $0x568] sm:$0xff] }
 0x43b   : > { %6661 = vmatpush3.msra.mxu0 %v3638_v14  ;;  %6013 = vmatprep.subr.mxu1 %v3621_v16  ;;  %v4249_v14 = vld [vmem:[#allocation16 + $0x668] sm:$0xff]  ;;  %v4232_v16 = vld [vmem:[#allocation16 + $0x5e0] sm:$0xff] }
 0x43c   : > { %6662 = vmatprep.subr.mxu0 %v8535_v60  ;;  %6014 = vmatpush3.msra.mxu1 %v3605_v17  ;;  %v4264_v17 = vld [vmem:[#allocation16 + $0x6e0] sm:$0xff] }
 0x43d   : > { %6663 = vmatpush3.msra.mxu0 %v3637_v18  ;;  %6015 = vmatprep.subr.mxu1 %v3620_v19  ;;  %v4216_v18 = vld [vmem:[#allocation16 + $0x560] sm:$0xff] }
 0x43e   : > { %6664 = vmatprep.subr.mxu0 %v8535_v60  ;;  %6016 = vmatpush3.msra.mxu1 %v3604_v20  ;;  %v4248_v19 = vld [vmem:[#allocation16 + $0x660] sm:$0xff]  ;;  %v4231_v20 = vld [vmem:[#allocation16 + $0x5d8] sm:$0xff] }
 0x43f   : > { %6665 = vmatpush3.msra.mxu0 %v3636_v21  ;;  %6017 = vmatprep.subr.mxu1 %v3619_v30  ;;  %v4263_v21 = vld [vmem:[#allocation16 + $0x6d8] sm:$0xff] }
 0x440   : > { %6666 = vmatprep.subr.mxu0 %v8535_v60  ;;  %6018 = vmatpush3.msra.mxu1 %v3603_v29  ;;  %v4215_v30 = vld [vmem:[#allocation16 + $0x558] sm:$0xff] }
 0x441   : > { %6667 = vmatpush3.msra.mxu0 %v3635_v31  ;;  %6019 = vmatprep.subr.mxu1 %v3618_v35  ;;  %v4247_v29 = vld [vmem:[#allocation16 + $0x658] sm:$0xff]  ;;  %v4230_v31 = vld [vmem:[#allocation16 + $0x5d0] sm:$0xff] }
 0x442   : > { %6668 = vmatprep.subr.mxu0 %v8535_v60  ;;  %6020 = vmatpush3.msra.mxu1 %v3602_v40  ;;  %v4262_v35 = vld [vmem:[#allocation16 + $0x6d0] sm:$0xff] }
 0x443   : > { %6669 = vmatpush3.msra.mxu0 %v3634_v28  ;;  %6021 = vmatprep.subr.mxu1 %v3617_v33  ;;  %v4214_v40 = vld [vmem:[#allocation16 + $0x550] sm:$0xff]  ;;  %v4229_v33 = vld [vmem:[#allocation16 + $0x5c8] sm:$0xff] }
 0x444   : > { %6670 = vmatprep.subr.mxu0 %v8535_v60  ;;  %6022 = vmatpush3.msra.mxu1 %v3601_v32  ;;  %v4246_v28 = vld [vmem:[#allocation16 + $0x650] sm:$0xff]  ;;  %v4261_v32 = vld [vmem:[#allocation16 + $0x6c8] sm:$0xff] }
 0x445   : > { %6671 = vmatpush3.msra.mxu0 %v3633_v27  ;;  %6023 = vmatprep.subr.mxu1 %v3616_v24  ;;  %v4213_v27 = vld [vmem:[#allocation16 + $0x548] sm:$0xff] }
 0x446   : > { %6672 = vmatprep.subr.mxu0 %v8535_v60  ;;  %6024 = vmatpush3.msra.mxu1 %v3600_v23  ;;  %v4245_v24 = vld [vmem:[#allocation16 + $0x648] sm:$0xff]  ;;  %v4228_v23 = vld [vmem:[#allocation16 + $0x5c0] sm:$0xff] }
 0x447   : > { %6673 = vmatpush3.msra.mxu0 %v3632_v39  ;;  %6025 = vmatprep.subr.mxu1 %v3615_v22  ;;  %v4260_v39 = vld [vmem:[#allocation16 + $0x6c0] sm:$0xff] }
 0x448   : > { %6674 = vmatprep.subr.mxu0 %v8535_v60  ;;  %6026 = vmatpush3.msra.mxu1 %v3599_v0  ;;  %v4212_v22 = vld [vmem:[#allocation16 + $0x540] sm:$0xff] }
 0x449   : > { %6675 = vmatpush3.msra.mxu0 %v3631_v25  ;;  %6027 = vmatprep.subr.mxu1 %v3614_v34  ;;  %v4244_v0 = vld [vmem:[#allocation16 + $0x640] sm:$0xff]  ;;  %v4227_v25 = vld [vmem:[#allocation16 + $0x5b8] sm:$0xff] }
 0x44a   : > { %6676 = vmatprep.subr.mxu0 %v8535_v60  ;;  %6028 = vmatpush3.msra.mxu1 %v3598_v41  ;;  %v4259_v34 = vld [vmem:[#allocation16 + $0x6b8] sm:$0xff] }
 0x44b   : > { %6677 = vmatpush3.msra.mxu0 %v3630_v43  ;;  %6029 = vmatprep.subr.mxu1 %v3613_v36  ;;  %v4211_v41 = vld [vmem:[#allocation16 + $0x538] sm:$0xff]  ;;  %v4226_v36 = vld [vmem:[#allocation16 + $0x5b0] sm:$0xff] }
 0x44c   : > { %6678 = vmatprep.subr.mxu0 %v8535_v60  ;;  %6030 = vmatpush3.msra.mxu1 %v3597_v46  ;;  %v4243_v43 = vld [vmem:[#allocation16 + $0x638] sm:$0xff]  ;;  %v4258_v46 = vld [vmem:[#allocation16 + $0x6b0] sm:$0xff] }
 0x44d   : > { %6679 = vmatpush3.msra.mxu0 %v3629_v47  ;;  %6031 = vmatprep.subr.mxu1 %v3612_v50  ;;  %v4210_v47 = vld [vmem:[#allocation16 + $0x530] sm:$0xff] }
 0x44e   : > { %6680 = vmatprep.subr.mxu0 %v8535_v60  ;;  %6032 = vmatpush3.msra.mxu1 %v3596_v51  ;;  %v4242_v50 = vld [vmem:[#allocation16 + $0x630] sm:$0xff]  ;;  %v4225_v51 = vld [vmem:[#allocation16 + $0x5a8] sm:$0xff] }
 0x44f   : > { %6681 = vmatpush3.msra.mxu0 %v3628_v52  ;;  %6033 = vmatprep.subr.mxu1 %v3611_v53  ;;  %v4257_v52 = vld [vmem:[#allocation16 + $0x6a8] sm:$0xff] }
 0x450   : > { %6682 = vmatprep.subr.mxu0 %v8535_v60  ;;  %6034 = vmatpush3.msra.mxu1 %v3595_v54  ;;  %v4209_v53 = vld [vmem:[#allocation16 + $0x528] sm:$0xff] }
 0x451   : > { %6683 = vmatpush3.msra.mxu0 %v3627_v55  ;;  %6035 = vmatprep.subr.mxu1 %v3610_v56  ;;  %v4241_v54 = vld [vmem:[#allocation16 + $0x628] sm:$0xff]  ;;  %v4224_v55 = vld [vmem:[#allocation16 + $0x5a0] sm:$0xff] }
 0x452   : > { %6684 = vmatprep.subr.mxu0 %v8535_v60  ;;  %6036 = vmatpush3.msra.mxu1 %v3594_v58  ;;  %v4256_v56 = vld [vmem:[#allocation16 + $0x6a0] sm:$0xff] }
 0x453   : > { %6685 = vmatpush3.msra.mxu0 %v3626_v61  ;;  %6686 = vmatprep.mubr.msk.f32.mxu0 %vm7224_vm0, %v8535_v60  ;;  %v4208_v58 = vld [vmem:[#allocation16 + $0x520] sm:$0xff] }
 0x454   : > { %4124 = vmatmul.mubr.f32.vlgmr.msra.gmra.mxu1 %v3975_v59  ;;  %6687 = vmatmul.mubr.f32.vlgmr.msra.gmra.mxu0 %v3983_v62  ;;  %v4265_v59 = vld [vmem:[#allocation16 + $0x6e8] sm:$0xff]  ;;  %v4240_v61 = vld [vmem:[#allocation16 + $0x620] sm:$0xff]  ;;  %v4223_v62 = vld [vmem:[#allocation16 + $0x598] sm:$0xff] }
 0x455   : > { %6057 = vmatprep.subr.mxu1 %v4235_v63  ;;  %6092 = vmatprep.subr.mxu0 %v4267_v1  ;;  %v4255_v63 = vld [vmem:[#allocation16 + $0x698] sm:$0xff] }
 0x456   : > { %6058 = vmatpush3.msra.mxu1 %v4219_v3  ;;  %4374 = vmatprep.mubr.f32.mxu1 %v4292_v4  ;;  %v4207_v1 = vld [vmem:[#allocation16 + $0x518] sm:$0xff]  ;;  %v4222_v4 = vld [vmem:[#allocation16 + $0x590] sm:$0xff] }
 0x457   : > { %6093 = vmatpush3.msra.mxu0 %v4251_v44  ;;  %4444 = vmatprep.mubr.f32.mxu0 %v4300_v7  ;;  %v4239_v3 = vld [vmem:[#allocation16 + $0x618] sm:$0xff]  ;;  %v4254_v44 = vld [vmem:[#allocation16 + $0x690] sm:$0xff] }
 0x458   : > { %6059 = vmatprep.subr.mxu1 %v4234_v8  ;;  %6094 = vmatprep.subr.mxu0 %v4266_v10  ;;  %v4206_v7 = vld [vmem:[#allocation16 + $0x510] sm:$0xff]  ;;  %v4221_v10 = vld [vmem:[#allocation16 + $0x588] sm:$0xff] }
 0x459   : > { %6060 = vmatpush3.msra.mxu1 %v4218_v11  ;;  %6095 = vmatpush3.msra.mxu0 %v4250_v12  ;;  %v4238_v8 = vld [vmem:[#allocation16 + $0x610] sm:$0xff]  ;;  %v4253_v11 = vld [vmem:[#allocation16 + $0x688] sm:$0xff] }
 0x45a   : > { %6061 = vmatprep.subr.mxu1 %v4233_v45  ;;  %6096 = vmatprep.subr.mxu0 %v4265_v59  ;;  %v4205_v12 = vld [vmem:[#allocation16 + $0x508] sm:$0xff]  ;;  %v4220_v59 = vld [vmem:[#allocation16 + $0x580] sm:$0xff] }
 0x45b   : > { %6062 = vmatpush3.msra.mxu1 %v4217_v13  ;;  %6097 = vmatpush3.msra.mxu0 %v4249_v14  ;;  %v4237_v45 = vld [vmem:[#allocation16 + $0x608] sm:$0xff]  ;;  %v4252_v13 = vld [vmem:[#allocation16 + $0x680] sm:$0xff] }
 0x45c   : > { %6063 = vmatprep.subr.mxu1 %v4232_v16  ;;  %6098 = vmatprep.subr.mxu0 %v4264_v17  ;;  %v4204_v14 = vld [vmem:[#allocation16 + $0x500] sm:$0xff]  ;;  %v4288_v17 = vrot.slane %v8205_v49, %v8195_v26 }
 0x45d   : > { %6064 = vmatpush3.msra.mxu1 %v4216_v18  ;;  %6099 = vmatpush3.msra.mxu0 %v4248_v19  ;;  %v4236_v16 = vld [vmem:[#allocation16 + $0x600] sm:$0xff]  ;;  %v4296_v18 = vrot.slane %v8205_v49, %v8197_v37  ;;  %v4557_v19 = vld [vmem:[#allocation16 + $0x878] sm:$0xff]  ;;  %v4603_v49 = vld [vmem:[#allocation16 + $0x9e8] sm:$0xff] }
 0x45e   : > { %6065 = vmatprep.subr.mxu1 %v4231_v20  ;;  %6100 = vmatprep.subr.mxu0 %v4263_v21  ;;  %v4283_v20 = vld [vmem:[#allocation16 + $0x778] sm:$0xff] }
 0x45f   : > { %6066 = vmatpush3.msra.mxu1 %v4215_v30  ;;  %6101 = vmatpush3.msra.mxu0 %v4247_v29  ;;  %v4541_v21 = vld [vmem:[#allocation16 + $0x7f8] sm:$0xff]  ;;  %v4614_v30 = vrot.slane %v8215_v57, %v8191_v38  ;;  %v4556_v29 = vld [vmem:[#allocation16 + $0x870] sm:$0xff] }
 0x460   : > { %6067 = vmatprep.subr.mxu1 %v4230_v31  ;;  %6102 = vmatprep.subr.mxu0 %v4262_v35  ;;  %v4282_v31 = vld [vmem:[#allocation16 + $0x770] sm:$0xff] }
 0x461   : > { %6068 = vmatpush3.msra.mxu1 %v4214_v40  ;;  %6103 = vmatpush3.msra.mxu0 %v4246_v28  ;;  %v4540_v35 = vld [vmem:[#allocation16 + $0x7f0] sm:$0xff]  ;;  %v4555_v40 = vld [vmem:[#allocation16 + $0x868] sm:$0xff] }
 0x462   : > { %6069 = vmatprep.subr.mxu1 %v4229_v33  ;;  %6104 = vmatprep.subr.mxu0 %v4261_v32  ;;  %v4281_v28 = vld [vmem:[#allocation16 + $0x768] sm:$0xff]  ;;  %v4554_v32 = vld [vmem:[#allocation16 + $0x860] sm:$0xff] }
 0x463   : > { %6070 = vmatpush3.msra.mxu1 %v4213_v27  ;;  %6105 = vmatpush3.msra.mxu0 %v4245_v24  ;;  %v4539_v33 = vld [vmem:[#allocation16 + $0x7e8] sm:$0xff]  ;;  %v4280_v27 = vld [vmem:[#allocation16 + $0x760] sm:$0xff] }
 0x464   : > { %6071 = vmatprep.subr.mxu1 %v4228_v23  ;;  %6106 = vmatprep.subr.mxu0 %v4260_v39  ;;  %v4538_v24 = vld [vmem:[#allocation16 + $0x7e0] sm:$0xff]  ;;  %v4553_v23 = vld [vmem:[#allocation16 + $0x858] sm:$0xff] }
 0x465   : > { %6072 = vmatpush3.msra.mxu1 %v4212_v22  ;;  %6107 = vmatpush3.msra.mxu0 %v4244_v0  ;;  %v4279_v39 = vld [vmem:[#allocation16 + $0x758] sm:$0xff]  ;;  %v4552_v0 = vld [vmem:[#allocation16 + $0x850] sm:$0xff] }
 0x466   : > { %6073 = vmatprep.subr.mxu1 %v4227_v25  ;;  %6108 = vmatprep.subr.mxu0 %v4259_v34  ;;  %v4537_v22 = vld [vmem:[#allocation16 + $0x7d8] sm:$0xff]  ;;  %v4278_v25 = vld [vmem:[#allocation16 + $0x750] sm:$0xff] }
 0x467   : > { %6074 = vmatpush3.msra.mxu1 %v4211_v41  ;;  %6109 = vmatpush3.msra.mxu0 %v4243_v43  ;;  %v4536_v34 = vld [vmem:[#allocation16 + $0x7d0] sm:$0xff]  ;;  %v4551_v41 = vld [vmem:[#allocation16 + $0x848] sm:$0xff] }
 0x468   : > { %6075 = vmatprep.subr.mxu1 %v4226_v36  ;;  %6110 = vmatprep.subr.mxu0 %v4258_v46  ;;  %v4277_v43 = vld [vmem:[#allocation16 + $0x748] sm:$0xff]  ;;  %v4550_v46 = vld [vmem:[#allocation16 + $0x840] sm:$0xff] }
 0x469   : > { %6076 = vmatpush3.msra.mxu1 %v4210_v47  ;;  %6111 = vmatpush3.msra.mxu0 %v4242_v50  ;;  %v4535_v36 = vld [vmem:[#allocation16 + $0x7c8] sm:$0xff]  ;;  %v4276_v47 = vld [vmem:[#allocation16 + $0x740] sm:$0xff] }
 0x46a   : > { %6077 = vmatprep.subr.mxu1 %v4225_v51  ;;  %6112 = vmatprep.subr.mxu0 %v4257_v52  ;;  %v4534_v50 = vld [vmem:[#allocation16 + $0x7c0] sm:$0xff]  ;;  %v4549_v51 = vld [vmem:[#allocation16 + $0x838] sm:$0xff] }
 0x46b   : > { %6078 = vmatpush3.msra.mxu1 %v4209_v53  ;;  %6113 = vmatpush3.msra.mxu0 %v4241_v54  ;;  %v4275_v52 = vld [vmem:[#allocation16 + $0x738] sm:$0xff]  ;;  %v4548_v54 = vld [vmem:[#allocation16 + $0x830] sm:$0xff] }
 0x46c   : > { %6079 = vmatprep.subr.mxu1 %v4224_v55  ;;  %6114 = vmatprep.subr.mxu0 %v4256_v56  ;;  %v4533_v53 = vld [vmem:[#allocation16 + $0x7b8] sm:$0xff]  ;;  %v4274_v55 = vld [vmem:[#allocation16 + $0x730] sm:$0xff] }
 0x46d   : > { %6080 = vmatpush3.msra.mxu1 %v4208_v58  ;;  %6115 = vmatpush3.msra.mxu0 %v4240_v61  ;;  %v4532_v56 = vld [vmem:[#allocation16 + $0x7b0] sm:$0xff]  ;;  %v4547_v58 = vld [vmem:[#allocation16 + $0x828] sm:$0xff] }
 0x46e   : > { %6081 = vmatprep.subr.mxu1 %v4223_v62  ;;  %6116 = vmatprep.subr.mxu0 %v4255_v63  ;;  %v4273_v61 = vld [vmem:[#allocation16 + $0x728] sm:$0xff]  ;;  %v4546_v63 = vld [vmem:[#allocation16 + $0x820] sm:$0xff] }
 0x46f   : > { %6082 = vmatpush3.msra.mxu1 %v4207_v1  ;;  %6117 = vmatpush3.msra.mxu0 %v4239_v3  ;;  %v4531_v62 = vld [vmem:[#allocation16 + $0x7a8] sm:$0xff]  ;;  %v4272_v1 = vld [vmem:[#allocation16 + $0x720] sm:$0xff] }
 0x470   : > { %6083 = vmatprep.subr.mxu1 %v4222_v4  ;;  %6118 = vmatprep.subr.mxu0 %v4254_v44  ;;  %v4530_v3 = vld [vmem:[#allocation16 + $0x7a0] sm:$0xff]  ;;  %v4545_v4 = vld [vmem:[#allocation16 + $0x818] sm:$0xff] }
 0x471   : > { %6084 = vmatpush3.msra.mxu1 %v4206_v7  ;;  %6119 = vmatpush3.msra.mxu0 %v4238_v8  ;;  %v4271_v44 = vld [vmem:[#allocation16 + $0x718] sm:$0xff]  ;;  %v4544_v8 = vld [vmem:[#allocation16 + $0x810] sm:$0xff] }
 0x472   : > { %6085 = vmatprep.subr.mxu1 %v4221_v10  ;;  %6120 = vmatprep.subr.mxu0 %v4253_v11  ;;  %v4529_v7 = vld [vmem:[#allocation16 + $0x798] sm:$0xff]  ;;  %v4270_v10 = vld [vmem:[#allocation16 + $0x710] sm:$0xff] }
 0x473   : > { %6086 = vmatpush3.msra.mxu1 %v4205_v12  ;;  %6121 = vmatpush3.msra.mxu0 %v4237_v45  ;;  %v4528_v11 = vld [vmem:[#allocation16 + $0x790] sm:$0xff]  ;;  %v4543_v12 = vld [vmem:[#allocation16 + $0x808] sm:$0xff] }
 0x474   : > { %6087 = vmatprep.subr.mxu1 %v4220_v59  ;;  %6122 = vmatprep.subr.mxu0 %v4252_v13  ;;  %v4269_v45 = vld [vmem:[#allocation16 + $0x708] sm:$0xff]  ;;  %v4542_v13 = vld [vmem:[#allocation16 + $0x800] sm:$0xff] }
 0x475   : > { %6088 = vmatpush3.msra.mxu1 %v4204_v14  ;;  %6123 = vmatpush3.msra.mxu0 %v4236_v16  ;;  %v4527_v59 = vld [vmem:[#allocation16 + $0x788] sm:$0xff]  ;;  %v4268_v14 = vld [vmem:[#allocation16 + $0x700] sm:$0xff] }
 0x476   : > { %4375 = vmatmul.mubr.f32.vlgmr.msra.gmra.mxu1 %v4288_v17  ;;  %4445 = vmatmul.mubr.f32.vlgmr.msra.gmra.mxu0 %v4296_v18  ;;  %v4526_v16 = vld [vmem:[#allocation16 + $0x780] sm:$0xff]  ;;  %v4610_v17 = vrot.slane %v8215_v57, %v8195_v26  ;;  %v4589_v18 = vld [vmem:[#allocation16 + $0x978] sm:$0xff] }
 0x477   : > { %6689 = vmatprep.subr.mxu1 %v8535_v60  ;;  %6144 = vmatprep.subr.mxu0 %v4557_v19  ;;  %v4573_v19 = vld [vmem:[#allocation16 + $0x8f8] sm:$0xff] }
 0x478   : > { %6690 = vmatpush3.msra.mxu1 %v4283_v20  ;;  %6145 = vmatpush3.msra.mxu0 %v4541_v21  ;;  %v4622_v20 = vrot.slane %v8215_v57, %v8193_v42  ;;  %v4605_v21 = vld [vmem:[#allocation16 + $0x9f8] sm:$0xff]  ;;  %v4909_v57 = vld [vmem:[#allocation16 + $0xbe8] sm:$0xff] }
 0x479   : > { %4696 = vmatprep.mubr.f32.mxu0 %v4614_v30  ;;  %6691 = vmatprep.subr.mxu1 %v8535_v60  ;;  %v4588_v30 = vld [vmem:[#allocation16 + $0x970] sm:$0xff] }
 0x47a   : > { %6146 = vmatprep.subr.mxu0 %v4556_v29  ;;  %6692 = vmatpush3.msra.mxu1 %v4282_v31  ;;  %v4572_v29 = vld [vmem:[#allocation16 + $0x8f0] sm:$0xff] }
 0x47b   : > { %6147 = vmatpush3.msra.mxu0 %v4540_v35  ;;  %6693 = vmatprep.subr.mxu1 %v8535_v60  ;;  %v4604_v31 = vld [vmem:[#allocation16 + $0x9f0] sm:$0xff]  ;;  %v4587_v35 = vld [vmem:[#allocation16 + $0x968] sm:$0xff] }
 0x47c   : > { %6148 = vmatprep.subr.mxu0 %v4555_v40  ;;  %6694 = vmatpush3.msra.mxu1 %v4281_v28  ;;  %v4571_v40 = vld [vmem:[#allocation16 + $0x8e8] sm:$0xff]  ;;  %v4570_v28 = vld [vmem:[#allocation16 + $0x8e0] sm:$0xff] }
 0x47d   : > { %6149 = vmatpush3.msra.mxu0 %v4539_v33  ;;  %6695 = vmatprep.subr.mxu1 %v8535_v60  ;;  %v4602_v33 = vld [vmem:[#allocation16 + $0x9e0] sm:$0xff] }
 0x47e   : > { %6150 = vmatprep.subr.mxu0 %v4554_v32  ;;  %6696 = vmatpush3.msra.mxu1 %v4280_v27  ;;  %v4585_v32 = vld [vmem:[#allocation16 + $0x958] sm:$0xff] }
 0x47f   : > { %6151 = vmatpush3.msra.mxu0 %v4538_v24  ;;  %6697 = vmatprep.subr.mxu1 %v8535_v60  ;;  %v4569_v27 = vld [vmem:[#allocation16 + $0x8d8] sm:$0xff] }
 0x480   : > { %6152 = vmatprep.subr.mxu0 %v4553_v23  ;;  %6698 = vmatpush3.msra.mxu1 %v4279_v39  ;;  %v4601_v24 = vld [vmem:[#allocation16 + $0x9d8] sm:$0xff]  ;;  %v4584_v23 = vld [vmem:[#allocation16 + $0x950] sm:$0xff] }
 0x481   : > { %6153 = vmatpush3.msra.mxu0 %v4537_v22  ;;  %6699 = vmatprep.subr.mxu1 %v8535_v60  ;;  %v4568_v39 = vld [vmem:[#allocation16 + $0x8d0] sm:$0xff] }
 0x482   : > { %6154 = vmatprep.subr.mxu0 %v4552_v0  ;;  %6700 = vmatpush3.msra.mxu1 %v4278_v25  ;;  %v4600_v22 = vld [vmem:[#allocation16 + $0x9d0] sm:$0xff]  ;;  %v4583_v0 = vld [vmem:[#allocation16 + $0x948] sm:$0xff] }
 0x483   : > { %6155 = vmatpush3.msra.mxu0 %v4536_v34  ;;  %6701 = vmatprep.subr.mxu1 %v8535_v60  ;;  %v4567_v25 = vld [vmem:[#allocation16 + $0x8c8] sm:$0xff] }
 0x484   : > { %6156 = vmatprep.subr.mxu0 %v4551_v41  ;;  %6702 = vmatpush3.msra.mxu1 %v4277_v43  ;;  %v4599_v34 = vld [vmem:[#allocation16 + $0x9c8] sm:$0xff]  ;;  %v4582_v41 = vld [vmem:[#allocation16 + $0x940] sm:$0xff] }
 0x485   : > { %6157 = vmatpush3.msra.mxu0 %v4535_v36  ;;  %6703 = vmatprep.subr.mxu1 %v8535_v60  ;;  %v4566_v43 = vld [vmem:[#allocation16 + $0x8c0] sm:$0xff] }
 0x486   : > { %6158 = vmatprep.subr.mxu0 %v4550_v46  ;;  %6704 = vmatpush3.msra.mxu1 %v4276_v47  ;;  %v4598_v36 = vld [vmem:[#allocation16 + $0x9c0] sm:$0xff]  ;;  %v4581_v46 = vld [vmem:[#allocation16 + $0x938] sm:$0xff] }
 0x487   : > { %6159 = vmatpush3.msra.mxu0 %v4534_v50  ;;  %6705 = vmatprep.subr.mxu1 %v8535_v60  ;;  %v4565_v47 = vld [vmem:[#allocation16 + $0x8b8] sm:$0xff] }
 0x488   : > { %6160 = vmatprep.subr.mxu0 %v4549_v51  ;;  %6706 = vmatpush3.msra.mxu1 %v4275_v52  ;;  %v4597_v50 = vld [vmem:[#allocation16 + $0x9b8] sm:$0xff]  ;;  %v4580_v51 = vld [vmem:[#allocation16 + $0x930] sm:$0xff] }
 0x489   : > { %6161 = vmatpush3.msra.mxu0 %v4533_v53  ;;  %6707 = vmatprep.subr.mxu1 %v8535_v60  ;;  %v4564_v52 = vld [vmem:[#allocation16 + $0x8b0] sm:$0xff] }
 0x48a   : > { %6162 = vmatprep.subr.mxu0 %v4548_v54  ;;  %6708 = vmatpush3.msra.mxu1 %v4274_v55  ;;  %v4596_v53 = vld [vmem:[#allocation16 + $0x9b0] sm:$0xff]  ;;  %v4579_v54 = vld [vmem:[#allocation16 + $0x928] sm:$0xff] }
 0x48b   : > { %6163 = vmatpush3.msra.mxu0 %v4532_v56  ;;  %6709 = vmatprep.subr.mxu1 %v8535_v60  ;;  %v4563_v55 = vld [vmem:[#allocation16 + $0x8a8] sm:$0xff] }
 0x48c   : > { %6164 = vmatprep.subr.mxu0 %v4547_v58  ;;  %6710 = vmatpush3.msra.mxu1 %v4273_v61  ;;  %v4595_v56 = vld [vmem:[#allocation16 + $0x9a8] sm:$0xff]  ;;  %v4578_v58 = vld [vmem:[#allocation16 + $0x920] sm:$0xff] }
 0x48d   : > { %6165 = vmatpush3.msra.mxu0 %v4531_v62  ;;  %6711 = vmatprep.subr.mxu1 %v8535_v60  ;;  %v4562_v61 = vld [vmem:[#allocation16 + $0x8a0] sm:$0xff] }
 0x48e   : > { %6166 = vmatprep.subr.mxu0 %v4546_v63  ;;  %6712 = vmatpush3.msra.mxu1 %v4272_v1  ;;  %v4594_v62 = vld [vmem:[#allocation16 + $0x9a0] sm:$0xff]  ;;  %v4577_v63 = vld [vmem:[#allocation16 + $0x918] sm:$0xff] }
 0x48f   : > { %6167 = vmatpush3.msra.mxu0 %v4530_v3  ;;  %6713 = vmatprep.subr.mxu1 %v8535_v60  ;;  %v4561_v1 = vld [vmem:[#allocation16 + $0x898] sm:$0xff] }
 0x490   : > { %6168 = vmatprep.subr.mxu0 %v4545_v4  ;;  %6714 = vmatpush3.msra.mxu1 %v4271_v44  ;;  %v4593_v3 = vld [vmem:[#allocation16 + $0x998] sm:$0xff]  ;;  %v4576_v4 = vld [vmem:[#allocation16 + $0x910] sm:$0xff] }
 0x491   : > { %6169 = vmatpush3.msra.mxu0 %v4529_v7  ;;  %6715 = vmatprep.subr.mxu1 %v8535_v60  ;;  %v4560_v44 = vld [vmem:[#allocation16 + $0x890] sm:$0xff] }
 0x492   : > { %6170 = vmatprep.subr.mxu0 %v4544_v8  ;;  %6716 = vmatpush3.msra.mxu1 %v4270_v10  ;;  %v4592_v7 = vld [vmem:[#allocation16 + $0x990] sm:$0xff]  ;;  %v4575_v8 = vld [vmem:[#allocation16 + $0x908] sm:$0xff] }
 0x493   : > { %6171 = vmatpush3.msra.mxu0 %v4528_v11  ;;  %6717 = vmatprep.subr.mxu1 %v8535_v60  ;;  %v4559_v10 = vld [vmem:[#allocation16 + $0x888] sm:$0xff] }
 0x494   : > { %6172 = vmatprep.subr.mxu0 %v4543_v12  ;;  %6718 = vmatpush3.msra.mxu1 %v4269_v45  ;;  %v4591_v11 = vld [vmem:[#allocation16 + $0x988] sm:$0xff]  ;;  %v4574_v12 = vld [vmem:[#allocation16 + $0x900] sm:$0xff] }
 0x495   : > { %6173 = vmatpush3.msra.mxu0 %v4527_v59  ;;  %6719 = vmatprep.subr.mxu1 %v8535_v60  ;;  %v4558_v45 = vld [vmem:[#allocation16 + $0x880] sm:$0xff] }
 0x496   : > { %6174 = vmatprep.subr.mxu0 %v4542_v13  ;;  %6720 = vmatpush3.msra.mxu1 %v4268_v14  ;;  %v4590_v59 = vld [vmem:[#allocation16 + $0x980] sm:$0xff]  ;;  %v4879_v13 = vld [vmem:[#allocation16 + $0xaf8] sm:$0xff] }
 0x497   : > { %6721 = vmatprep.mubr.msk.f32.mxu1 %vm7224_vm0, %v8535_v60  ;;  %6175 = vmatpush3.msra.mxu0 %v4526_v16  ;;  %v4911_v14 = vld [vmem:[#allocation16 + $0xbf8] sm:$0xff] }
 0x498   : > { %6722 = vmatmul.mubr.f32.vlgmr.msra.gmra.mxu1 %v4304_v2  ;;  %4697 = vmatmul.mubr.f32.vlgmr.msra.gmra.mxu0 %v4610_v17  ;;  %v4586_v2 = vld [vmem:[#allocation16 + $0x960] sm:$0xff]  ;;  %v4863_v16 = vld [vmem:[#allocation16 + $0xa78] sm:$0xff]  ;;  %v4936_v17 = vrot.slane %v8228_v9, %v8191_v38  ;;  %v4893_v38 = vld [vmem:[#allocation16 + $0xb68] sm:$0xff] }
 0x499   : > { %6179 = vmatprep.subr.mxu1 %v4589_v18  ;;  %6724 = vmatprep.subr.mxu0 %v8535_v60  ;;  %v4895_v18 = vld [vmem:[#allocation16 + $0xb78] sm:$0xff] }
 0x49a   : > { %6180 = vmatpush3.msra.mxu1 %v4573_v19  ;;  %4766 = vmatprep.mubr.f32.mxu1 %v4622_v20  ;;  %v4944_v19 = vrot.slane %v8228_v9, %v8193_v42  ;;  %v4878_v20 = vld [vmem:[#allocation16 + $0xaf0] sm:$0xff]  ;;  %v4860_v42 = vld [vmem:[#allocation16 + $0xa60] sm:$0xff] }
 0x49b   : > { %6725 = vmatpush3.msra.mxu0 %v4605_v21  ;;  %6181 = vmatprep.subr.mxu1 %v4588_v30  ;;  %v4910_v21 = vld [vmem:[#allocation16 + $0xbf0] sm:$0xff] }
 0x49c   : > { %6726 = vmatprep.subr.mxu0 %v8535_v60  ;;  %6182 = vmatpush3.msra.mxu1 %v4572_v29  ;;  %v4862_v30 = vld [vmem:[#allocation16 + $0xa70] sm:$0xff] }
 0x49d   : > { %6727 = vmatpush3.msra.mxu0 %v4604_v31  ;;  %6183 = vmatprep.subr.mxu1 %v4587_v35  ;;  %v4894_v29 = vld [vmem:[#allocation16 + $0xb70] sm:$0xff]  ;;  %v4876_v31 = vld [vmem:[#allocation16 + $0xae0] sm:$0xff] }
 0x49e   : > { %6728 = vmatprep.subr.mxu0 %v8535_v60  ;;  %6184 = vmatpush3.msra.mxu1 %v4571_v40  ;;  %v4908_v35 = vld [vmem:[#allocation16 + $0xbe0] sm:$0xff] }
 0x49f   : > { %6729 = vmatpush3.msra.mxu0 %v4603_v49  ;;  %6185 = vmatprep.subr.mxu1 %v4586_v2  ;;  %v4892_v40 = vld [vmem:[#allocation16 + $0xb60] sm:$0xff]  ;;  %v4875_v49 = vld [vmem:[#allocation16 + $0xad8] sm:$0xff] }
 0x4a0   : > { %6730 = vmatprep.subr.mxu0 %v8535_v60  ;;  %6186 = vmatpush3.msra.mxu1 %v4570_v28  ;;  %v4907_v2 = vld [vmem:[#allocation16 + $0xbd8] sm:$0xff] }
 0x4a1   : > { %6731 = vmatpush3.msra.mxu0 %v4602_v33  ;;  %6187 = vmatprep.subr.mxu1 %v4585_v32  ;;  %v4859_v28 = vld [vmem:[#allocation16 + $0xa58] sm:$0xff]  ;;  %v4874_v32 = vld [vmem:[#allocation16 + $0xad0] sm:$0xff] }
 0x4a2   : > { %6732 = vmatprep.subr.mxu0 %v8535_v60  ;;  %6188 = vmatpush3.msra.mxu1 %v4569_v27  ;;  %v4891_v33 = vld [vmem:[#allocation16 + $0xb58] sm:$0xff]  ;;  %v4906_v27 = vld [vmem:[#allocation16 + $0xbd0] sm:$0xff] }
 0x4a3   : > { %6733 = vmatpush3.msra.mxu0 %v4601_v24  ;;  %6189 = vmatprep.subr.mxu1 %v4584_v23  ;;  %v4858_v24 = vld [vmem:[#allocation16 + $0xa50] sm:$0xff] }
 0x4a4   : > { %6734 = vmatprep.subr.mxu0 %v8535_v60  ;;  %6190 = vmatpush3.msra.mxu1 %v4568_v39  ;;  %v4890_v23 = vld [vmem:[#allocation16 + $0xb50] sm:$0xff]  ;;  %v4873_v39 = vld [vmem:[#allocation16 + $0xac8] sm:$0xff] }
 0x4a5   : > { %6735 = vmatpush3.msra.mxu0 %v4600_v22  ;;  %6191 = vmatprep.subr.mxu1 %v4583_v0  ;;  %v4905_v22 = vld [vmem:[#allocation16 + $0xbc8] sm:$0xff] }
 0x4a6   : > { %6736 = vmatprep.subr.mxu0 %v8535_v60  ;;  %6192 = vmatpush3.msra.mxu1 %v4567_v25  ;;  %v4857_v0 = vld [vmem:[#allocation16 + $0xa48] sm:$0xff] }
 0x4a7   : > { %6737 = vmatpush3.msra.mxu0 %v4599_v34  ;;  %6193 = vmatprep.subr.mxu1 %v4582_v41  ;;  %v4889_v25 = vld [vmem:[#allocation16 + $0xb48] sm:$0xff]  ;;  %v4872_v34 = vld [vmem:[#allocation16 + $0xac0] sm:$0xff] }
 0x4a8   : > { %6738 = vmatprep.subr.mxu0 %v8535_v60  ;;  %6194 = vmatpush3.msra.mxu1 %v4566_v43  ;;  %v4904_v41 = vld [vmem:[#allocation16 + $0xbc0] sm:$0xff] }
 0x4a9   : > { %6739 = vmatpush3.msra.mxu0 %v4598_v36  ;;  %6195 = vmatprep.subr.mxu1 %v4581_v46  ;;  %v4856_v43 = vld [vmem:[#allocation16 + $0xa40] sm:$0xff]  ;;  %v4871_v46 = vld [vmem:[#allocation16 + $0xab8] sm:$0xff] }
 0x4aa   : > { %6740 = vmatprep.subr.mxu0 %v8535_v60  ;;  %6196 = vmatpush3.msra.mxu1 %v4565_v47  ;;  %v4888_v36 = vld [vmem:[#allocation16 + $0xb40] sm:$0xff]  ;;  %v4903_v47 = vld [vmem:[#allocation16 + $0xbb8] sm:$0xff] }
 0x4ab   : > { %6741 = vmatpush3.msra.mxu0 %v4597_v50  ;;  %6197 = vmatprep.subr.mxu1 %v4580_v51  ;;  %v4855_v50 = vld [vmem:[#allocation16 + $0xa38] sm:$0xff] }
 0x4ac   : > { %6742 = vmatprep.subr.mxu0 %v8535_v60  ;;  %6198 = vmatpush3.msra.mxu1 %v4564_v52  ;;  %v4887_v51 = vld [vmem:[#allocation16 + $0xb38] sm:$0xff]  ;;  %v4870_v52 = vld [vmem:[#allocation16 + $0xab0] sm:$0xff] }
 0x4ad   : > { %6743 = vmatpush3.msra.mxu0 %v4596_v53  ;;  %6199 = vmatprep.subr.mxu1 %v4579_v54  ;;  %v4902_v53 = vld [vmem:[#allocation16 + $0xbb0] sm:$0xff] }
 0x4ae   : > { %6744 = vmatprep.subr.mxu0 %v8535_v60  ;;  %6200 = vmatpush3.msra.mxu1 %v4563_v55  ;;  %v4854_v54 = vld [vmem:[#allocation16 + $0xa30] sm:$0xff] }
 0x4af   : > { %6745 = vmatpush3.msra.mxu0 %v4595_v56  ;;  %6201 = vmatprep.subr.mxu1 %v4578_v58  ;;  %v4886_v55 = vld [vmem:[#allocation16 + $0xb30] sm:$0xff]  ;;  %v4869_v56 = vld [vmem:[#allocation16 + $0xaa8] sm:$0xff] }
 0x4b0   : > { %6746 = vmatprep.subr.mxu0 %v8535_v60  ;;  %6202 = vmatpush3.msra.mxu1 %v4562_v61  ;;  %v4901_v58 = vld [vmem:[#allocation16 + $0xba8] sm:$0xff] }
 0x4b1   : > { %6747 = vmatpush3.msra.mxu0 %v4594_v62  ;;  %6203 = vmatprep.subr.mxu1 %v4577_v63  ;;  %v4853_v61 = vld [vmem:[#allocation16 + $0xa28] sm:$0xff]  ;;  %v4868_v63 = vld [vmem:[#allocation16 + $0xaa0] sm:$0xff] }
 0x4b2   : > { %6748 = vmatprep.subr.mxu0 %v8535_v60  ;;  %6204 = vmatpush3.msra.mxu1 %v4561_v1  ;;  %v4885_v62 = vld [vmem:[#allocation16 + $0xb28] sm:$0xff]  ;;  %v4900_v1 = vld [vmem:[#allocation16 + $0xba0] sm:$0xff] }
 0x4b3   : > { %6749 = vmatpush3.msra.mxu0 %v4593_v3  ;;  %6205 = vmatprep.subr.mxu1 %v4576_v4  ;;  %v4852_v3 = vld [vmem:[#allocation16 + $0xa20] sm:$0xff] }
 0x4b4   : > { %6750 = vmatprep.subr.mxu0 %v8535_v60  ;;  %6206 = vmatpush3.msra.mxu1 %v4560_v44  ;;  %v4884_v4 = vld [vmem:[#allocation16 + $0xb20] sm:$0xff]  ;;  %v4867_v44 = vld [vmem:[#allocation16 + $0xa98] sm:$0xff] }
 0x4b5   : > { %6751 = vmatpush3.msra.mxu0 %v4592_v7  ;;  %6207 = vmatprep.subr.mxu1 %v4575_v8  ;;  %v4899_v7 = vld [vmem:[#allocation16 + $0xb98] sm:$0xff] }
 0x4b6   : > { %6752 = vmatprep.subr.mxu0 %v8535_v60  ;;  %6208 = vmatpush3.msra.mxu1 %v4559_v10 }
 0x4b7   : > { %6753 = vmatpush3.msra.mxu0 %v4591_v11  ;;  %6209 = vmatprep.subr.mxu1 %v4574_v12  ;;  %v4851_v11 = vld [vmem:[#allocation16 + $0xa18] sm:$0xff] }
 0x4b8   : > { %6754 = vmatprep.subr.mxu0 %v8535_v60  ;;  %6210 = vmatpush3.msra.mxu1 %v4558_v45  ;;  %v4883_v12 = vld [vmem:[#allocation16 + $0xb18] sm:$0xff]  ;;  %v4866_v45 = vld [vmem:[#allocation16 + $0xa90] sm:$0xff] }
 0x4b9   : > { %6755 = vmatpush3.msra.mxu0 %v4590_v59  ;;  %6756 = vmatprep.mubr.msk.f32.mxu0 %vm7224_vm0, %v8535_v60  ;;  %v4898_v59 = vld [vmem:[#allocation16 + $0xb90] sm:$0xff] }
 0x4ba   : > { %4767 = vmatmul.mubr.f32.vlgmr.msra.gmra.mxu1 %v4618_v5  ;;  %6757 = vmatmul.mubr.f32.vlgmr.msra.gmra.mxu0 %v4626_v6  ;;  %v4877_v5 = vld [vmem:[#allocation16 + $0xae8] sm:$0xff] }
 0x4bb   : > { %6231 = vmatprep.subr.mxu1 %v4879_v13  ;;  %6266 = vmatprep.subr.mxu0 %v4911_v14  ;;  %v4861_v6 = vld [vmem:[#allocation16 + $0xa68] sm:$0xff] }
 0x4bc   : > { %6232 = vmatpush3.msra.mxu1 %v4863_v16  ;;  %5018 = vmatprep.mubr.f32.mxu1 %v4936_v17  ;;  %v4850_v16 = vld [vmem:[#allocation16 + $0xa10] sm:$0xff] }
 0x4bd   : > { %6267 = vmatpush3.msra.mxu0 %v4895_v18  ;;  %5088 = vmatprep.mubr.f32.mxu0 %v4944_v19  ;;  %v4882_v17 = vld [vmem:[#allocation16 + $0xb10] sm:$0xff] }
 0x4be   : > { %6233 = vmatprep.subr.mxu1 %v4878_v20  ;;  %6268 = vmatprep.subr.mxu0 %v4910_v21  ;;  %v4865_v20 = vld [vmem:[#allocation16 + $0xa88] sm:$0xff] }
 0x4bf   : > { %6234 = vmatpush3.msra.mxu1 %v4862_v30  ;;  %6269 = vmatpush3.msra.mxu0 %v4894_v29  ;;  %v4897_v21 = vld [vmem:[#allocation16 + $0xb88] sm:$0xff] }
 0x4c0   : > { %6235 = vmatprep.subr.mxu1 %v4877_v5  ;;  %6270 = vmatprep.subr.mxu0 %v4909_v57  ;;  %v4849_v30 = vld [vmem:[#allocation16 + $0xa08] sm:$0xff]  ;;  %v4864_v57 = vld [vmem:[#allocation16 + $0xa80] sm:$0xff] }
 0x4c1   : > { %6236 = vmatpush3.msra.mxu1 %v4861_v6  ;;  %6271 = vmatpush3.msra.mxu0 %v4893_v38  ;;  %v4881_v29 = vld [vmem:[#allocation16 + $0xb08] sm:$0xff]  ;;  %v4896_v6 = vld [vmem:[#allocation16 + $0xb80] sm:$0xff] }
 0x4c2   : > { %6237 = vmatprep.subr.mxu1 %v4876_v31  ;;  %6272 = vmatprep.subr.mxu0 %v4908_v35  ;;  %v4848_v38 = vld [vmem:[#allocation16 + $0xa00] sm:$0xff]  ;;  %v4932_v35 = vrot.slane %v8228_v9, %v8195_v26 }
 0x4c3   : > { %6238 = vmatpush3.msra.mxu1 %v4860_v42  ;;  %6273 = vmatpush3.msra.mxu0 %v4892_v40  ;;  %v4880_v31 = vld [vmem:[#allocation16 + $0xb00] sm:$0xff]  ;;  %v4940_v42 = vrot.slane %v8228_v9, %v8197_v37  ;;  %v4927_v40 = vld [vmem:[#allocation16 + $0xc78] sm:$0xff] }
 0x4c4   : > { %6239 = vmatprep.subr.mxu1 %v4875_v49  ;;  %6274 = vmatprep.subr.mxu0 %v4907_v2  ;;  %v4926_v49 = vld [vmem:[#allocation16 + $0xc70] sm:$0xff]  ;;  %v4925_v2 = vld [vmem:[#allocation16 + $0xc68] sm:$0xff]  ;;  %v4924_v26 = vld [vmem:[#allocation16 + $0xc60] sm:$0xff] }
 0x4c5   : > { %6240 = vmatpush3.msra.mxu1 %v4859_v28  ;;  %6275 = vmatpush3.msra.mxu0 %v4891_v33  ;;  %v4923_v37 = vld [vmem:[#allocation16 + $0xc58] sm:$0xff]  ;;  %v4922_v28 = vld [vmem:[#allocation16 + $0xc50] sm:$0xff]  ;;  %v4921_v33 = vld [vmem:[#allocation16 + $0xc48] sm:$0xff] }
 0x4c6   : > { %6241 = vmatprep.subr.mxu1 %v4874_v32  ;;  %6276 = vmatprep.subr.mxu0 %v4906_v27  ;;  %v4920_v32 = vld [vmem:[#allocation16 + $0xc40] sm:$0xff]  ;;  %v4919_v27 = vld [vmem:[#allocation16 + $0xc38] sm:$0xff] }
 0x4c7   : > { %6242 = vmatpush3.msra.mxu1 %v4858_v24  ;;  %6277 = vmatpush3.msra.mxu0 %v4890_v23  ;;  %v4918_v24 = vld [vmem:[#allocation16 + $0xc30] sm:$0xff]  ;;  %v4917_v23 = vld [vmem:[#allocation16 + $0xc28] sm:$0xff] }
 0x4c8   : > { %6243 = vmatprep.subr.mxu1 %v4873_v39  ;;  %6278 = vmatprep.subr.mxu0 %v4905_v22  ;;  %v4916_v39 = vld [vmem:[#allocation16 + $0xc20] sm:$0xff] }
 0x4c9   : > { %6244 = vmatpush3.msra.mxu1 %v4857_v0  ;;  %6279 = vmatpush3.msra.mxu0 %v4889_v25  ;;  %v4915_v25 = vld [vmem:[#allocation16 + $0xc18] sm:$0xff] }
 0x4ca   : > { %6245 = vmatprep.subr.mxu1 %v4872_v34  ;;  %6280 = vmatprep.subr.mxu0 %v4904_v41 }
 0x4cb   : > { %6246 = vmatpush3.msra.mxu1 %v4856_v43  ;;  %6281 = vmatpush3.msra.mxu0 %v4888_v36  ;;  %v4914_v36 = vld [vmem:[#allocation16 + $0xc10] sm:$0xff] }
 0x4cc   : > { %6247 = vmatprep.subr.mxu1 %v4871_v46  ;;  %6282 = vmatprep.subr.mxu0 %v4903_v47  ;;  %v4913_v47 = vld [vmem:[#allocation16 + $0xc08] sm:$0xff] }
 0x4cd   : > { %6248 = vmatpush3.msra.mxu1 %v4855_v50  ;;  %6283 = vmatpush3.msra.mxu0 %v4887_v51  ;;  %v4912_v51 = vld [vmem:[#allocation16 + $0xc00] sm:$0xff] }
 0x4ce   : > { %6249 = vmatprep.subr.mxu1 %v4870_v52  ;;  %6284 = vmatprep.subr.mxu0 %v4902_v53 }
 0x4cf   : > { %6250 = vmatpush3.msra.mxu1 %v4854_v54  ;;  %6285 = vmatpush3.msra.mxu0 %v4886_v55 }
 0x4d0   : > { %6251 = vmatprep.subr.mxu1 %v4869_v56  ;;  %6286 = vmatprep.subr.mxu0 %v4901_v58 }
 0x4d1   : > { %6252 = vmatpush3.msra.mxu1 %v4853_v61  ;;  %6287 = vmatpush3.msra.mxu0 %v4885_v62  ;;  %v5915_v8 = vpop.f32.mrf.mxu1  ;;  %v5950_v10 = vpop.f32.mrf.mxu0 }
 0x4d2   : > { %6253 = vmatprep.subr.mxu1 %v4868_v63  ;;  %6288 = vmatprep.subr.mxu0 %v4900_v1 }
 0x4d3   : > { %6254 = vmatpush3.msra.mxu1 %v4852_v3  ;;  %6289 = vmatpush3.msra.mxu0 %v4884_v4  ;;  %v5916_v13 = vpop.f32.mrf.mxu1  ;;  %v5951_v14 = vpop.f32.mrf.mxu0 }
 0x4d4   : > { %6255 = vmatprep.subr.mxu1 %v4867_v44  ;;  %6290 = vmatprep.subr.mxu0 %v4899_v7  ;;  %v5917_v18 = vadd.f32 %v5916_v13, %v5915_v8  ;;  %v5952_v19 = vadd.f32 %v5951_v14, %v5950_v10 }
 0x4d5   : > { %6256 = vmatpush3.msra.mxu1 %v4851_v11  ;;  %6291 = vmatpush3.msra.mxu0 %v4883_v12 }
 0x4d6   : > { %6257 = vmatprep.subr.mxu1 %v4866_v45  ;;  %6292 = vmatprep.subr.mxu0 %v4898_v59  ;;  %v3890_v5 = vadd.f32 %v5952_v19, %v5917_v18 }
 0x4d7   : > { %6258 = vmatpush3.msra.mxu1 %v4850_v16  ;;  %6293 = vmatpush3.msra.mxu0 %v4882_v17 }
 0x4d8   : > { %6259 = vmatprep.subr.mxu1 %v4865_v20  ;;  %6294 = vmatprep.subr.mxu0 %v4897_v21 }
 0x4d9   : > { %6260 = vmatpush3.msra.mxu1 %v4849_v30  ;;  %6295 = vmatpush3.msra.mxu0 %v4881_v29 }
 0x4da   : > { %6261 = vmatprep.subr.mxu1 %v4864_v57  ;;  %6296 = vmatprep.subr.mxu0 %v4896_v6 }
 0x4db   : > { %6262 = vmatpush3.msra.mxu1 %v4848_v38  ;;  %6297 = vmatpush3.msra.mxu0 %v4880_v31  ;;  %v5165_v31 = vld [vmem:[#allocation17] sm:$0x1] }
 0x4dc   : > { %5019 = vmatmul.mubr.f32.vlgmr.msra.gmra.mxu1 %v4932_v35  ;;  %5089 = vmatmul.mubr.f32.vlgmr.msra.gmra.mxu0 %v4940_v42 }
 0x4dd   : > { %6759 = vmatprep.subr.mxu1 %v8535_v60  ;;  %6791 = vmatprep.mubr.msk.f32.mxu1 %vm7224_vm0, %v8535_v60 }
 0x4de   : > { %6760 = vmatpush3.msra.mxu1 %v4927_v40 }
 0x4df   : > { %6761 = vmatprep.subr.mxu1 %v8535_v60 }
 0x4e0   : > { %6762 = vmatpush3.msra.mxu1 %v4926_v49 }
 0x4e1   : > { %6763 = vmatprep.subr.mxu1 %v8535_v60 }
 0x4e2   : > { %6764 = vmatpush3.msra.mxu1 %v4925_v2 }
 0x4e3   : > { %6765 = vmatprep.subr.mxu1 %v8535_v60 }
 0x4e4   : > { %6766 = vmatpush3.msra.mxu1 %v4924_v26 }
 0x4e5   : > { %6767 = vmatprep.subr.mxu1 %v8535_v60 }
 0x4e6   : > { %6768 = vmatpush3.msra.mxu1 %v4923_v37 }
 0x4e7   : > { %6769 = vmatprep.subr.mxu1 %v8535_v60 }
 0x4e8   : > { %6770 = vmatpush3.msra.mxu1 %v4922_v28 }
 0x4e9   : > { %6771 = vmatprep.subr.mxu1 %v8535_v60 }
 0x4ea   : > { %6772 = vmatpush3.msra.mxu1 %v4921_v33 }
 0x4eb   : > { %6773 = vmatprep.subr.mxu1 %v8535_v60 }
 0x4ec   : > { %6774 = vmatpush3.msra.mxu1 %v4920_v32 }
 0x4ed   : > { %6775 = vmatprep.subr.mxu1 %v8535_v60 }
 0x4ee   : > { %6776 = vmatpush3.msra.mxu1 %v4919_v27 }
 0x4ef   : > { %6777 = vmatprep.subr.mxu1 %v8535_v60 }
 0x4f0   : > { %6778 = vmatpush3.msra.mxu1 %v4918_v24 }
 0x4f1   : > { %6779 = vmatprep.subr.mxu1 %v8535_v60 }
 0x4f2   : > { %6780 = vmatpush3.msra.mxu1 %v4917_v23  ;;  %v3959_v22 = vpop.f32.mrf.mxu1  ;;  %v6002_v0 = vpop.f32.mrf.mxu0 }
 0x4f3   : > { %6781 = vmatprep.subr.mxu1 %v8535_v60  ;;  %v3960_v34 = vadd.f32 %v3959_v22, %v3890_v5 }
 0x4f4   : > { %6782 = vmatpush3.msra.mxu1 %v4916_v39  ;;  %v6653_v41 = vpop.f32.mrf.mxu1  ;;  %v6003_v43 = vpop.f32.mrf.mxu0 }
 0x4f5   : > { %6783 = vmatprep.subr.mxu1 %v8535_v60  ;;  %v6004_v46 = vadd.f32 %v6003_v43, %v6002_v0 }
 0x4f6   : > { %6784 = vmatpush3.msra.mxu1 %v4915_v25 }
 0x4f7   : > { %6785 = vmatprep.subr.mxu1 %v8535_v60  ;;  %v4056_v50 = vadd.f32 %v6004_v46, %v3960_v34 }
 0x4f8   : > { %6786 = vmatpush3.msra.mxu1 %v4914_v36 }
 0x4f9   : > { %6787 = vmatprep.subr.mxu1 %v8535_v60 }
 0x4fa   : > { %6788 = vmatpush3.msra.mxu1 %v4913_v47 }
 0x4fb   : > { %6789 = vmatprep.subr.mxu1 %v8535_v60 }
 0x4fc   : > { %6790 = vmatpush3.msra.mxu1 %v4912_v51 }
 0x4fd   : > { %6792 = vmatmul.mubr.f32.vlgmr.msra.gmra.mxu1 %v4948_v15 }
 0x514   : > { %v6037_v52 = vpop.f32.mrf.mxu1  ;;  %v4195_v53 = vpop.f32.mrf.mxu0 }
 0x516   : > { %v6038_v54 = vpop.f32.mrf.mxu1  ;;  %v6688_v55 = vpop.f32.mrf.mxu0 }
 0x517   : > { %v6039_v56 = vadd.f32 %v6038_v54, %v6037_v52 }
 0x519   : > { %v4126_v58 = vadd.f32 %v6039_v56, %v4056_v50 }
 0x51b   : > { %v4196_v61 = vadd.f32 %v4195_v53, %v4126_v58 }
 0x536   : > { %v6089_v62 = vpop.f32.mrf.mxu1  ;;  %v6124_v63 = vpop.f32.mrf.mxu0 }
 0x538   : > { %v6090_v1 = vpop.f32.mrf.mxu1  ;;  %v6125_v3 = vpop.f32.mrf.mxu0 }
 0x539   : > { %v6091_v4 = vadd.f32 %v6090_v1, %v6089_v62  ;;  %v6126_v44 = vadd.f32 %v6125_v3, %v6124_v63 }
 0x53b   : > { %v4447_v7 = vadd.f32 %v6126_v44, %v6091_v4 }
 0x558   : > { %v4516_v60 = vpop.f32.mrf.mxu1  ;;  %v6176_v48 = vpop.f32.mrf.mxu0 }
 0x559   : > { %v4517_v8 = vadd.f32 %v4516_v60, %v4447_v7 }
 0x55a   : > { %v6723_v10 = vpop.f32.mrf.mxu1  ;;  %v6177_v9 = vpop.f32.mrf.mxu0 }
 0x55b   : > { %v4520_v11 = vadd.f32 %v4517_v8, %v4196_v61  ;;  %v6178_v13 = vadd.f32 %v6177_v9, %v6176_v48 }
 0x57a   : > { %v6211_v15 = vpop.f32.mrf.mxu1  ;;  %v4838_v12 = vpop.f32.mrf.mxu0 }
 0x57c   : > { %v6212_v45 = vpop.f32.mrf.mxu1  ;;  %v6758_v59 = vpop.f32.mrf.mxu0 }
 0x57d   : > { %v6213_v14 = vadd.f32 %v6212_v45, %v6211_v15 }
 0x57f   : > { %v4769_v16 = vadd.f32 %v6213_v14, %v6178_v13 }
 0x581   : > { %v4839_v17 = vadd.f32 %v4838_v12, %v4769_v16 }
 0x583   : > { %v4842_v18 = vadd.f32 %v4839_v17, %v4520_v11 }
 0x59c   : > { %v6263_v19 = vpop.f32.mrf.mxu1  ;;  %v6298_v20 = vpop.f32.mrf.mxu0 }
 0x59e   : > { %v6264_v21 = vpop.f32.mrf.mxu1  ;;  %v6299_v30 = vpop.f32.mrf.mxu0 }
 0x59f   : > { %v6265_v29 = vadd.f32 %v6264_v21, %v6263_v19  ;;  %v6300_v5 = vadd.f32 %v6299_v30, %v6298_v20 }
 0x5a1   : > { %v5091_v57 = vadd.f32 %v6300_v5, %v6265_v29 }
 0x5bd   : > { %v5160_v6 = vpop.f32.mrf.mxu1 }
 0x5be   : > { %v5161_v38 = vadd.f32 %v5160_v6, %v5091_v57 }
 0x5bf   : > { %v6793_v35 = vpop.f32.mrf.mxu1 }
 0x5c0   : > { %v5164_v42 = vadd.f32 %v5161_v38, %v4842_v18 }
 0x5c2   : > { %v5166_v40 = vadd.f32 %v5165_v31, %v5164_v42 }
 0x5c4   : > { %vm5167_vm0 = vcmp.gt.f32.partialorder %v5166_v40, 0.0  ;;  %v5168_v49 = vmul.f32 0.01, %v5166_v40 }
 0x5c6   : > { %v5169_v2 = vsel %vm5167_vm0, %v5166_v40, %v5168_v49 }
 0x5c7   : > { %5170 = vst [vmem:[%s431_s17] sm:$0x1] %v5169_v2 }
 0x5c8   : > { %7144 = shalt.err (!%p7141_p0)
}
 0x5c9   : > { %s7145_s22 = scalar_lea.hbm %s8370_s16, 16  ;;  %s7149_s27 = scalar_lea.hbm %s8414_s9, 32 }
 0x5ca   : > { %p7146_p12 = scmp.ne.s32.totalorder %s8370_s16, %s7145_s22  ;;  %p7150_p9 = scmp.lt.s32.totalorder %s8370_s16, %s8414_s9 }
 0x5cb   : > { %p7151_p3 = scmp.lt.s32.totalorder %s7149_s27, %s7145_s22 }
 0x5cc   : > { %p7147_p1 = pnand %p7146_p12, %p8536_p10 }
 0x5cd   : > { %p7152_p5 = por %p7151_p3, %p7150_p9 }
 0x5ce   : > { %p7148_p2 = pneg %p7147_p1 }
 0x5d0   : > { %p7153_p6 = pnand %p7152_p5, %p7148_p2 }
 0x5d2   : > { %7156 = shalt.err (!%p7153_p6)
}
 0x5d3   : > { %6826 = dma.vmem_to_hbm [thread:$0]  (%p8536_p10), %s5185_s21, 16, %s8370_s16, %s5172_s23  }
 0x5d4 PF: > { %p6873_p4 = scmp.ge.s32.totalorder %s7211_s12, 2  ;;  %s5196_s29 = sand.u32 1, %s7199_s30  }
 0x5d5   : > { %p8537_p7 = scmp.ne.s32.totalorder %s8468_s20, 0  ;;  %s5197_s14 = scalar_lea.sflag [#allocation7], %s5196_s29 }
 0x5d7   : > { %p6854_p13 = pnand %p6873_p4, %p8537_p7 }
 0x5d9   : > { %p6855_p8 = pneg %p6854_p13 }
 0x5db   : > { %7194 = dma.done.wait (%p6855_p8), %s5197_s14, 16  }
 0x5dc   : > { %7196 = vsyncadd (%p6855_p8), %s5197_s14, 4294967280  ;;  %p24_p11 = scmp.ge.s32.totalorder %s7306_s15, 4   ;;  %s8538_s30 = smov %s7203_s10 }
 0x5dd   : > { %s8539_s10 = smov %s7207_s11  ;;  %s8540_s11 = smov %s7317_s18 }
 0x5de   : > { %s8541_s12 = smov %s7306_s15  ;;  %26 = sbr.rel (!%p24_p11) target bundleno = 10 (0xa), region = 135 }
 0x5e3   :  { %5201 = vsyncpa [#allocation6], 1 }
 0x5e4   :  { %5203 = vsyncpa [#allocation6 + $0x1], 1 }
 0x5e5   :  { %5204 = vsyncpa [#allocation9], 1 }
 0x5e6   :  { %5205 = vsyncpa [#allocation12], 1 }
 0x5e7   :  { %5206 = vsyncpa [#allocation15], 1 }
 0x5e8   :  { %5207 = vsyncpa [#allocation18], 1 }
 0x5e9   :  { %5208 = vsyncpa [#allocation7], 1 }
 0x5ea   :  { %5210 = vsyncpa [#allocation7 + $0x1], 1 }

</bundles_post_ra>
